<compile_context>
chip_gen: v5e
topology: v5e:2x2
jax: 0.10.0
libtpu: 0.0.40
codegen_flags: <defaults>
</compile_context>

<pallas_src>
import math

import jax
import jax.numpy as jnp
from jax.experimental import pallas as pl
from jax.experimental.pallas import tpu as pltpu


# -----------------------------------------------------------------------------
# Pallas kernel: 2-layer LSTM + self-attention. Whole problem fits in VMEM at
# these sizes, so grid=() and full-array VMEM blocks.
# -----------------------------------------------------------------------------
def lstm_attn_kernel(
    x_ref,      # (S*B, D)     input sequence, seq-major, flattened
    w0x_ref,    # (D, 4H)      W_ih_l0^T  (gate order i,f,g,o along lanes)
    b0_ref,     # (1, 4H)      b_ih_l0 + b_hh_l0
    w0h_ref,    # (4, H, H)    per-gate W_hh_l0^T
    w1x_ref,    # (4, H, H)    per-gate W_ih_l1^T
    w1h_ref,    # (4, H, H)    per-gate W_hh_l1^T
    b1_ref,     # (4, 1, H)    per-gate (b_ih_l1 + b_hh_l1)
    wattT_ref,  # (H, H)       attention W, pre-transposed (y = x @ W^T)
    enh_ref,    # out: (B, 2H) [context ; h_M]
    attn_ref,   # out: (B, S)  attention weights, batch-major
):
    B, S = attn_ref.shape
    H = wattT_ref.shape[0]

    # ---- hoisted weight / bias loads (issued once, reused all S steps) -------
    w0h = [w0h_ref[k] for k in range(4)]                      # each (H, H)
    w1x = [w1x_ref[k] for k in range(4)]
    w1h = [w1h_ref[k] for k in range(4)]
    b1 = [jnp.broadcast_to(b1_ref[k], (B, H)) for k in range(4)]
    watt = wattT_ref[...]

    # ---- hoisted layer-0 input projection: one MXU dot for all timesteps ----
    xp = (
        jnp.dot(x_ref[...], w0x_ref[...], preferred_element_type=jnp.float32)
        + b0_ref[...]
    )                                                          # (S*B, 4H)
    # split per gate once (off the recurrent critical path)
    xp_g = [xp[:, k * H:(k + 1) * H] for k in range(4)]        # each (S*B, H)

    def mm(a, w):
        return jnp.dot(a, w, preferred_element_type=jnp.float32)

    zeros = jnp.zeros((B, H), jnp.float32)
    h0, c0, h1, c1 = zeros, zeros, zeros, zeros
    hs = []                                                    # register-held history

    # Fully unrolled static time loop; recurrence state lives in vregs.
    for t in range(S):
        r = slice(t * B, (t + 1) * B)                          # static row slice
        # ---- layer 0: per-gate, lane-aligned (no concat, no lane slicing) ----
        i0 = jax.nn.sigmoid(xp_g[0][r] + mm(h0, w0h[0]))
        f0 = jax.nn.sigmoid(xp_g[1][r] + mm(h0, w0h[1]))
        g0 = jnp.tanh(      xp_g[2][r] + mm(h0, w0h[2]))
        o0 = jax.nn.sigmoid(xp_g[3][r] + mm(h0, w0h[3]))
        c0 = f0 * c0 + i0 * g0
        h0 = o0 * jnp.tanh(c0)

        # ---- layer 1: split dots instead of [h0;h1] lane concat --------------
        i1 = jax.nn.sigmoid(b1[0] + mm(h0, w1x[0]) + mm(h1, w1h[0]))
        f1 = jax.nn.sigmoid(b1[1] + mm(h0, w1x[1]) + mm(h1, w1h[1]))
        g1 = jnp.tanh(      b1[2] + mm(h0, w1x[2]) + mm(h1, w1h[2]))
        o1 = jax.nn.sigmoid(b1[3] + mm(h0, w1x[3]) + mm(h1, w1h[3]))
        c1 = f1 * c1 + i1 * g1
        h1 = o1 * jnp.tanh(c1)
        hs.append(h1)

    last = h1                                                  # (B, H) == h_M
    lstm_out = jnp.stack(hs, axis=1)                           # (B, S, H), from vregs

    # score(h_s, h_M) = <h_s, h_M @ W^T>, built directly in (B, S) layout.
    w_last = jnp.dot(last, watt, preferred_element_type=jnp.float32)   # (B, H)
    scores = jnp.sum(lstm_out * w_last[:, None, :], axis=2)            # (B, S)

    # numerically-stable softmax over the sequence axis (lanes)
    m = jnp.max(scores, axis=1, keepdims=True)
    e = jnp.exp(scores - m)
    denom = jnp.sum(e, axis=1, keepdims=True)
    attn = e * pl.reciprocal(denom, approx=True)                        # (B, S)

    context = jnp.sum(lstm_out * attn[:, :, None], axis=1)              # (B, H)

    enh_ref[...] = jnp.concatenate([context, last], axis=1).astype(enh_ref.dtype)
    attn_ref[...] = attn.astype(attn_ref.dtype)


# -----------------------------------------------------------------------------
# Wrapper
# -----------------------------------------------------------------------------
def lstm_with_attention(x_bsd, params):
    """x_bsd: (B, S, D) float32. Returns (enhanced (B, 2H), attn (B, S))."""
    B, S, D = x_bsd.shape
    H = params["wattT"].shape[0]
    # seq-major, flattened to (S*B, D) so the hoisted input projection is one dot
    x_flat = jnp.transpose(x_bsd, (1, 0, 2)).reshape(S * B, D)

    # Advisory cost estimate (tiny kernel; helps XLA schedule around it).
    lstm_flops = 2 * S * B * 4 * H * (D + 3 * H)
    attn_flops = 2 * B * H * H + 4 * S * B * H
    transcendentals = 10 * S * B * H + S * B + B
    bytes_accessed = 4 * (
        S * B * D + D * 4 * H + 4 * H + 3 * 4 * H * H + 4 * H
        + H * H + B * 2 * H + B * S
    )

    vmem = pl.BlockSpec(memory_space=pltpu.MemorySpace.VMEM)
    enh, attn = pl.pallas_call(
        lstm_attn_kernel,
        out_shape=(
            jax.ShapeDtypeStruct((B, 2 * H), jnp.float32),
            jax.ShapeDtypeStruct((B, S), jnp.float32),
        ),
        in_specs=[vmem] * 8,
        out_specs=(vmem, vmem),
        cost_estimate=pl.CostEstimate(
            flops=lstm_flops + attn_flops,
            transcendentals=transcendentals,
            bytes_accessed=bytes_accessed,
        ),
    )(
        x_flat,
        params["w0x"], params["b0"],
        params["w0h"], params["w1x"], params["w1h"], params["b1"],
        params["wattT"],
    )
    return enh, attn


# -----------------------------------------------------------------------------
# Parameter construction (deterministic, PyTorch-like uniform init).  Weights
# are pre-transposed and pre-split per gate once at init time so the kernel's
# per-step dots are lane-aligned and concat-free.
# -----------------------------------------------------------------------------
def init_params(key, input_size, hidden_size):
    H = hidden_size
    bound = 1.0 / math.sqrt(H)
    ks = jax.random.split(key, 9)

    def u(k, shape):
        return jax.random.uniform(k, shape, jnp.float32, -bound, bound)

    w_ih_l0 = u(ks[0], (4 * H, input_size))
    w_hh_l0 = u(ks[1], (4 * H, H))
    b_ih_l0 = u(ks[2], (4 * H,))
    b_hh_l0 = u(ks[3], (4 * H,))
    w_ih_l1 = u(ks[4], (4 * H, H))
    w_hh_l1 = u(ks[5], (4 * H, H))
    b_ih_l1 = u(ks[6], (4 * H,))
    b_hh_l1 = u(ks[7], (4 * H,))
    w_att = u(ks[8], (H, H))             # nn.Linear(H, H, bias=False).weight

    def split_gates_T(w):                # (4H, K) -> (4, K, H), per-gate W^T
        return jnp.stack([w[k * H:(k + 1) * H, :].T for k in range(4)], axis=0)

    return {
        "w0x": w_ih_l0.T,                                        # (D, 4H)
        "b0": (b_ih_l0 + b_hh_l0)[None, :],                      # (1, 4H)
        "w0h": split_gates_T(w_hh_l0),                           # (4, H, H)
        "w1x": split_gates_T(w_ih_l1),                           # (4, H, H)
        "w1h": split_gates_T(w_hh_l1),                           # (4, H, H)
        "b1": (b_ih_l1 + b_hh_l1).reshape(4, 1, H),              # (4, 1, H)
        "wattT": w_att.T,                                        # (H, H)
    }


# -----------------------------------------------------------------------------
# Pure-JAX reference (same math as the PyTorch module) for a correctness check.
# Reconstructs the fused PyTorch-style weights from the kernel-layout params.
# -----------------------------------------------------------------------------
def reference_forward(x_bsd, params):
    H = params["wattT"].shape[0]
    B = x_bsd.shape[0]

    w0 = jnp.concatenate(
        [params["w0x"], jnp.concatenate(list(params["w0h"]), axis=1)], axis=0
    )                                                            # (D+H, 4H)
    b0 = params["b0"]                                            # (1, 4H)
    w1 = jnp.concatenate(
        [jnp.concatenate(list(params["w1x"]), axis=1),
         jnp.concatenate(list(params["w1h"]), axis=1)], axis=0
    )                                                            # (2H, 4H)
    b1 = params["b1"].reshape(1, 4 * H)                          # (1, 4H)

    def cell(inp, c, w, b):
        gates = inp @ w + b
        i = jax.nn.sigmoid(gates[:, 0 * H:1 * H])
        f = jax.nn.sigmoid(gates[:, 1 * H:2 * H])
        g = jnp.tanh(gates[:, 2 * H:3 * H])
        o = jax.nn.sigmoid(gates[:, 3 * H:4 * H])
        c_new = f * c + i * g
        return o * jnp.tanh(c_new), c_new

    def step(carry, x_t):
        h0, c0, h1, c1 = carry
        h0, c0 = cell(jnp.concatenate([x_t, h0], axis=1), c0, w0, b0)
        h1, c1 = cell(jnp.concatenate([h0, h1], axis=1), c1, w1, b1)
        return (h0, c0, h1, c1), h1

    z = jnp.zeros((B, H), jnp.float32)
    _, hs = jax.lax.scan(step, (z, z, z, z), jnp.transpose(x_bsd, (1, 0, 2)))
    lstm_out = jnp.transpose(hs, (1, 0, 2))                      # (B, S, H)
    last = lstm_out[:, -1, :]
    scores = jnp.einsum("bsh,bh->bs", lstm_out, last @ params["wattT"])
    attn = jax.nn.softmax(scores, axis=1)
    context = jnp.sum(lstm_out * attn[..., None], axis=1)
    return jnp.concatenate([context, last], axis=1), attn


if __name__ == "__main__":
    B, S, D, H = 2, 8, 16, 32

    root = jax.random.PRNGKey(0)
    k_params, k_x = jax.random.split(root)
    params = init_params(k_params, D, H)
    x = jax.random.normal(k_x, (B, S, D), jnp.float32)

    fwd = jax.jit(lstm_with_attention)
    enh, attn = fwd(x, params)
    enh = jax.block_until_ready(enh)
    attn = jax.block_until_ready(attn)

    assert enh.shape == (B, 2 * H), enh.shape
    assert attn.shape == (B, S), attn.shape
    assert bool(jnp.all(jnp.isfinite(enh)))
    assert bool(jnp.all(jnp.isfinite(attn)))
    # attention weights are softmax-normalized over the sequence axis
    # (tolerance slightly loosened: softmax denominator uses approx reciprocal)
    assert bool(jnp.allclose(jnp.sum(attn, axis=1), 1.0, atol=5e-3))

    # numerics match the pure-JAX reference of the PyTorch forward
    ref_enh, ref_attn = reference_forward(x, params)
    assert bool(jnp.allclose(enh, ref_enh, atol=2e-3, rtol=2e-3))
    assert bool(jnp.allclose(attn, ref_attn, atol=2e-3, rtol=2e-3))

    print("KERNEL_OK")
</pallas_src>

<mosaic_0001>
module attributes {stable_mosaic.version = 11 : i64} {
  func.func @lstm_attn_kernel(%arg0: memref<16x16xf32, #tpu.memory_space<vmem>>, %arg1: memref<16x128xf32, #tpu.memory_space<vmem>>, %arg2: memref<1x128xf32, #tpu.memory_space<vmem>>, %arg3: memref<4x32x32xf32, #tpu.memory_space<vmem>>, %arg4: memref<4x32x32xf32, #tpu.memory_space<vmem>>, %arg5: memref<4x32x32xf32, #tpu.memory_space<vmem>>, %arg6: memref<4x1x32xf32, #tpu.memory_space<vmem>>, %arg7: memref<32x32xf32, #tpu.memory_space<vmem>>, %arg8: memref<2x64xf32, #tpu.memory_space<vmem>>, %arg9: memref<2x8xf32, #tpu.memory_space<vmem>>) attributes {dimension_semantics = [], scalar_prefetch = 0 : i64, scratch_operands = 0 : i64, tpu.core_type = #tpu.core_type<tc>} {
    %c0 = arith.constant 0 : index
    %c0_0 = arith.constant 0 : index
    %c0_1 = arith.constant 0 : index
    %0 = vector.load %arg3[%c0, %c0_0, %c0_1] : memref<4x32x32xf32, #tpu.memory_space<vmem>>, vector<1x32x32xf32>
    %1 = vector.shape_cast %0 : vector<1x32x32xf32> to vector<32x32xf32>
    %c1 = arith.constant 1 : index
    %c0_2 = arith.constant 0 : index
    %c0_3 = arith.constant 0 : index
    %2 = vector.load %arg3[%c1, %c0_2, %c0_3] : memref<4x32x32xf32, #tpu.memory_space<vmem>>, vector<1x32x32xf32>
    %3 = vector.shape_cast %2 : vector<1x32x32xf32> to vector<32x32xf32>
    %c2 = arith.constant 2 : index
    %c0_4 = arith.constant 0 : index
    %c0_5 = arith.constant 0 : index
    %4 = vector.load %arg3[%c2, %c0_4, %c0_5] : memref<4x32x32xf32, #tpu.memory_space<vmem>>, vector<1x32x32xf32>
    %5 = vector.shape_cast %4 : vector<1x32x32xf32> to vector<32x32xf32>
    %c3 = arith.constant 3 : index
    %c0_6 = arith.constant 0 : index
    %c0_7 = arith.constant 0 : index
    %6 = vector.load %arg3[%c3, %c0_6, %c0_7] : memref<4x32x32xf32, #tpu.memory_space<vmem>>, vector<1x32x32xf32>
    %7 = vector.shape_cast %6 : vector<1x32x32xf32> to vector<32x32xf32>
    %c0_8 = arith.constant 0 : index
    %c0_9 = arith.constant 0 : index
    %c0_10 = arith.constant 0 : index
    %8 = vector.load %arg4[%c0_8, %c0_9, %c0_10] : memref<4x32x32xf32, #tpu.memory_space<vmem>>, vector<1x32x32xf32>
    %9 = vector.shape_cast %8 : vector<1x32x32xf32> to vector<32x32xf32>
    %c1_11 = arith.constant 1 : index
    %c0_12 = arith.constant 0 : index
    %c0_13 = arith.constant 0 : index
    %10 = vector.load %arg4[%c1_11, %c0_12, %c0_13] : memref<4x32x32xf32, #tpu.memory_space<vmem>>, vector<1x32x32xf32>
    %11 = vector.shape_cast %10 : vector<1x32x32xf32> to vector<32x32xf32>
    %c2_14 = arith.constant 2 : index
    %c0_15 = arith.constant 0 : index
    %c0_16 = arith.constant 0 : index
    %12 = vector.load %arg4[%c2_14, %c0_15, %c0_16] : memref<4x32x32xf32, #tpu.memory_space<vmem>>, vector<1x32x32xf32>
    %13 = vector.shape_cast %12 : vector<1x32x32xf32> to vector<32x32xf32>
    %c3_17 = arith.constant 3 : index
    %c0_18 = arith.constant 0 : index
    %c0_19 = arith.constant 0 : index
    %14 = vector.load %arg4[%c3_17, %c0_18, %c0_19] : memref<4x32x32xf32, #tpu.memory_space<vmem>>, vector<1x32x32xf32>
    %15 = vector.shape_cast %14 : vector<1x32x32xf32> to vector<32x32xf32>
    %c0_20 = arith.constant 0 : index
    %c0_21 = arith.constant 0 : index
    %c0_22 = arith.constant 0 : index
    %16 = vector.load %arg5[%c0_20, %c0_21, %c0_22] : memref<4x32x32xf32, #tpu.memory_space<vmem>>, vector<1x32x32xf32>
    %17 = vector.shape_cast %16 : vector<1x32x32xf32> to vector<32x32xf32>
    %c1_23 = arith.constant 1 : index
    %c0_24 = arith.constant 0 : index
    %c0_25 = arith.constant 0 : index
    %18 = vector.load %arg5[%c1_23, %c0_24, %c0_25] : memref<4x32x32xf32, #tpu.memory_space<vmem>>, vector<1x32x32xf32>
    %19 = vector.shape_cast %18 : vector<1x32x32xf32> to vector<32x32xf32>
    %c2_26 = arith.constant 2 : index
    %c0_27 = arith.constant 0 : index
    %c0_28 = arith.constant 0 : index
    %20 = vector.load %arg5[%c2_26, %c0_27, %c0_28] : memref<4x32x32xf32, #tpu.memory_space<vmem>>, vector<1x32x32xf32>
    %21 = vector.shape_cast %20 : vector<1x32x32xf32> to vector<32x32xf32>
    %c3_29 = arith.constant 3 : index
    %c0_30 = arith.constant 0 : index
    %c0_31 = arith.constant 0 : index
    %22 = vector.load %arg5[%c3_29, %c0_30, %c0_31] : memref<4x32x32xf32, #tpu.memory_space<vmem>>, vector<1x32x32xf32>
    %23 = vector.shape_cast %22 : vector<1x32x32xf32> to vector<32x32xf32>
    %c0_32 = arith.constant 0 : index
    %c0_33 = arith.constant 0 : index
    %c0_34 = arith.constant 0 : index
    %24 = vector.load %arg6[%c0_32, %c0_33, %c0_34] : memref<4x1x32xf32, #tpu.memory_space<vmem>>, vector<1x1x32xf32>
    %25 = vector.shape_cast %24 : vector<1x1x32xf32> to vector<1x32xf32>
    %26 = vector.shape_cast %25 : vector<1x32xf32> to vector<1x32xf32>
    %27 = vector.broadcast %26 : vector<1x32xf32> to vector<2x32xf32>
    %c1_35 = arith.constant 1 : index
    %c0_36 = arith.constant 0 : index
    %c0_37 = arith.constant 0 : index
    %28 = vector.load %arg6[%c1_35, %c0_36, %c0_37] : memref<4x1x32xf32, #tpu.memory_space<vmem>>, vector<1x1x32xf32>
    %29 = vector.shape_cast %28 : vector<1x1x32xf32> to vector<1x32xf32>
    %30 = vector.shape_cast %29 : vector<1x32xf32> to vector<1x32xf32>
    %31 = vector.broadcast %30 : vector<1x32xf32> to vector<2x32xf32>
    %c2_38 = arith.constant 2 : index
    %c0_39 = arith.constant 0 : index
    %c0_40 = arith.constant 0 : index
    %32 = vector.load %arg6[%c2_38, %c0_39, %c0_40] : memref<4x1x32xf32, #tpu.memory_space<vmem>>, vector<1x1x32xf32>
    %33 = vector.shape_cast %32 : vector<1x1x32xf32> to vector<1x32xf32>
    %34 = vector.shape_cast %33 : vector<1x32xf32> to vector<1x32xf32>
    %35 = vector.broadcast %34 : vector<1x32xf32> to vector<2x32xf32>
    %c3_41 = arith.constant 3 : index
    %c0_42 = arith.constant 0 : index
    %c0_43 = arith.constant 0 : index
    %36 = vector.load %arg6[%c3_41, %c0_42, %c0_43] : memref<4x1x32xf32, #tpu.memory_space<vmem>>, vector<1x1x32xf32>
    %37 = vector.shape_cast %36 : vector<1x1x32xf32> to vector<1x32xf32>
    %38 = vector.shape_cast %37 : vector<1x32xf32> to vector<1x32xf32>
    %39 = vector.broadcast %38 : vector<1x32xf32> to vector<2x32xf32>
    %c0_44 = arith.constant 0 : index
    %c0_45 = arith.constant 0 : index
    %40 = vector.load %arg7[%c0_44, %c0_45] : memref<32x32xf32, #tpu.memory_space<vmem>>, vector<32x32xf32>
    %c0_46 = arith.constant 0 : index
    %c0_47 = arith.constant 0 : index
    %41 = vector.load %arg0[%c0_46, %c0_47] : memref<16x16xf32, #tpu.memory_space<vmem>>, vector<16x16xf32>
    %c0_48 = arith.constant 0 : index
    %c0_49 = arith.constant 0 : index
    %42 = vector.load %arg1[%c0_48, %c0_49] : memref<16x128xf32, #tpu.memory_space<vmem>>, vector<16x128xf32>
    %cst = arith.constant dense<0.000000e+00> : vector<16x128xf32>
    %43 = tpu.matmul %41, %42, %cst {dimension_numbers = #tpu.dot_dimension_numbers<[1], [0], [0], [1], [0, 0, 1, 1], [], []>} : vector<16x16xf32>, vector<16x128xf32>, vector<16x128xf32> -> vector<16x128xf32>
    %c0_50 = arith.constant 0 : index
    %c0_51 = arith.constant 0 : index
    %44 = vector.load %arg2[%c0_50, %c0_51] : memref<1x128xf32, #tpu.memory_space<vmem>>, vector<1x128xf32>
    %45 = vector.broadcast %44 : vector<1x128xf32> to vector<16x128xf32>
    %46 = arith.addf %43, %45 : vector<16x128xf32>
    %47 = vector.extract_strided_slice %46 {offsets = [0, 0], sizes = [16, 32], strides = [1, 1]} : vector<16x128xf32> to vector<16x32xf32>
    %48 = vector.extract_strided_slice %46 {offsets = [0, 32], sizes = [16, 32], strides = [1, 1]} : vector<16x128xf32> to vector<16x32xf32>
    %49 = vector.extract_strided_slice %46 {offsets = [0, 64], sizes = [16, 32], strides = [1, 1]} : vector<16x128xf32> to vector<16x32xf32>
    %50 = vector.extract_strided_slice %46 {offsets = [0, 96], sizes = [16, 32], strides = [1, 1]} : vector<16x128xf32> to vector<16x32xf32>
    %cst_52 = arith.constant 0.000000e+00 : f32
    %51 = vector.broadcast %cst_52 : f32 to vector<2x32xf32>
    %52 = vector.extract_strided_slice %47 {offsets = [0, 0], sizes = [2, 32], strides = [1, 1]} : vector<16x32xf32> to vector<2x32xf32>
    %cst_53 = arith.constant dense<0.000000e+00> : vector<2x32xf32>
    %53 = tpu.matmul %51, %1, %cst_53 {dimension_numbers = #tpu.dot_dimension_numbers<[1], [0], [0], [1], [0, 0, 1, 1], [], []>} : vector<2x32xf32>, vector<32x32xf32>, vector<2x32xf32> -> vector<2x32xf32>
    %54 = arith.addf %52, %53 : vector<2x32xf32>
    %55 = arith.negf %54 : vector<2x32xf32>
    %56 = math.exp %55 : vector<2x32xf32>
    %cst_54 = arith.constant 1.000000e+00 : f32
    %57 = vector.broadcast %cst_54 : f32 to vector<2x32xf32>
    %58 = arith.addf %57, %56 : vector<2x32xf32>
    %59 = arith.divf %57, %58 : vector<2x32xf32>
    %60 = vector.extract_strided_slice %48 {offsets = [0, 0], sizes = [2, 32], strides = [1, 1]} : vector<16x32xf32> to vector<2x32xf32>
    %cst_55 = arith.constant dense<0.000000e+00> : vector<2x32xf32>
    %61 = tpu.matmul %51, %3, %cst_55 {dimension_numbers = #tpu.dot_dimension_numbers<[1], [0], [0], [1], [0, 0, 1, 1], [], []>} : vector<2x32xf32>, vector<32x32xf32>, vector<2x32xf32> -> vector<2x32xf32>
    %62 = arith.addf %60, %61 : vector<2x32xf32>
    %63 = arith.negf %62 : vector<2x32xf32>
    %64 = math.exp %63 : vector<2x32xf32>
    %cst_56 = arith.constant 1.000000e+00 : f32
    %65 = vector.broadcast %cst_56 : f32 to vector<2x32xf32>
    %66 = arith.addf %65, %64 : vector<2x32xf32>
    %67 = arith.divf %65, %66 : vector<2x32xf32>
    %68 = vector.extract_strided_slice %49 {offsets = [0, 0], sizes = [2, 32], strides = [1, 1]} : vector<16x32xf32> to vector<2x32xf32>
    %cst_57 = arith.constant dense<0.000000e+00> : vector<2x32xf32>
    %69 = tpu.matmul %51, %5, %cst_57 {dimension_numbers = #tpu.dot_dimension_numbers<[1], [0], [0], [1], [0, 0, 1, 1], [], []>} : vector<2x32xf32>, vector<32x32xf32>, vector<2x32xf32> -> vector<2x32xf32>
    %70 = arith.addf %68, %69 : vector<2x32xf32>
    %71 = math.tanh %70 : vector<2x32xf32>
    %72 = vector.extract_strided_slice %50 {offsets = [0, 0], sizes = [2, 32], strides = [1, 1]} : vector<16x32xf32> to vector<2x32xf32>
    %cst_58 = arith.constant dense<0.000000e+00> : vector<2x32xf32>
    %73 = tpu.matmul %51, %7, %cst_58 {dimension_numbers = #tpu.dot_dimension_numbers<[1], [0], [0], [1], [0, 0, 1, 1], [], []>} : vector<2x32xf32>, vector<32x32xf32>, vector<2x32xf32> -> vector<2x32xf32>
    %74 = arith.addf %72, %73 : vector<2x32xf32>
    %75 = arith.negf %74 : vector<2x32xf32>
    %76 = math.exp %75 : vector<2x32xf32>
    %cst_59 = arith.constant 1.000000e+00 : f32
    %77 = vector.broadcast %cst_59 : f32 to vector<2x32xf32>
    %78 = arith.addf %77, %76 : vector<2x32xf32>
    %79 = arith.divf %77, %78 : vector<2x32xf32>
    %80 = arith.mulf %67, %51 : vector<2x32xf32>
    %81 = arith.mulf %59, %71 : vector<2x32xf32>
    %82 = arith.addf %80, %81 : vector<2x32xf32>
    %83 = math.tanh %82 : vector<2x32xf32>
    %84 = arith.mulf %79, %83 : vector<2x32xf32>
    %cst_60 = arith.constant dense<0.000000e+00> : vector<2x32xf32>
    %85 = tpu.matmul %84, %9, %cst_60 {dimension_numbers = #tpu.dot_dimension_numbers<[1], [0], [0], [1], [0, 0, 1, 1], [], []>} : vector<2x32xf32>, vector<32x32xf32>, vector<2x32xf32> -> vector<2x32xf32>
    %86 = arith.addf %27, %85 : vector<2x32xf32>
    %cst_61 = arith.constant dense<0.000000e+00> : vector<2x32xf32>
    %87 = tpu.matmul %51, %17, %cst_61 {dimension_numbers = #tpu.dot_dimension_numbers<[1], [0], [0], [1], [0, 0, 1, 1], [], []>} : vector<2x32xf32>, vector<32x32xf32>, vector<2x32xf32> -> vector<2x32xf32>
    %88 = arith.addf %86, %87 : vector<2x32xf32>
    %89 = arith.negf %88 : vector<2x32xf32>
    %90 = math.exp %89 : vector<2x32xf32>
    %cst_62 = arith.constant 1.000000e+00 : f32
    %91 = vector.broadcast %cst_62 : f32 to vector<2x32xf32>
    %92 = arith.addf %91, %90 : vector<2x32xf32>
    %93 = arith.divf %91, %92 : vector<2x32xf32>
    %cst_63 = arith.constant dense<0.000000e+00> : vector<2x32xf32>
    %94 = tpu.matmul %84, %11, %cst_63 {dimension_numbers = #tpu.dot_dimension_numbers<[1], [0], [0], [1], [0, 0, 1, 1], [], []>} : vector<2x32xf32>, vector<32x32xf32>, vector<2x32xf32> -> vector<2x32xf32>
    %95 = arith.addf %31, %94 : vector<2x32xf32>
    %cst_64 = arith.constant dense<0.000000e+00> : vector<2x32xf32>
    %96 = tpu.matmul %51, %19, %cst_64 {dimension_numbers = #tpu.dot_dimension_numbers<[1], [0], [0], [1], [0, 0, 1, 1], [], []>} : vector<2x32xf32>, vector<32x32xf32>, vector<2x32xf32> -> vector<2x32xf32>
    %97 = arith.addf %95, %96 : vector<2x32xf32>
    %98 = arith.negf %97 : vector<2x32xf32>
    %99 = math.exp %98 : vector<2x32xf32>
    %cst_65 = arith.constant 1.000000e+00 : f32
    %100 = vector.broadcast %cst_65 : f32 to vector<2x32xf32>
    %101 = arith.addf %100, %99 : vector<2x32xf32>
    %102 = arith.divf %100, %101 : vector<2x32xf32>
    %cst_66 = arith.constant dense<0.000000e+00> : vector<2x32xf32>
    %103 = tpu.matmul %84, %13, %cst_66 {dimension_numbers = #tpu.dot_dimension_numbers<[1], [0], [0], [1], [0, 0, 1, 1], [], []>} : vector<2x32xf32>, vector<32x32xf32>, vector<2x32xf32> -> vector<2x32xf32>
    %104 = arith.addf %35, %103 : vector<2x32xf32>
    %cst_67 = arith.constant dense<0.000000e+00> : vector<2x32xf32>
    %105 = tpu.matmul %51, %21, %cst_67 {dimension_numbers = #tpu.dot_dimension_numbers<[1], [0], [0], [1], [0, 0, 1, 1], [], []>} : vector<2x32xf32>, vector<32x32xf32>, vector<2x32xf32> -> vector<2x32xf32>
    %106 = arith.addf %104, %105 : vector<2x32xf32>
    %107 = math.tanh %106 : vector<2x32xf32>
    %cst_68 = arith.constant dense<0.000000e+00> : vector<2x32xf32>
    %108 = tpu.matmul %84, %15, %cst_68 {dimension_numbers = #tpu.dot_dimension_numbers<[1], [0], [0], [1], [0, 0, 1, 1], [], []>} : vector<2x32xf32>, vector<32x32xf32>, vector<2x32xf32> -> vector<2x32xf32>
    %109 = arith.addf %39, %108 : vector<2x32xf32>
    %cst_69 = arith.constant dense<0.000000e+00> : vector<2x32xf32>
    %110 = tpu.matmul %51, %23, %cst_69 {dimension_numbers = #tpu.dot_dimension_numbers<[1], [0], [0], [1], [0, 0, 1, 1], [], []>} : vector<2x32xf32>, vector<32x32xf32>, vector<2x32xf32> -> vector<2x32xf32>
    %111 = arith.addf %109, %110 : vector<2x32xf32>
    %112 = arith.negf %111 : vector<2x32xf32>
    %113 = math.exp %112 : vector<2x32xf32>
    %cst_70 = arith.constant 1.000000e+00 : f32
    %114 = vector.broadcast %cst_70 : f32 to vector<2x32xf32>
    %115 = arith.addf %114, %113 : vector<2x32xf32>
    %116 = arith.divf %114, %115 : vector<2x32xf32>
    %117 = arith.mulf %102, %51 : vector<2x32xf32>
    %118 = arith.mulf %93, %107 : vector<2x32xf32>
    %119 = arith.addf %117, %118 : vector<2x32xf32>
    %120 = math.tanh %119 : vector<2x32xf32>
    %121 = arith.mulf %116, %120 : vector<2x32xf32>
    %122 = vector.extract_strided_slice %47 {offsets = [2, 0], sizes = [2, 32], strides = [1, 1]} : vector<16x32xf32> to vector<2x32xf32>
    %cst_71 = arith.constant dense<0.000000e+00> : vector<2x32xf32>
    %123 = tpu.matmul %84, %1, %cst_71 {dimension_numbers = #tpu.dot_dimension_numbers<[1], [0], [0], [1], [0, 0, 1, 1], [], []>} : vector<2x32xf32>, vector<32x32xf32>, vector<2x32xf32> -> vector<2x32xf32>
    %124 = arith.addf %122, %123 : vector<2x32xf32>
    %125 = arith.negf %124 : vector<2x32xf32>
    %126 = math.exp %125 : vector<2x32xf32>
    %cst_72 = arith.constant 1.000000e+00 : f32
    %127 = vector.broadcast %cst_72 : f32 to vector<2x32xf32>
    %128 = arith.addf %127, %126 : vector<2x32xf32>
    %129 = arith.divf %127, %128 : vector<2x32xf32>
    %130 = vector.extract_strided_slice %48 {offsets = [2, 0], sizes = [2, 32], strides = [1, 1]} : vector<16x32xf32> to vector<2x32xf32>
    %cst_73 = arith.constant dense<0.000000e+00> : vector<2x32xf32>
    %131 = tpu.matmul %84, %3, %cst_73 {dimension_numbers = #tpu.dot_dimension_numbers<[1], [0], [0], [1], [0, 0, 1, 1], [], []>} : vector<2x32xf32>, vector<32x32xf32>, vector<2x32xf32> -> vector<2x32xf32>
    %132 = arith.addf %130, %131 : vector<2x32xf32>
    %133 = arith.negf %132 : vector<2x32xf32>
    %134 = math.exp %133 : vector<2x32xf32>
    %cst_74 = arith.constant 1.000000e+00 : f32
    %135 = vector.broadcast %cst_74 : f32 to vector<2x32xf32>
    %136 = arith.addf %135, %134 : vector<2x32xf32>
    %137 = arith.divf %135, %136 : vector<2x32xf32>
    %138 = vector.extract_strided_slice %49 {offsets = [2, 0], sizes = [2, 32], strides = [1, 1]} : vector<16x32xf32> to vector<2x32xf32>
    %cst_75 = arith.constant dense<0.000000e+00> : vector<2x32xf32>
    %139 = tpu.matmul %84, %5, %cst_75 {dimension_numbers = #tpu.dot_dimension_numbers<[1], [0], [0], [1], [0, 0, 1, 1], [], []>} : vector<2x32xf32>, vector<32x32xf32>, vector<2x32xf32> -> vector<2x32xf32>
    %140 = arith.addf %138, %139 : vector<2x32xf32>
    %141 = math.tanh %140 : vector<2x32xf32>
    %142 = vector.extract_strided_slice %50 {offsets = [2, 0], sizes = [2, 32], strides = [1, 1]} : vector<16x32xf32> to vector<2x32xf32>
    %cst_76 = arith.constant dense<0.000000e+00> : vector<2x32xf32>
    %143 = tpu.matmul %84, %7, %cst_76 {dimension_numbers = #tpu.dot_dimension_numbers<[1], [0], [0], [1], [0, 0, 1, 1], [], []>} : vector<2x32xf32>, vector<32x32xf32>, vector<2x32xf32> -> vector<2x32xf32>
    %144 = arith.addf %142, %143 : vector<2x32xf32>
    %145 = arith.negf %144 : vector<2x32xf32>
    %146 = math.exp %145 : vector<2x32xf32>
    %cst_77 = arith.constant 1.000000e+00 : f32
    %147 = vector.broadcast %cst_77 : f32 to vector<2x32xf32>
    %148 = arith.addf %147, %146 : vector<2x32xf32>
    %149 = arith.divf %147, %148 : vector<2x32xf32>
    %150 = arith.mulf %137, %82 : vector<2x32xf32>
    %151 = arith.mulf %129, %141 : vector<2x32xf32>
    %152 = arith.addf %150, %151 : vector<2x32xf32>
    %153 = math.tanh %152 : vector<2x32xf32>
    %154 = arith.mulf %149, %153 : vector<2x32xf32>
    %cst_78 = arith.constant dense<0.000000e+00> : vector<2x32xf32>
    %155 = tpu.matmul %154, %9, %cst_78 {dimension_numbers = #tpu.dot_dimension_numbers<[1], [0], [0], [1], [0, 0, 1, 1], [], []>} : vector<2x32xf32>, vector<32x32xf32>, vector<2x32xf32> -> vector<2x32xf32>
    %156 = arith.addf %27, %155 : vector<2x32xf32>
    %cst_79 = arith.constant dense<0.000000e+00> : vector<2x32xf32>
    %157 = tpu.matmul %121, %17, %cst_79 {dimension_numbers = #tpu.dot_dimension_numbers<[1], [0], [0], [1], [0, 0, 1, 1], [], []>} : vector<2x32xf32>, vector<32x32xf32>, vector<2x32xf32> -> vector<2x32xf32>
    %158 = arith.addf %156, %157 : vector<2x32xf32>
    %159 = arith.negf %158 : vector<2x32xf32>
    %160 = math.exp %159 : vector<2x32xf32>
    %cst_80 = arith.constant 1.000000e+00 : f32
    %161 = vector.broadcast %cst_80 : f32 to vector<2x32xf32>
    %162 = arith.addf %161, %160 : vector<2x32xf32>
    %163 = arith.divf %161, %162 : vector<2x32xf32>
    %cst_81 = arith.constant dense<0.000000e+00> : vector<2x32xf32>
    %164 = tpu.matmul %154, %11, %cst_81 {dimension_numbers = #tpu.dot_dimension_numbers<[1], [0], [0], [1], [0, 0, 1, 1], [], []>} : vector<2x32xf32>, vector<32x32xf32>, vector<2x32xf32> -> vector<2x32xf32>
    %165 = arith.addf %31, %164 : vector<2x32xf32>
    %cst_82 = arith.constant dense<0.000000e+00> : vector<2x32xf32>
    %166 = tpu.matmul %121, %19, %cst_82 {dimension_numbers = #tpu.dot_dimension_numbers<[1], [0], [0], [1], [0, 0, 1, 1], [], []>} : vector<2x32xf32>, vector<32x32xf32>, vector<2x32xf32> -> vector<2x32xf32>
    %167 = arith.addf %165, %166 : vector<2x32xf32>
    %168 = arith.negf %167 : vector<2x32xf32>
    %169 = math.exp %168 : vector<2x32xf32>
    %cst_83 = arith.constant 1.000000e+00 : f32
    %170 = vector.broadcast %cst_83 : f32 to vector<2x32xf32>
    %171 = arith.addf %170, %169 : vector<2x32xf32>
    %172 = arith.divf %170, %171 : vector<2x32xf32>
    %cst_84 = arith.constant dense<0.000000e+00> : vector<2x32xf32>
    %173 = tpu.matmul %154, %13, %cst_84 {dimension_numbers = #tpu.dot_dimension_numbers<[1], [0], [0], [1], [0, 0, 1, 1], [], []>} : vector<2x32xf32>, vector<32x32xf32>, vector<2x32xf32> -> vector<2x32xf32>
    %174 = arith.addf %35, %173 : vector<2x32xf32>
    %cst_85 = arith.constant dense<0.000000e+00> : vector<2x32xf32>
    %175 = tpu.matmul %121, %21, %cst_85 {dimension_numbers = #tpu.dot_dimension_numbers<[1], [0], [0], [1], [0, 0, 1, 1], [], []>} : vector<2x32xf32>, vector<32x32xf32>, vector<2x32xf32> -> vector<2x32xf32>
    %176 = arith.addf %174, %175 : vector<2x32xf32>
    %177 = math.tanh %176 : vector<2x32xf32>
    %cst_86 = arith.constant dense<0.000000e+00> : vector<2x32xf32>
    %178 = tpu.matmul %154, %15, %cst_86 {dimension_numbers = #tpu.dot_dimension_numbers<[1], [0], [0], [1], [0, 0, 1, 1], [], []>} : vector<2x32xf32>, vector<32x32xf32>, vector<2x32xf32> -> vector<2x32xf32>
    %179 = arith.addf %39, %178 : vector<2x32xf32>
    %cst_87 = arith.constant dense<0.000000e+00> : vector<2x32xf32>
    %180 = tpu.matmul %121, %23, %cst_87 {dimension_numbers = #tpu.dot_dimension_numbers<[1], [0], [0], [1], [0, 0, 1, 1], [], []>} : vector<2x32xf32>, vector<32x32xf32>, vector<2x32xf32> -> vector<2x32xf32>
    %181 = arith.addf %179, %180 : vector<2x32xf32>
    %182 = arith.negf %181 : vector<2x32xf32>
    %183 = math.exp %182 : vector<2x32xf32>
    %cst_88 = arith.constant 1.000000e+00 : f32
    %184 = vector.broadcast %cst_88 : f32 to vector<2x32xf32>
    %185 = arith.addf %184, %183 : vector<2x32xf32>
    %186 = arith.divf %184, %185 : vector<2x32xf32>
    %187 = arith.mulf %172, %119 : vector<2x32xf32>
    %188 = arith.mulf %163, %177 : vector<2x32xf32>
    %189 = arith.addf %187, %188 : vector<2x32xf32>
    %190 = math.tanh %189 : vector<2x32xf32>
    %191 = arith.mulf %186, %190 : vector<2x32xf32>
    %192 = vector.extract_strided_slice %47 {offsets = [4, 0], sizes = [2, 32], strides = [1, 1]} : vector<16x32xf32> to vector<2x32xf32>
    %cst_89 = arith.constant dense<0.000000e+00> : vector<2x32xf32>
    %193 = tpu.matmul %154, %1, %cst_89 {dimension_numbers = #tpu.dot_dimension_numbers<[1], [0], [0], [1], [0, 0, 1, 1], [], []>} : vector<2x32xf32>, vector<32x32xf32>, vector<2x32xf32> -> vector<2x32xf32>
    %194 = arith.addf %192, %193 : vector<2x32xf32>
    %195 = arith.negf %194 : vector<2x32xf32>
    %196 = math.exp %195 : vector<2x32xf32>
    %cst_90 = arith.constant 1.000000e+00 : f32
    %197 = vector.broadcast %cst_90 : f32 to vector<2x32xf32>
    %198 = arith.addf %197, %196 : vector<2x32xf32>
    %199 = arith.divf %197, %198 : vector<2x32xf32>
    %200 = vector.extract_strided_slice %48 {offsets = [4, 0], sizes = [2, 32], strides = [1, 1]} : vector<16x32xf32> to vector<2x32xf32>
    %cst_91 = arith.constant dense<0.000000e+00> : vector<2x32xf32>
    %201 = tpu.matmul %154, %3, %cst_91 {dimension_numbers = #tpu.dot_dimension_numbers<[1], [0], [0], [1], [0, 0, 1, 1], [], []>} : vector<2x32xf32>, vector<32x32xf32>, vector<2x32xf32> -> vector<2x32xf32>
    %202 = arith.addf %200, %201 : vector<2x32xf32>
    %203 = arith.negf %202 : vector<2x32xf32>
    %204 = math.exp %203 : vector<2x32xf32>
    %cst_92 = arith.constant 1.000000e+00 : f32
    %205 = vector.broadcast %cst_92 : f32 to vector<2x32xf32>
    %206 = arith.addf %205, %204 : vector<2x32xf32>
    %207 = arith.divf %205, %206 : vector<2x32xf32>
    %208 = vector.extract_strided_slice %49 {offsets = [4, 0], sizes = [2, 32], strides = [1, 1]} : vector<16x32xf32> to vector<2x32xf32>
    %cst_93 = arith.constant dense<0.000000e+00> : vector<2x32xf32>
    %209 = tpu.matmul %154, %5, %cst_93 {dimension_numbers = #tpu.dot_dimension_numbers<[1], [0], [0], [1], [0, 0, 1, 1], [], []>} : vector<2x32xf32>, vector<32x32xf32>, vector<2x32xf32> -> vector<2x32xf32>
    %210 = arith.addf %208, %209 : vector<2x32xf32>
    %211 = math.tanh %210 : vector<2x32xf32>
    %212 = vector.extract_strided_slice %50 {offsets = [4, 0], sizes = [2, 32], strides = [1, 1]} : vector<16x32xf32> to vector<2x32xf32>
    %cst_94 = arith.constant dense<0.000000e+00> : vector<2x32xf32>
    %213 = tpu.matmul %154, %7, %cst_94 {dimension_numbers = #tpu.dot_dimension_numbers<[1], [0], [0], [1], [0, 0, 1, 1], [], []>} : vector<2x32xf32>, vector<32x32xf32>, vector<2x32xf32> -> vector<2x32xf32>
    %214 = arith.addf %212, %213 : vector<2x32xf32>
    %215 = arith.negf %214 : vector<2x32xf32>
    %216 = math.exp %215 : vector<2x32xf32>
    %cst_95 = arith.constant 1.000000e+00 : f32
    %217 = vector.broadcast %cst_95 : f32 to vector<2x32xf32>
    %218 = arith.addf %217, %216 : vector<2x32xf32>
    %219 = arith.divf %217, %218 : vector<2x32xf32>
    %220 = arith.mulf %207, %152 : vector<2x32xf32>
    %221 = arith.mulf %199, %211 : vector<2x32xf32>
    %222 = arith.addf %220, %221 : vector<2x32xf32>
    %223 = math.tanh %222 : vector<2x32xf32>
    %224 = arith.mulf %219, %223 : vector<2x32xf32>
    %cst_96 = arith.constant dense<0.000000e+00> : vector<2x32xf32>
    %225 = tpu.matmul %224, %9, %cst_96 {dimension_numbers = #tpu.dot_dimension_numbers<[1], [0], [0], [1], [0, 0, 1, 1], [], []>} : vector<2x32xf32>, vector<32x32xf32>, vector<2x32xf32> -> vector<2x32xf32>
    %226 = arith.addf %27, %225 : vector<2x32xf32>
    %cst_97 = arith.constant dense<0.000000e+00> : vector<2x32xf32>
    %227 = tpu.matmul %191, %17, %cst_97 {dimension_numbers = #tpu.dot_dimension_numbers<[1], [0], [0], [1], [0, 0, 1, 1], [], []>} : vector<2x32xf32>, vector<32x32xf32>, vector<2x32xf32> -> vector<2x32xf32>
    %228 = arith.addf %226, %227 : vector<2x32xf32>
    %229 = arith.negf %228 : vector<2x32xf32>
    %230 = math.exp %229 : vector<2x32xf32>
    %cst_98 = arith.constant 1.000000e+00 : f32
    %231 = vector.broadcast %cst_98 : f32 to vector<2x32xf32>
    %232 = arith.addf %231, %230 : vector<2x32xf32>
    %233 = arith.divf %231, %232 : vector<2x32xf32>
    %cst_99 = arith.constant dense<0.000000e+00> : vector<2x32xf32>
    %234 = tpu.matmul %224, %11, %cst_99 {dimension_numbers = #tpu.dot_dimension_numbers<[1], [0], [0], [1], [0, 0, 1, 1], [], []>} : vector<2x32xf32>, vector<32x32xf32>, vector<2x32xf32> -> vector<2x32xf32>
    %235 = arith.addf %31, %234 : vector<2x32xf32>
    %cst_100 = arith.constant dense<0.000000e+00> : vector<2x32xf32>
    %236 = tpu.matmul %191, %19, %cst_100 {dimension_numbers = #tpu.dot_dimension_numbers<[1], [0], [0], [1], [0, 0, 1, 1], [], []>} : vector<2x32xf32>, vector<32x32xf32>, vector<2x32xf32> -> vector<2x32xf32>
    %237 = arith.addf %235, %236 : vector<2x32xf32>
    %238 = arith.negf %237 : vector<2x32xf32>
    %239 = math.exp %238 : vector<2x32xf32>
    %cst_101 = arith.constant 1.000000e+00 : f32
    %240 = vector.broadcast %cst_101 : f32 to vector<2x32xf32>
    %241 = arith.addf %240, %239 : vector<2x32xf32>
    %242 = arith.divf %240, %241 : vector<2x32xf32>
    %cst_102 = arith.constant dense<0.000000e+00> : vector<2x32xf32>
    %243 = tpu.matmul %224, %13, %cst_102 {dimension_numbers = #tpu.dot_dimension_numbers<[1], [0], [0], [1], [0, 0, 1, 1], [], []>} : vector<2x32xf32>, vector<32x32xf32>, vector<2x32xf32> -> vector<2x32xf32>
    %244 = arith.addf %35, %243 : vector<2x32xf32>
    %cst_103 = arith.constant dense<0.000000e+00> : vector<2x32xf32>
    %245 = tpu.matmul %191, %21, %cst_103 {dimension_numbers = #tpu.dot_dimension_numbers<[1], [0], [0], [1], [0, 0, 1, 1], [], []>} : vector<2x32xf32>, vector<32x32xf32>, vector<2x32xf32> -> vector<2x32xf32>
    %246 = arith.addf %244, %245 : vector<2x32xf32>
    %247 = math.tanh %246 : vector<2x32xf32>
    %cst_104 = arith.constant dense<0.000000e+00> : vector<2x32xf32>
    %248 = tpu.matmul %224, %15, %cst_104 {dimension_numbers = #tpu.dot_dimension_numbers<[1], [0], [0], [1], [0, 0, 1, 1], [], []>} : vector<2x32xf32>, vector<32x32xf32>, vector<2x32xf32> -> vector<2x32xf32>
    %249 = arith.addf %39, %248 : vector<2x32xf32>
    %cst_105 = arith.constant dense<0.000000e+00> : vector<2x32xf32>
    %250 = tpu.matmul %191, %23, %cst_105 {dimension_numbers = #tpu.dot_dimension_numbers<[1], [0], [0], [1], [0, 0, 1, 1], [], []>} : vector<2x32xf32>, vector<32x32xf32>, vector<2x32xf32> -> vector<2x32xf32>
    %251 = arith.addf %249, %250 : vector<2x32xf32>
    %252 = arith.negf %251 : vector<2x32xf32>
    %253 = math.exp %252 : vector<2x32xf32>
    %cst_106 = arith.constant 1.000000e+00 : f32
    %254 = vector.broadcast %cst_106 : f32 to vector<2x32xf32>
    %255 = arith.addf %254, %253 : vector<2x32xf32>
    %256 = arith.divf %254, %255 : vector<2x32xf32>
    %257 = arith.mulf %242, %189 : vector<2x32xf32>
    %258 = arith.mulf %233, %247 : vector<2x32xf32>
    %259 = arith.addf %257, %258 : vector<2x32xf32>
    %260 = math.tanh %259 : vector<2x32xf32>
    %261 = arith.mulf %256, %260 : vector<2x32xf32>
    %262 = vector.extract_strided_slice %47 {offsets = [6, 0], sizes = [2, 32], strides = [1, 1]} : vector<16x32xf32> to vector<2x32xf32>
    %cst_107 = arith.constant dense<0.000000e+00> : vector<2x32xf32>
    %263 = tpu.matmul %224, %1, %cst_107 {dimension_numbers = #tpu.dot_dimension_numbers<[1], [0], [0], [1], [0, 0, 1, 1], [], []>} : vector<2x32xf32>, vector<32x32xf32>, vector<2x32xf32> -> vector<2x32xf32>
    %264 = arith.addf %262, %263 : vector<2x32xf32>
    %265 = arith.negf %264 : vector<2x32xf32>
    %266 = math.exp %265 : vector<2x32xf32>
    %cst_108 = arith.constant 1.000000e+00 : f32
    %267 = vector.broadcast %cst_108 : f32 to vector<2x32xf32>
    %268 = arith.addf %267, %266 : vector<2x32xf32>
    %269 = arith.divf %267, %268 : vector<2x32xf32>
    %270 = vector.extract_strided_slice %48 {offsets = [6, 0], sizes = [2, 32], strides = [1, 1]} : vector<16x32xf32> to vector<2x32xf32>
    %cst_109 = arith.constant dense<0.000000e+00> : vector<2x32xf32>
    %271 = tpu.matmul %224, %3, %cst_109 {dimension_numbers = #tpu.dot_dimension_numbers<[1], [0], [0], [1], [0, 0, 1, 1], [], []>} : vector<2x32xf32>, vector<32x32xf32>, vector<2x32xf32> -> vector<2x32xf32>
    %272 = arith.addf %270, %271 : vector<2x32xf32>
    %273 = arith.negf %272 : vector<2x32xf32>
    %274 = math.exp %273 : vector<2x32xf32>
    %cst_110 = arith.constant 1.000000e+00 : f32
    %275 = vector.broadcast %cst_110 : f32 to vector<2x32xf32>
    %276 = arith.addf %275, %274 : vector<2x32xf32>
    %277 = arith.divf %275, %276 : vector<2x32xf32>
    %278 = vector.extract_strided_slice %49 {offsets = [6, 0], sizes = [2, 32], strides = [1, 1]} : vector<16x32xf32> to vector<2x32xf32>
    %cst_111 = arith.constant dense<0.000000e+00> : vector<2x32xf32>
    %279 = tpu.matmul %224, %5, %cst_111 {dimension_numbers = #tpu.dot_dimension_numbers<[1], [0], [0], [1], [0, 0, 1, 1], [], []>} : vector<2x32xf32>, vector<32x32xf32>, vector<2x32xf32> -> vector<2x32xf32>
    %280 = arith.addf %278, %279 : vector<2x32xf32>
    %281 = math.tanh %280 : vector<2x32xf32>
    %282 = vector.extract_strided_slice %50 {offsets = [6, 0], sizes = [2, 32], strides = [1, 1]} : vector<16x32xf32> to vector<2x32xf32>
    %cst_112 = arith.constant dense<0.000000e+00> : vector<2x32xf32>
    %283 = tpu.matmul %224, %7, %cst_112 {dimension_numbers = #tpu.dot_dimension_numbers<[1], [0], [0], [1], [0, 0, 1, 1], [], []>} : vector<2x32xf32>, vector<32x32xf32>, vector<2x32xf32> -> vector<2x32xf32>
    %284 = arith.addf %282, %283 : vector<2x32xf32>
    %285 = arith.negf %284 : vector<2x32xf32>
    %286 = math.exp %285 : vector<2x32xf32>
    %cst_113 = arith.constant 1.000000e+00 : f32
    %287 = vector.broadcast %cst_113 : f32 to vector<2x32xf32>
    %288 = arith.addf %287, %286 : vector<2x32xf32>
    %289 = arith.divf %287, %288 : vector<2x32xf32>
    %290 = arith.mulf %277, %222 : vector<2x32xf32>
    %291 = arith.mulf %269, %281 : vector<2x32xf32>
    %292 = arith.addf %290, %291 : vector<2x32xf32>
    %293 = math.tanh %292 : vector<2x32xf32>
    %294 = arith.mulf %289, %293 : vector<2x32xf32>
    %cst_114 = arith.constant dense<0.000000e+00> : vector<2x32xf32>
    %295 = tpu.matmul %294, %9, %cst_114 {dimension_numbers = #tpu.dot_dimension_numbers<[1], [0], [0], [1], [0, 0, 1, 1], [], []>} : vector<2x32xf32>, vector<32x32xf32>, vector<2x32xf32> -> vector<2x32xf32>
    %296 = arith.addf %27, %295 : vector<2x32xf32>
    %cst_115 = arith.constant dense<0.000000e+00> : vector<2x32xf32>
    %297 = tpu.matmul %261, %17, %cst_115 {dimension_numbers = #tpu.dot_dimension_numbers<[1], [0], [0], [1], [0, 0, 1, 1], [], []>} : vector<2x32xf32>, vector<32x32xf32>, vector<2x32xf32> -> vector<2x32xf32>
    %298 = arith.addf %296, %297 : vector<2x32xf32>
    %299 = arith.negf %298 : vector<2x32xf32>
    %300 = math.exp %299 : vector<2x32xf32>
    %cst_116 = arith.constant 1.000000e+00 : f32
    %301 = vector.broadcast %cst_116 : f32 to vector<2x32xf32>
    %302 = arith.addf %301, %300 : vector<2x32xf32>
    %303 = arith.divf %301, %302 : vector<2x32xf32>
    %cst_117 = arith.constant dense<0.000000e+00> : vector<2x32xf32>
    %304 = tpu.matmul %294, %11, %cst_117 {dimension_numbers = #tpu.dot_dimension_numbers<[1], [0], [0], [1], [0, 0, 1, 1], [], []>} : vector<2x32xf32>, vector<32x32xf32>, vector<2x32xf32> -> vector<2x32xf32>
    %305 = arith.addf %31, %304 : vector<2x32xf32>
    %cst_118 = arith.constant dense<0.000000e+00> : vector<2x32xf32>
    %306 = tpu.matmul %261, %19, %cst_118 {dimension_numbers = #tpu.dot_dimension_numbers<[1], [0], [0], [1], [0, 0, 1, 1], [], []>} : vector<2x32xf32>, vector<32x32xf32>, vector<2x32xf32> -> vector<2x32xf32>
    %307 = arith.addf %305, %306 : vector<2x32xf32>
    %308 = arith.negf %307 : vector<2x32xf32>
    %309 = math.exp %308 : vector<2x32xf32>
    %cst_119 = arith.constant 1.000000e+00 : f32
    %310 = vector.broadcast %cst_119 : f32 to vector<2x32xf32>
    %311 = arith.addf %310, %309 : vector<2x32xf32>
    %312 = arith.divf %310, %311 : vector<2x32xf32>
    %cst_120 = arith.constant dense<0.000000e+00> : vector<2x32xf32>
    %313 = tpu.matmul %294, %13, %cst_120 {dimension_numbers = #tpu.dot_dimension_numbers<[1], [0], [0], [1], [0, 0, 1, 1], [], []>} : vector<2x32xf32>, vector<32x32xf32>, vector<2x32xf32> -> vector<2x32xf32>
    %314 = arith.addf %35, %313 : vector<2x32xf32>
    %cst_121 = arith.constant dense<0.000000e+00> : vector<2x32xf32>
    %315 = tpu.matmul %261, %21, %cst_121 {dimension_numbers = #tpu.dot_dimension_numbers<[1], [0], [0], [1], [0, 0, 1, 1], [], []>} : vector<2x32xf32>, vector<32x32xf32>, vector<2x32xf32> -> vector<2x32xf32>
    %316 = arith.addf %314, %315 : vector<2x32xf32>
    %317 = math.tanh %316 : vector<2x32xf32>
    %cst_122 = arith.constant dense<0.000000e+00> : vector<2x32xf32>
    %318 = tpu.matmul %294, %15, %cst_122 {dimension_numbers = #tpu.dot_dimension_numbers<[1], [0], [0], [1], [0, 0, 1, 1], [], []>} : vector<2x32xf32>, vector<32x32xf32>, vector<2x32xf32> -> vector<2x32xf32>
    %319 = arith.addf %39, %318 : vector<2x32xf32>
    %cst_123 = arith.constant dense<0.000000e+00> : vector<2x32xf32>
    %320 = tpu.matmul %261, %23, %cst_123 {dimension_numbers = #tpu.dot_dimension_numbers<[1], [0], [0], [1], [0, 0, 1, 1], [], []>} : vector<2x32xf32>, vector<32x32xf32>, vector<2x32xf32> -> vector<2x32xf32>
    %321 = arith.addf %319, %320 : vector<2x32xf32>
    %322 = arith.negf %321 : vector<2x32xf32>
    %323 = math.exp %322 : vector<2x32xf32>
    %cst_124 = arith.constant 1.000000e+00 : f32
    %324 = vector.broadcast %cst_124 : f32 to vector<2x32xf32>
    %325 = arith.addf %324, %323 : vector<2x32xf32>
    %326 = arith.divf %324, %325 : vector<2x32xf32>
    %327 = arith.mulf %312, %259 : vector<2x32xf32>
    %328 = arith.mulf %303, %317 : vector<2x32xf32>
    %329 = arith.addf %327, %328 : vector<2x32xf32>
    %330 = math.tanh %329 : vector<2x32xf32>
    %331 = arith.mulf %326, %330 : vector<2x32xf32>
    %332 = vector.extract_strided_slice %47 {offsets = [8, 0], sizes = [2, 32], strides = [1, 1]} : vector<16x32xf32> to vector<2x32xf32>
    %cst_125 = arith.constant dense<0.000000e+00> : vector<2x32xf32>
    %333 = tpu.matmul %294, %1, %cst_125 {dimension_numbers = #tpu.dot_dimension_numbers<[1], [0], [0], [1], [0, 0, 1, 1], [], []>} : vector<2x32xf32>, vector<32x32xf32>, vector<2x32xf32> -> vector<2x32xf32>
    %334 = arith.addf %332, %333 : vector<2x32xf32>
    %335 = arith.negf %334 : vector<2x32xf32>
    %336 = math.exp %335 : vector<2x32xf32>
    %cst_126 = arith.constant 1.000000e+00 : f32
    %337 = vector.broadcast %cst_126 : f32 to vector<2x32xf32>
    %338 = arith.addf %337, %336 : vector<2x32xf32>
    %339 = arith.divf %337, %338 : vector<2x32xf32>
    %340 = vector.extract_strided_slice %48 {offsets = [8, 0], sizes = [2, 32], strides = [1, 1]} : vector<16x32xf32> to vector<2x32xf32>
    %cst_127 = arith.constant dense<0.000000e+00> : vector<2x32xf32>
    %341 = tpu.matmul %294, %3, %cst_127 {dimension_numbers = #tpu.dot_dimension_numbers<[1], [0], [0], [1], [0, 0, 1, 1], [], []>} : vector<2x32xf32>, vector<32x32xf32>, vector<2x32xf32> -> vector<2x32xf32>
    %342 = arith.addf %340, %341 : vector<2x32xf32>
    %343 = arith.negf %342 : vector<2x32xf32>
    %344 = math.exp %343 : vector<2x32xf32>
    %cst_128 = arith.constant 1.000000e+00 : f32
    %345 = vector.broadcast %cst_128 : f32 to vector<2x32xf32>
    %346 = arith.addf %345, %344 : vector<2x32xf32>
    %347 = arith.divf %345, %346 : vector<2x32xf32>
    %348 = vector.extract_strided_slice %49 {offsets = [8, 0], sizes = [2, 32], strides = [1, 1]} : vector<16x32xf32> to vector<2x32xf32>
    %cst_129 = arith.constant dense<0.000000e+00> : vector<2x32xf32>
    %349 = tpu.matmul %294, %5, %cst_129 {dimension_numbers = #tpu.dot_dimension_numbers<[1], [0], [0], [1], [0, 0, 1, 1], [], []>} : vector<2x32xf32>, vector<32x32xf32>, vector<2x32xf32> -> vector<2x32xf32>
    %350 = arith.addf %348, %349 : vector<2x32xf32>
    %351 = math.tanh %350 : vector<2x32xf32>
    %352 = vector.extract_strided_slice %50 {offsets = [8, 0], sizes = [2, 32], strides = [1, 1]} : vector<16x32xf32> to vector<2x32xf32>
    %cst_130 = arith.constant dense<0.000000e+00> : vector<2x32xf32>
    %353 = tpu.matmul %294, %7, %cst_130 {dimension_numbers = #tpu.dot_dimension_numbers<[1], [0], [0], [1], [0, 0, 1, 1], [], []>} : vector<2x32xf32>, vector<32x32xf32>, vector<2x32xf32> -> vector<2x32xf32>
    %354 = arith.addf %352, %353 : vector<2x32xf32>
    %355 = arith.negf %354 : vector<2x32xf32>
    %356 = math.exp %355 : vector<2x32xf32>
    %cst_131 = arith.constant 1.000000e+00 : f32
    %357 = vector.broadcast %cst_131 : f32 to vector<2x32xf32>
    %358 = arith.addf %357, %356 : vector<2x32xf32>
    %359 = arith.divf %357, %358 : vector<2x32xf32>
    %360 = arith.mulf %347, %292 : vector<2x32xf32>
    %361 = arith.mulf %339, %351 : vector<2x32xf32>
    %362 = arith.addf %360, %361 : vector<2x32xf32>
    %363 = math.tanh %362 : vector<2x32xf32>
    %364 = arith.mulf %359, %363 : vector<2x32xf32>
    %cst_132 = arith.constant dense<0.000000e+00> : vector<2x32xf32>
    %365 = tpu.matmul %364, %9, %cst_132 {dimension_numbers = #tpu.dot_dimension_numbers<[1], [0], [0], [1], [0, 0, 1, 1], [], []>} : vector<2x32xf32>, vector<32x32xf32>, vector<2x32xf32> -> vector<2x32xf32>
    %366 = arith.addf %27, %365 : vector<2x32xf32>
    %cst_133 = arith.constant dense<0.000000e+00> : vector<2x32xf32>
    %367 = tpu.matmul %331, %17, %cst_133 {dimension_numbers = #tpu.dot_dimension_numbers<[1], [0], [0], [1], [0, 0, 1, 1], [], []>} : vector<2x32xf32>, vector<32x32xf32>, vector<2x32xf32> -> vector<2x32xf32>
    %368 = arith.addf %366, %367 : vector<2x32xf32>
    %369 = arith.negf %368 : vector<2x32xf32>
    %370 = math.exp %369 : vector<2x32xf32>
    %cst_134 = arith.constant 1.000000e+00 : f32
    %371 = vector.broadcast %cst_134 : f32 to vector<2x32xf32>
    %372 = arith.addf %371, %370 : vector<2x32xf32>
    %373 = arith.divf %371, %372 : vector<2x32xf32>
    %cst_135 = arith.constant dense<0.000000e+00> : vector<2x32xf32>
    %374 = tpu.matmul %364, %11, %cst_135 {dimension_numbers = #tpu.dot_dimension_numbers<[1], [0], [0], [1], [0, 0, 1, 1], [], []>} : vector<2x32xf32>, vector<32x32xf32>, vector<2x32xf32> -> vector<2x32xf32>
    %375 = arith.addf %31, %374 : vector<2x32xf32>
    %cst_136 = arith.constant dense<0.000000e+00> : vector<2x32xf32>
    %376 = tpu.matmul %331, %19, %cst_136 {dimension_numbers = #tpu.dot_dimension_numbers<[1], [0], [0], [1], [0, 0, 1, 1], [], []>} : vector<2x32xf32>, vector<32x32xf32>, vector<2x32xf32> -> vector<2x32xf32>
    %377 = arith.addf %375, %376 : vector<2x32xf32>
    %378 = arith.negf %377 : vector<2x32xf32>
    %379 = math.exp %378 : vector<2x32xf32>
    %cst_137 = arith.constant 1.000000e+00 : f32
    %380 = vector.broadcast %cst_137 : f32 to vector<2x32xf32>
    %381 = arith.addf %380, %379 : vector<2x32xf32>
    %382 = arith.divf %380, %381 : vector<2x32xf32>
    %cst_138 = arith.constant dense<0.000000e+00> : vector<2x32xf32>
    %383 = tpu.matmul %364, %13, %cst_138 {dimension_numbers = #tpu.dot_dimension_numbers<[1], [0], [0], [1], [0, 0, 1, 1], [], []>} : vector<2x32xf32>, vector<32x32xf32>, vector<2x32xf32> -> vector<2x32xf32>
    %384 = arith.addf %35, %383 : vector<2x32xf32>
    %cst_139 = arith.constant dense<0.000000e+00> : vector<2x32xf32>
    %385 = tpu.matmul %331, %21, %cst_139 {dimension_numbers = #tpu.dot_dimension_numbers<[1], [0], [0], [1], [0, 0, 1, 1], [], []>} : vector<2x32xf32>, vector<32x32xf32>, vector<2x32xf32> -> vector<2x32xf32>
    %386 = arith.addf %384, %385 : vector<2x32xf32>
    %387 = math.tanh %386 : vector<2x32xf32>
    %cst_140 = arith.constant dense<0.000000e+00> : vector<2x32xf32>
    %388 = tpu.matmul %364, %15, %cst_140 {dimension_numbers = #tpu.dot_dimension_numbers<[1], [0], [0], [1], [0, 0, 1, 1], [], []>} : vector<2x32xf32>, vector<32x32xf32>, vector<2x32xf32> -> vector<2x32xf32>
    %389 = arith.addf %39, %388 : vector<2x32xf32>
    %cst_141 = arith.constant dense<0.000000e+00> : vector<2x32xf32>
    %390 = tpu.matmul %331, %23, %cst_141 {dimension_numbers = #tpu.dot_dimension_numbers<[1], [0], [0], [1], [0, 0, 1, 1], [], []>} : vector<2x32xf32>, vector<32x32xf32>, vector<2x32xf32> -> vector<2x32xf32>
    %391 = arith.addf %389, %390 : vector<2x32xf32>
    %392 = arith.negf %391 : vector<2x32xf32>
    %393 = math.exp %392 : vector<2x32xf32>
    %cst_142 = arith.constant 1.000000e+00 : f32
    %394 = vector.broadcast %cst_142 : f32 to vector<2x32xf32>
    %395 = arith.addf %394, %393 : vector<2x32xf32>
    %396 = arith.divf %394, %395 : vector<2x32xf32>
    %397 = arith.mulf %382, %329 : vector<2x32xf32>
    %398 = arith.mulf %373, %387 : vector<2x32xf32>
    %399 = arith.addf %397, %398 : vector<2x32xf32>
    %400 = math.tanh %399 : vector<2x32xf32>
    %401 = arith.mulf %396, %400 : vector<2x32xf32>
    %402 = vector.extract_strided_slice %47 {offsets = [10, 0], sizes = [2, 32], strides = [1, 1]} : vector<16x32xf32> to vector<2x32xf32>
    %cst_143 = arith.constant dense<0.000000e+00> : vector<2x32xf32>
    %403 = tpu.matmul %364, %1, %cst_143 {dimension_numbers = #tpu.dot_dimension_numbers<[1], [0], [0], [1], [0, 0, 1, 1], [], []>} : vector<2x32xf32>, vector<32x32xf32>, vector<2x32xf32> -> vector<2x32xf32>
    %404 = arith.addf %402, %403 : vector<2x32xf32>
    %405 = arith.negf %404 : vector<2x32xf32>
    %406 = math.exp %405 : vector<2x32xf32>
    %cst_144 = arith.constant 1.000000e+00 : f32
    %407 = vector.broadcast %cst_144 : f32 to vector<2x32xf32>
    %408 = arith.addf %407, %406 : vector<2x32xf32>
    %409 = arith.divf %407, %408 : vector<2x32xf32>
    %410 = vector.extract_strided_slice %48 {offsets = [10, 0], sizes = [2, 32], strides = [1, 1]} : vector<16x32xf32> to vector<2x32xf32>
    %cst_145 = arith.constant dense<0.000000e+00> : vector<2x32xf32>
    %411 = tpu.matmul %364, %3, %cst_145 {dimension_numbers = #tpu.dot_dimension_numbers<[1], [0], [0], [1], [0, 0, 1, 1], [], []>} : vector<2x32xf32>, vector<32x32xf32>, vector<2x32xf32> -> vector<2x32xf32>
    %412 = arith.addf %410, %411 : vector<2x32xf32>
    %413 = arith.negf %412 : vector<2x32xf32>
    %414 = math.exp %413 : vector<2x32xf32>
    %cst_146 = arith.constant 1.000000e+00 : f32
    %415 = vector.broadcast %cst_146 : f32 to vector<2x32xf32>
    %416 = arith.addf %415, %414 : vector<2x32xf32>
    %417 = arith.divf %415, %416 : vector<2x32xf32>
    %418 = vector.extract_strided_slice %49 {offsets = [10, 0], sizes = [2, 32], strides = [1, 1]} : vector<16x32xf32> to vector<2x32xf32>
    %cst_147 = arith.constant dense<0.000000e+00> : vector<2x32xf32>
    %419 = tpu.matmul %364, %5, %cst_147 {dimension_numbers = #tpu.dot_dimension_numbers<[1], [0], [0], [1], [0, 0, 1, 1], [], []>} : vector<2x32xf32>, vector<32x32xf32>, vector<2x32xf32> -> vector<2x32xf32>
    %420 = arith.addf %418, %419 : vector<2x32xf32>
    %421 = math.tanh %420 : vector<2x32xf32>
    %422 = vector.extract_strided_slice %50 {offsets = [10, 0], sizes = [2, 32], strides = [1, 1]} : vector<16x32xf32> to vector<2x32xf32>
    %cst_148 = arith.constant dense<0.000000e+00> : vector<2x32xf32>
    %423 = tpu.matmul %364, %7, %cst_148 {dimension_numbers = #tpu.dot_dimension_numbers<[1], [0], [0], [1], [0, 0, 1, 1], [], []>} : vector<2x32xf32>, vector<32x32xf32>, vector<2x32xf32> -> vector<2x32xf32>
    %424 = arith.addf %422, %423 : vector<2x32xf32>
    %425 = arith.negf %424 : vector<2x32xf32>
    %426 = math.exp %425 : vector<2x32xf32>
    %cst_149 = arith.constant 1.000000e+00 : f32
    %427 = vector.broadcast %cst_149 : f32 to vector<2x32xf32>
    %428 = arith.addf %427, %426 : vector<2x32xf32>
    %429 = arith.divf %427, %428 : vector<2x32xf32>
    %430 = arith.mulf %417, %362 : vector<2x32xf32>
    %431 = arith.mulf %409, %421 : vector<2x32xf32>
    %432 = arith.addf %430, %431 : vector<2x32xf32>
    %433 = math.tanh %432 : vector<2x32xf32>
    %434 = arith.mulf %429, %433 : vector<2x32xf32>
    %cst_150 = arith.constant dense<0.000000e+00> : vector<2x32xf32>
    %435 = tpu.matmul %434, %9, %cst_150 {dimension_numbers = #tpu.dot_dimension_numbers<[1], [0], [0], [1], [0, 0, 1, 1], [], []>} : vector<2x32xf32>, vector<32x32xf32>, vector<2x32xf32> -> vector<2x32xf32>
    %436 = arith.addf %27, %435 : vector<2x32xf32>
    %cst_151 = arith.constant dense<0.000000e+00> : vector<2x32xf32>
    %437 = tpu.matmul %401, %17, %cst_151 {dimension_numbers = #tpu.dot_dimension_numbers<[1], [0], [0], [1], [0, 0, 1, 1], [], []>} : vector<2x32xf32>, vector<32x32xf32>, vector<2x32xf32> -> vector<2x32xf32>
    %438 = arith.addf %436, %437 : vector<2x32xf32>
    %439 = arith.negf %438 : vector<2x32xf32>
    %440 = math.exp %439 : vector<2x32xf32>
    %cst_152 = arith.constant 1.000000e+00 : f32
    %441 = vector.broadcast %cst_152 : f32 to vector<2x32xf32>
    %442 = arith.addf %441, %440 : vector<2x32xf32>
    %443 = arith.divf %441, %442 : vector<2x32xf32>
    %cst_153 = arith.constant dense<0.000000e+00> : vector<2x32xf32>
    %444 = tpu.matmul %434, %11, %cst_153 {dimension_numbers = #tpu.dot_dimension_numbers<[1], [0], [0], [1], [0, 0, 1, 1], [], []>} : vector<2x32xf32>, vector<32x32xf32>, vector<2x32xf32> -> vector<2x32xf32>
    %445 = arith.addf %31, %444 : vector<2x32xf32>
    %cst_154 = arith.constant dense<0.000000e+00> : vector<2x32xf32>
    %446 = tpu.matmul %401, %19, %cst_154 {dimension_numbers = #tpu.dot_dimension_numbers<[1], [0], [0], [1], [0, 0, 1, 1], [], []>} : vector<2x32xf32>, vector<32x32xf32>, vector<2x32xf32> -> vector<2x32xf32>
    %447 = arith.addf %445, %446 : vector<2x32xf32>
    %448 = arith.negf %447 : vector<2x32xf32>
    %449 = math.exp %448 : vector<2x32xf32>
    %cst_155 = arith.constant 1.000000e+00 : f32
    %450 = vector.broadcast %cst_155 : f32 to vector<2x32xf32>
    %451 = arith.addf %450, %449 : vector<2x32xf32>
    %452 = arith.divf %450, %451 : vector<2x32xf32>
    %cst_156 = arith.constant dense<0.000000e+00> : vector<2x32xf32>
    %453 = tpu.matmul %434, %13, %cst_156 {dimension_numbers = #tpu.dot_dimension_numbers<[1], [0], [0], [1], [0, 0, 1, 1], [], []>} : vector<2x32xf32>, vector<32x32xf32>, vector<2x32xf32> -> vector<2x32xf32>
    %454 = arith.addf %35, %453 : vector<2x32xf32>
    %cst_157 = arith.constant dense<0.000000e+00> : vector<2x32xf32>
    %455 = tpu.matmul %401, %21, %cst_157 {dimension_numbers = #tpu.dot_dimension_numbers<[1], [0], [0], [1], [0, 0, 1, 1], [], []>} : vector<2x32xf32>, vector<32x32xf32>, vector<2x32xf32> -> vector<2x32xf32>
    %456 = arith.addf %454, %455 : vector<2x32xf32>
    %457 = math.tanh %456 : vector<2x32xf32>
    %cst_158 = arith.constant dense<0.000000e+00> : vector<2x32xf32>
    %458 = tpu.matmul %434, %15, %cst_158 {dimension_numbers = #tpu.dot_dimension_numbers<[1], [0], [0], [1], [0, 0, 1, 1], [], []>} : vector<2x32xf32>, vector<32x32xf32>, vector<2x32xf32> -> vector<2x32xf32>
    %459 = arith.addf %39, %458 : vector<2x32xf32>
    %cst_159 = arith.constant dense<0.000000e+00> : vector<2x32xf32>
    %460 = tpu.matmul %401, %23, %cst_159 {dimension_numbers = #tpu.dot_dimension_numbers<[1], [0], [0], [1], [0, 0, 1, 1], [], []>} : vector<2x32xf32>, vector<32x32xf32>, vector<2x32xf32> -> vector<2x32xf32>
    %461 = arith.addf %459, %460 : vector<2x32xf32>
    %462 = arith.negf %461 : vector<2x32xf32>
    %463 = math.exp %462 : vector<2x32xf32>
    %cst_160 = arith.constant 1.000000e+00 : f32
    %464 = vector.broadcast %cst_160 : f32 to vector<2x32xf32>
    %465 = arith.addf %464, %463 : vector<2x32xf32>
    %466 = arith.divf %464, %465 : vector<2x32xf32>
    %467 = arith.mulf %452, %399 : vector<2x32xf32>
    %468 = arith.mulf %443, %457 : vector<2x32xf32>
    %469 = arith.addf %467, %468 : vector<2x32xf32>
    %470 = math.tanh %469 : vector<2x32xf32>
    %471 = arith.mulf %466, %470 : vector<2x32xf32>
    %472 = vector.extract_strided_slice %47 {offsets = [12, 0], sizes = [2, 32], strides = [1, 1]} : vector<16x32xf32> to vector<2x32xf32>
    %cst_161 = arith.constant dense<0.000000e+00> : vector<2x32xf32>
    %473 = tpu.matmul %434, %1, %cst_161 {dimension_numbers = #tpu.dot_dimension_numbers<[1], [0], [0], [1], [0, 0, 1, 1], [], []>} : vector<2x32xf32>, vector<32x32xf32>, vector<2x32xf32> -> vector<2x32xf32>
    %474 = arith.addf %472, %473 : vector<2x32xf32>
    %475 = arith.negf %474 : vector<2x32xf32>
    %476 = math.exp %475 : vector<2x32xf32>
    %cst_162 = arith.constant 1.000000e+00 : f32
    %477 = vector.broadcast %cst_162 : f32 to vector<2x32xf32>
    %478 = arith.addf %477, %476 : vector<2x32xf32>
    %479 = arith.divf %477, %478 : vector<2x32xf32>
    %480 = vector.extract_strided_slice %48 {offsets = [12, 0], sizes = [2, 32], strides = [1, 1]} : vector<16x32xf32> to vector<2x32xf32>
    %cst_163 = arith.constant dense<0.000000e+00> : vector<2x32xf32>
    %481 = tpu.matmul %434, %3, %cst_163 {dimension_numbers = #tpu.dot_dimension_numbers<[1], [0], [0], [1], [0, 0, 1, 1], [], []>} : vector<2x32xf32>, vector<32x32xf32>, vector<2x32xf32> -> vector<2x32xf32>
    %482 = arith.addf %480, %481 : vector<2x32xf32>
    %483 = arith.negf %482 : vector<2x32xf32>
    %484 = math.exp %483 : vector<2x32xf32>
    %cst_164 = arith.constant 1.000000e+00 : f32
    %485 = vector.broadcast %cst_164 : f32 to vector<2x32xf32>
    %486 = arith.addf %485, %484 : vector<2x32xf32>
    %487 = arith.divf %485, %486 : vector<2x32xf32>
    %488 = vector.extract_strided_slice %49 {offsets = [12, 0], sizes = [2, 32], strides = [1, 1]} : vector<16x32xf32> to vector<2x32xf32>
    %cst_165 = arith.constant dense<0.000000e+00> : vector<2x32xf32>
    %489 = tpu.matmul %434, %5, %cst_165 {dimension_numbers = #tpu.dot_dimension_numbers<[1], [0], [0], [1], [0, 0, 1, 1], [], []>} : vector<2x32xf32>, vector<32x32xf32>, vector<2x32xf32> -> vector<2x32xf32>
    %490 = arith.addf %488, %489 : vector<2x32xf32>
    %491 = math.tanh %490 : vector<2x32xf32>
    %492 = vector.extract_strided_slice %50 {offsets = [12, 0], sizes = [2, 32], strides = [1, 1]} : vector<16x32xf32> to vector<2x32xf32>
    %cst_166 = arith.constant dense<0.000000e+00> : vector<2x32xf32>
    %493 = tpu.matmul %434, %7, %cst_166 {dimension_numbers = #tpu.dot_dimension_numbers<[1], [0], [0], [1], [0, 0, 1, 1], [], []>} : vector<2x32xf32>, vector<32x32xf32>, vector<2x32xf32> -> vector<2x32xf32>
    %494 = arith.addf %492, %493 : vector<2x32xf32>
    %495 = arith.negf %494 : vector<2x32xf32>
    %496 = math.exp %495 : vector<2x32xf32>
    %cst_167 = arith.constant 1.000000e+00 : f32
    %497 = vector.broadcast %cst_167 : f32 to vector<2x32xf32>
    %498 = arith.addf %497, %496 : vector<2x32xf32>
    %499 = arith.divf %497, %498 : vector<2x32xf32>
    %500 = arith.mulf %487, %432 : vector<2x32xf32>
    %501 = arith.mulf %479, %491 : vector<2x32xf32>
    %502 = arith.addf %500, %501 : vector<2x32xf32>
    %503 = math.tanh %502 : vector<2x32xf32>
    %504 = arith.mulf %499, %503 : vector<2x32xf32>
    %cst_168 = arith.constant dense<0.000000e+00> : vector<2x32xf32>
    %505 = tpu.matmul %504, %9, %cst_168 {dimension_numbers = #tpu.dot_dimension_numbers<[1], [0], [0], [1], [0, 0, 1, 1], [], []>} : vector<2x32xf32>, vector<32x32xf32>, vector<2x32xf32> -> vector<2x32xf32>
    %506 = arith.addf %27, %505 : vector<2x32xf32>
    %cst_169 = arith.constant dense<0.000000e+00> : vector<2x32xf32>
    %507 = tpu.matmul %471, %17, %cst_169 {dimension_numbers = #tpu.dot_dimension_numbers<[1], [0], [0], [1], [0, 0, 1, 1], [], []>} : vector<2x32xf32>, vector<32x32xf32>, vector<2x32xf32> -> vector<2x32xf32>
    %508 = arith.addf %506, %507 : vector<2x32xf32>
    %509 = arith.negf %508 : vector<2x32xf32>
    %510 = math.exp %509 : vector<2x32xf32>
    %cst_170 = arith.constant 1.000000e+00 : f32
    %511 = vector.broadcast %cst_170 : f32 to vector<2x32xf32>
    %512 = arith.addf %511, %510 : vector<2x32xf32>
    %513 = arith.divf %511, %512 : vector<2x32xf32>
    %cst_171 = arith.constant dense<0.000000e+00> : vector<2x32xf32>
    %514 = tpu.matmul %504, %11, %cst_171 {dimension_numbers = #tpu.dot_dimension_numbers<[1], [0], [0], [1], [0, 0, 1, 1], [], []>} : vector<2x32xf32>, vector<32x32xf32>, vector<2x32xf32> -> vector<2x32xf32>
    %515 = arith.addf %31, %514 : vector<2x32xf32>
    %cst_172 = arith.constant dense<0.000000e+00> : vector<2x32xf32>
    %516 = tpu.matmul %471, %19, %cst_172 {dimension_numbers = #tpu.dot_dimension_numbers<[1], [0], [0], [1], [0, 0, 1, 1], [], []>} : vector<2x32xf32>, vector<32x32xf32>, vector<2x32xf32> -> vector<2x32xf32>
    %517 = arith.addf %515, %516 : vector<2x32xf32>
    %518 = arith.negf %517 : vector<2x32xf32>
    %519 = math.exp %518 : vector<2x32xf32>
    %cst_173 = arith.constant 1.000000e+00 : f32
    %520 = vector.broadcast %cst_173 : f32 to vector<2x32xf32>
    %521 = arith.addf %520, %519 : vector<2x32xf32>
    %522 = arith.divf %520, %521 : vector<2x32xf32>
    %cst_174 = arith.constant dense<0.000000e+00> : vector<2x32xf32>
    %523 = tpu.matmul %504, %13, %cst_174 {dimension_numbers = #tpu.dot_dimension_numbers<[1], [0], [0], [1], [0, 0, 1, 1], [], []>} : vector<2x32xf32>, vector<32x32xf32>, vector<2x32xf32> -> vector<2x32xf32>
    %524 = arith.addf %35, %523 : vector<2x32xf32>
    %cst_175 = arith.constant dense<0.000000e+00> : vector<2x32xf32>
    %525 = tpu.matmul %471, %21, %cst_175 {dimension_numbers = #tpu.dot_dimension_numbers<[1], [0], [0], [1], [0, 0, 1, 1], [], []>} : vector<2x32xf32>, vector<32x32xf32>, vector<2x32xf32> -> vector<2x32xf32>
    %526 = arith.addf %524, %525 : vector<2x32xf32>
    %527 = math.tanh %526 : vector<2x32xf32>
    %cst_176 = arith.constant dense<0.000000e+00> : vector<2x32xf32>
    %528 = tpu.matmul %504, %15, %cst_176 {dimension_numbers = #tpu.dot_dimension_numbers<[1], [0], [0], [1], [0, 0, 1, 1], [], []>} : vector<2x32xf32>, vector<32x32xf32>, vector<2x32xf32> -> vector<2x32xf32>
    %529 = arith.addf %39, %528 : vector<2x32xf32>
    %cst_177 = arith.constant dense<0.000000e+00> : vector<2x32xf32>
    %530 = tpu.matmul %471, %23, %cst_177 {dimension_numbers = #tpu.dot_dimension_numbers<[1], [0], [0], [1], [0, 0, 1, 1], [], []>} : vector<2x32xf32>, vector<32x32xf32>, vector<2x32xf32> -> vector<2x32xf32>
    %531 = arith.addf %529, %530 : vector<2x32xf32>
    %532 = arith.negf %531 : vector<2x32xf32>
    %533 = math.exp %532 : vector<2x32xf32>
    %cst_178 = arith.constant 1.000000e+00 : f32
    %534 = vector.broadcast %cst_178 : f32 to vector<2x32xf32>
    %535 = arith.addf %534, %533 : vector<2x32xf32>
    %536 = arith.divf %534, %535 : vector<2x32xf32>
    %537 = arith.mulf %522, %469 : vector<2x32xf32>
    %538 = arith.mulf %513, %527 : vector<2x32xf32>
    %539 = arith.addf %537, %538 : vector<2x32xf32>
    %540 = math.tanh %539 : vector<2x32xf32>
    %541 = arith.mulf %536, %540 : vector<2x32xf32>
    %542 = vector.extract_strided_slice %47 {offsets = [14, 0], sizes = [2, 32], strides = [1, 1]} : vector<16x32xf32> to vector<2x32xf32>
    %cst_179 = arith.constant dense<0.000000e+00> : vector<2x32xf32>
    %543 = tpu.matmul %504, %1, %cst_179 {dimension_numbers = #tpu.dot_dimension_numbers<[1], [0], [0], [1], [0, 0, 1, 1], [], []>} : vector<2x32xf32>, vector<32x32xf32>, vector<2x32xf32> -> vector<2x32xf32>
    %544 = arith.addf %542, %543 : vector<2x32xf32>
    %545 = arith.negf %544 : vector<2x32xf32>
    %546 = math.exp %545 : vector<2x32xf32>
    %cst_180 = arith.constant 1.000000e+00 : f32
    %547 = vector.broadcast %cst_180 : f32 to vector<2x32xf32>
    %548 = arith.addf %547, %546 : vector<2x32xf32>
    %549 = arith.divf %547, %548 : vector<2x32xf32>
    %550 = vector.extract_strided_slice %48 {offsets = [14, 0], sizes = [2, 32], strides = [1, 1]} : vector<16x32xf32> to vector<2x32xf32>
    %cst_181 = arith.constant dense<0.000000e+00> : vector<2x32xf32>
    %551 = tpu.matmul %504, %3, %cst_181 {dimension_numbers = #tpu.dot_dimension_numbers<[1], [0], [0], [1], [0, 0, 1, 1], [], []>} : vector<2x32xf32>, vector<32x32xf32>, vector<2x32xf32> -> vector<2x32xf32>
    %552 = arith.addf %550, %551 : vector<2x32xf32>
    %553 = arith.negf %552 : vector<2x32xf32>
    %554 = math.exp %553 : vector<2x32xf32>
    %cst_182 = arith.constant 1.000000e+00 : f32
    %555 = vector.broadcast %cst_182 : f32 to vector<2x32xf32>
    %556 = arith.addf %555, %554 : vector<2x32xf32>
    %557 = arith.divf %555, %556 : vector<2x32xf32>
    %558 = vector.extract_strided_slice %49 {offsets = [14, 0], sizes = [2, 32], strides = [1, 1]} : vector<16x32xf32> to vector<2x32xf32>
    %cst_183 = arith.constant dense<0.000000e+00> : vector<2x32xf32>
    %559 = tpu.matmul %504, %5, %cst_183 {dimension_numbers = #tpu.dot_dimension_numbers<[1], [0], [0], [1], [0, 0, 1, 1], [], []>} : vector<2x32xf32>, vector<32x32xf32>, vector<2x32xf32> -> vector<2x32xf32>
    %560 = arith.addf %558, %559 : vector<2x32xf32>
    %561 = math.tanh %560 : vector<2x32xf32>
    %562 = vector.extract_strided_slice %50 {offsets = [14, 0], sizes = [2, 32], strides = [1, 1]} : vector<16x32xf32> to vector<2x32xf32>
    %cst_184 = arith.constant dense<0.000000e+00> : vector<2x32xf32>
    %563 = tpu.matmul %504, %7, %cst_184 {dimension_numbers = #tpu.dot_dimension_numbers<[1], [0], [0], [1], [0, 0, 1, 1], [], []>} : vector<2x32xf32>, vector<32x32xf32>, vector<2x32xf32> -> vector<2x32xf32>
    %564 = arith.addf %562, %563 : vector<2x32xf32>
    %565 = arith.negf %564 : vector<2x32xf32>
    %566 = math.exp %565 : vector<2x32xf32>
    %cst_185 = arith.constant 1.000000e+00 : f32
    %567 = vector.broadcast %cst_185 : f32 to vector<2x32xf32>
    %568 = arith.addf %567, %566 : vector<2x32xf32>
    %569 = arith.divf %567, %568 : vector<2x32xf32>
    %570 = arith.mulf %557, %502 : vector<2x32xf32>
    %571 = arith.mulf %549, %561 : vector<2x32xf32>
    %572 = arith.addf %570, %571 : vector<2x32xf32>
    %573 = math.tanh %572 : vector<2x32xf32>
    %574 = arith.mulf %569, %573 : vector<2x32xf32>
    %cst_186 = arith.constant dense<0.000000e+00> : vector<2x32xf32>
    %575 = tpu.matmul %574, %9, %cst_186 {dimension_numbers = #tpu.dot_dimension_numbers<[1], [0], [0], [1], [0, 0, 1, 1], [], []>} : vector<2x32xf32>, vector<32x32xf32>, vector<2x32xf32> -> vector<2x32xf32>
    %576 = arith.addf %27, %575 : vector<2x32xf32>
    %cst_187 = arith.constant dense<0.000000e+00> : vector<2x32xf32>
    %577 = tpu.matmul %541, %17, %cst_187 {dimension_numbers = #tpu.dot_dimension_numbers<[1], [0], [0], [1], [0, 0, 1, 1], [], []>} : vector<2x32xf32>, vector<32x32xf32>, vector<2x32xf32> -> vector<2x32xf32>
    %578 = arith.addf %576, %577 : vector<2x32xf32>
    %579 = arith.negf %578 : vector<2x32xf32>
    %580 = math.exp %579 : vector<2x32xf32>
    %cst_188 = arith.constant 1.000000e+00 : f32
    %581 = vector.broadcast %cst_188 : f32 to vector<2x32xf32>
    %582 = arith.addf %581, %580 : vector<2x32xf32>
    %583 = arith.divf %581, %582 : vector<2x32xf32>
    %cst_189 = arith.constant dense<0.000000e+00> : vector<2x32xf32>
    %584 = tpu.matmul %574, %11, %cst_189 {dimension_numbers = #tpu.dot_dimension_numbers<[1], [0], [0], [1], [0, 0, 1, 1], [], []>} : vector<2x32xf32>, vector<32x32xf32>, vector<2x32xf32> -> vector<2x32xf32>
    %585 = arith.addf %31, %584 : vector<2x32xf32>
    %cst_190 = arith.constant dense<0.000000e+00> : vector<2x32xf32>
    %586 = tpu.matmul %541, %19, %cst_190 {dimension_numbers = #tpu.dot_dimension_numbers<[1], [0], [0], [1], [0, 0, 1, 1], [], []>} : vector<2x32xf32>, vector<32x32xf32>, vector<2x32xf32> -> vector<2x32xf32>
    %587 = arith.addf %585, %586 : vector<2x32xf32>
    %588 = arith.negf %587 : vector<2x32xf32>
    %589 = math.exp %588 : vector<2x32xf32>
    %cst_191 = arith.constant 1.000000e+00 : f32
    %590 = vector.broadcast %cst_191 : f32 to vector<2x32xf32>
    %591 = arith.addf %590, %589 : vector<2x32xf32>
    %592 = arith.divf %590, %591 : vector<2x32xf32>
    %cst_192 = arith.constant dense<0.000000e+00> : vector<2x32xf32>
    %593 = tpu.matmul %574, %13, %cst_192 {dimension_numbers = #tpu.dot_dimension_numbers<[1], [0], [0], [1], [0, 0, 1, 1], [], []>} : vector<2x32xf32>, vector<32x32xf32>, vector<2x32xf32> -> vector<2x32xf32>
    %594 = arith.addf %35, %593 : vector<2x32xf32>
    %cst_193 = arith.constant dense<0.000000e+00> : vector<2x32xf32>
    %595 = tpu.matmul %541, %21, %cst_193 {dimension_numbers = #tpu.dot_dimension_numbers<[1], [0], [0], [1], [0, 0, 1, 1], [], []>} : vector<2x32xf32>, vector<32x32xf32>, vector<2x32xf32> -> vector<2x32xf32>
    %596 = arith.addf %594, %595 : vector<2x32xf32>
    %597 = math.tanh %596 : vector<2x32xf32>
    %cst_194 = arith.constant dense<0.000000e+00> : vector<2x32xf32>
    %598 = tpu.matmul %574, %15, %cst_194 {dimension_numbers = #tpu.dot_dimension_numbers<[1], [0], [0], [1], [0, 0, 1, 1], [], []>} : vector<2x32xf32>, vector<32x32xf32>, vector<2x32xf32> -> vector<2x32xf32>
    %599 = arith.addf %39, %598 : vector<2x32xf32>
    %cst_195 = arith.constant dense<0.000000e+00> : vector<2x32xf32>
    %600 = tpu.matmul %541, %23, %cst_195 {dimension_numbers = #tpu.dot_dimension_numbers<[1], [0], [0], [1], [0, 0, 1, 1], [], []>} : vector<2x32xf32>, vector<32x32xf32>, vector<2x32xf32> -> vector<2x32xf32>
    %601 = arith.addf %599, %600 : vector<2x32xf32>
    %602 = arith.negf %601 : vector<2x32xf32>
    %603 = math.exp %602 : vector<2x32xf32>
    %cst_196 = arith.constant 1.000000e+00 : f32
    %604 = vector.broadcast %cst_196 : f32 to vector<2x32xf32>
    %605 = arith.addf %604, %603 : vector<2x32xf32>
    %606 = arith.divf %604, %605 : vector<2x32xf32>
    %607 = arith.mulf %592, %539 : vector<2x32xf32>
    %608 = arith.mulf %583, %597 : vector<2x32xf32>
    %609 = arith.addf %607, %608 : vector<2x32xf32>
    %610 = math.tanh %609 : vector<2x32xf32>
    %611 = arith.mulf %606, %610 : vector<2x32xf32>
    %612 = vector.shape_cast %121 : vector<2x32xf32> to vector<2x1x32xf32>
    %613 = vector.shape_cast %191 : vector<2x32xf32> to vector<2x1x32xf32>
    %614 = vector.shape_cast %261 : vector<2x32xf32> to vector<2x1x32xf32>
    %615 = vector.shape_cast %331 : vector<2x32xf32> to vector<2x1x32xf32>
    %616 = vector.shape_cast %401 : vector<2x32xf32> to vector<2x1x32xf32>
    %617 = vector.shape_cast %471 : vector<2x32xf32> to vector<2x1x32xf32>
    %618 = vector.shape_cast %541 : vector<2x32xf32> to vector<2x1x32xf32>
    %619 = vector.shape_cast %611 : vector<2x32xf32> to vector<2x1x32xf32>
    %620 = tpu.concatenate %612, %613, %614, %615, %616, %617, %618, %619 in 1 : vector<2x1x32xf32>, vector<2x1x32xf32>, vector<2x1x32xf32>, vector<2x1x32xf32>, vector<2x1x32xf32>, vector<2x1x32xf32>, vector<2x1x32xf32>, vector<2x1x32xf32> -> vector<2x8x32xf32>
    %cst_197 = arith.constant dense<0.000000e+00> : vector<2x32xf32>
    %621 = tpu.matmul %611, %40, %cst_197 {dimension_numbers = #tpu.dot_dimension_numbers<[1], [0], [0], [1], [0, 0, 1, 1], [], []>} : vector<2x32xf32>, vector<32x32xf32>, vector<2x32xf32> -> vector<2x32xf32>
    %622 = vector.shape_cast %621 : vector<2x32xf32> to vector<2x1x32xf32>
    %623 = vector.broadcast %622 : vector<2x1x32xf32> to vector<2x8x32xf32>
    %624 = arith.mulf %620, %623 : vector<2x8x32xf32>
    %cst_198 = arith.constant dense<0.000000e+00> : vector<2x8xf32>
    %625 = vector.multi_reduction <add>, %624, %cst_198 [2] : vector<2x8x32xf32> to vector<2x8xf32>
    %cst_199 = arith.constant dense<0xFF800000> : vector<2xf32>
    %626 = vector.multi_reduction <maximumf>, %625, %cst_199 [1] : vector<2x8xf32> to vector<2xf32>
    %627 = vector.shape_cast %626 : vector<2xf32> to vector<2x1xf32>
    %628 = vector.broadcast %627 : vector<2x1xf32> to vector<2x8xf32>
    %629 = arith.subf %625, %628 : vector<2x8xf32>
    %630 = math.exp %629 : vector<2x8xf32>
    %cst_200 = arith.constant dense<0.000000e+00> : vector<2xf32>
    %631 = vector.multi_reduction <add>, %630, %cst_200 [1] : vector<2x8xf32> to vector<2xf32>
    %632 = vector.shape_cast %631 : vector<2xf32> to vector<2x1xf32>
    %633 = tpu.reciprocal %632 {approx = true} : vector<2x1xf32> -> vector<2x1xf32>
    %634 = vector.broadcast %633 : vector<2x1xf32> to vector<2x8xf32>
    %635 = arith.mulf %630, %634 : vector<2x8xf32>
    %636 = vector.shape_cast %635 : vector<2x8xf32> to vector<2x8x1xf32>
    %637 = vector.broadcast %636 : vector<2x8x1xf32> to vector<2x8x32xf32>
    %638 = arith.mulf %620, %637 : vector<2x8x32xf32>
    %cst_201 = arith.constant dense<0.000000e+00> : vector<2x32xf32>
    %639 = vector.multi_reduction <add>, %638, %cst_201 [1] : vector<2x8x32xf32> to vector<2x32xf32>
    %640 = tpu.concatenate %639, %611 in 1 : vector<2x32xf32>, vector<2x32xf32> -> vector<2x64xf32>
    %c0_202 = arith.constant 0 : index
    %c0_203 = arith.constant 0 : index
    %641 = vector.load %arg8[%c0_202, %c0_203] : memref<2x64xf32, #tpu.memory_space<vmem>>, vector<2x64xf32>
    tpu.vector_store %arg8[%c0_202, %c0_203], %640 {strides = array<i32>} : memref<2x64xf32, #tpu.memory_space<vmem>>, vector<2x64xf32>,
    %c0_204 = arith.constant 0 : index
    %c0_205 = arith.constant 0 : index
    %642 = vector.load %arg9[%c0_204, %c0_205] : memref<2x8xf32, #tpu.memory_space<vmem>>, vector<2x8xf32>
    tpu.vector_store %arg9[%c0_204, %c0_205], %635 {strides = array<i32>} : memref<2x8xf32, #tpu.memory_space<vmem>>, vector<2x8xf32>,
    return
  }
}

</mosaic_0001>

<bundles_post_ra>
// kernel: lstm_with_attention.1
= control target key start
LH: loop header
LB: loop body
LE: loop exit
PB: predicated region body
PF: predicated region fallthrough
CT: control target
= control target key end

     0   :  { %15 = vsyncpa [#allocation3], 0  ;;  %s5632_s0 = inlined_call_operand.vmem [shape: f32[16,16], index: 0, kind: input, shape index: {}]   ;;  %s5633_s1 = inlined_call_operand.hbm [shape: f32[16,128], index: 1, kind: input, shape index: {}]   ;;  %s5634_s2 = inlined_call_operand.vmem [shape: f32[1,128], index: 2, kind: input, shape index: {}]   ;;  %s5635_s3 = inlined_call_operand.hbm [shape: f32[4,32,32], index: 3, kind: input, shape index: {}]   ;;  %s5636_s4 = inlined_call_operand.hbm [shape: f32[4,32,32], index: 4, kind: input, shape index: {}]   ;;  %s5637_s5 = inlined_call_operand.hbm [shape: f32[4,32,32], index: 5, kind: input, shape index: {}]   ;;  %s5638_s6 = inlined_call_operand.vmem [shape: f32[4,1,32], index: 6, kind: input, shape index: {}]   ;;  %s5639_s7 = inlined_call_operand.vmem [shape: f32[32,32], index: 7, kind: input, shape index: {}]   ;;  %s5640_s8 = inlined_call_operand.hbm [shape: f32[2,64], index: 8, kind: output, shape index: {0}]   ;;  %s5641_s9 = inlined_call_operand.hbm [shape: f32[2,8], index: 9, kind: output, shape index: {1}]  }
   0x1   :  { %16 = vsyncpa [#allocation6], 0 }
   0x2   :  { %17 = vsyncpa [#allocation9], 0 }
   0x3   :  { %18 = vsyncpa [#allocation4], 0 }
   0x4   :  { %19 = vsyncpa [#allocation12], 0  ;;  %s41_s11 = sshll.u32 %s5635_s3, 4  ;;  %s4460_s12 = smov [#allocation5]   ;;  %s42_s11 = int_to_ptr.hbm [resolvable:$true] %s41_s11 }
   0x5   :  { %s43_s13 = sshll.u32 %s4460_s12, 4  ;;  %s26_s16 = sshll.u32 %s5633_s1, 4  ;;  %s44_s13 = int_to_ptr.vmem [resolvable:$true] %s43_s13  ;;  %s27_s16 = int_to_ptr.hbm [resolvable:$true] %s26_s16 }
   0x6   :  { %s4461_s17 = smov 128   ;;  %s4462_s18 = smov 8  }
   0x7   :  { %49 = dma.hbm_to_vmem [thread:$0]  %s42_s11, 2048, %s44_s13, [#allocation6], %s4461_s17, %s4461_s17, %s4462_s18  }
   0x8   :  { %s4463_s19 = smov [#allocation2]   ;;  %s54_s23 = sshll.u32 %s5636_s4, 4  ;;  %s55_s23 = int_to_ptr.hbm [resolvable:$true] %s54_s23 }
   0x9   :  { %s28_s20 = sshll.u32 %s4463_s19, 4  ;;  %s67_s25 = sshll.u32 %s5637_s5, 4  ;;  %s29_s20 = int_to_ptr.vmem [resolvable:$true] %s28_s20  ;;  %s68_s25 = int_to_ptr.hbm [resolvable:$true] %s67_s25 }
   0xa   :  { %34 = dma.hbm_to_vmem [thread:$0]  %s27_s16, 256, %s29_s20, [#allocation3], %s4461_s17, %s4461_s17, %s4462_s18  }
   0xb   :  { %s4464_s26 = smov [#allocation7]   ;;  %s4465_s1 = smov [#allocation8]  }
   0xc   :  { %s56_s27 = sshll.u32 %s4464_s26, 4  ;;  %s69_s28 = sshll.u32 %s4465_s1, 4  ;;  %s57_s27 = int_to_ptr.vmem [resolvable:$true] %s56_s27  ;;  %s70_s28 = int_to_ptr.vmem [resolvable:$true] %s69_s28 }
   0xd   :  { %62 = dma.hbm_to_vmem [thread:$0]  %s55_s23, 2048, %s57_s27, [#allocation6], %s4461_s17, %s4461_s17, %s4462_s18  }
   0xe   :  { %75 = dma.hbm_to_vmem [thread:$0]  %s68_s25, 2048, %s70_s28, [#allocation9], %s4461_s17, %s4461_s17, %s4462_s18  }
   0xf   :  { %4450 = dma.done.wait [#allocation3], 256  }
  0x10   :  { %4451 = vsyncadd [#allocation3], 4294967040 }
  0x11   :  { %4452 = dma.done.wait [#allocation6], 4096  }
  0x12   :  { %4453 = vsyncadd [#allocation6], 4294963200 }
  0x13   :  { %4454 = dma.done.wait [#allocation9], 2048  }
  0x14   :  { %4455 = vsyncadd [#allocation9], 4294965248  ;;  %v4535_v0 = vld [vmem:[#allocation5 + $0x38] sm:$0xff]  ;;  %v4539_v2 = vld [vmem:[#allocation5 + $0x30] sm:$0xff]  ;;  %vm184_vm0 = vcmask 130048   ;;  %v4466_v14 = vmov 0.0  }
  0x15   :  { %v4537_v1 = vld [vmem:[#allocation5 + $0x58] sm:$0xff]  ;;  %270 = vmatpush.msra.mxu2 %v4535_v0  ;;  %v4543_v3 = vld [vmem:[#allocation5 + $0x50] sm:$0xff]  ;;  %v4545_v4 = vld [vmem:[#allocation5 + $0x28] sm:$0xff]  ;;  %s4467_s29 = smov 64   ;;  %s4468_s30 = smov 32   ;;  %vm214_vm13 = vcmask 261120  }
  0x16   :  { %314 = vmatpush.msra.mxu3 %v4537_v1  ;;  %v4547_v5 = vld [vmem:[#allocation5 + $0x48] sm:$0xff]  ;;  %v4549_v6 = vld [vmem:[#allocation5 + $0x18] sm:$0xff]  ;;  %v4553_v7 = vld [vmem:[#allocation5 + $0x10] sm:$0xff]  ;;  %s4469_s10 = smov 96   ;;  %s3759_s3 = sshll.u32 %s5641_s9, 4  ;;  %s3760_s3 = int_to_ptr.hbm [resolvable:$true] %s3759_s3 }
  0x17   :  { %271 = vmatpush.msra.mxu2 %v4539_v2  ;;  %v4555_v8 = vld [vmem:[#allocation5 + $0x20] sm:$0xff]  ;;  %230 = vmatpush.msra.mxu1 %v4549_v6  ;;  %v4562_v10 = vld [vmem:[#allocation5 + $0x8] sm:$0xff]  ;;  %v179_v11 = vld [vmem:[#allocation2 + $0x8] sm:$0xff]  ;;  %s4472_s9 = smov [#allocation10]   ;;  %s3748_s26 = sshll.u32 %s5640_s8, 4  ;;  %s3749_s26 = int_to_ptr.hbm [resolvable:$true] %s3748_s26 }
  0x18   :  { %315 = vmatpush.msra.mxu3 %v4543_v3  ;;  %v4557_v9 = vld [vmem:[#allocation5 + $0x40] sm:$0xff]  ;;  %v178_v12 = vld [vmem:[#allocation2] sm:$0xff]  ;;  %205 = vmatpush.msra.mxu0 %v179_v11  ;;  %v4575_v16 = vld [vmem:[#allocation5 + $0x78] sm:$0xff] }
  0x19   :  { %272 = vmatpush.msra.mxu2 %v4545_v4  ;;  %231 = vmatpush.msra.mxu1 %v4553_v7  ;;  %v176_v13 = vld [vmem:[%s5632_s0] sm:$0xff]  ;;  %v4572_v15 = vld [vmem:[#allocation5] sm:$0xff]  ;;  %v4583_v18 = vld [vmem:[#allocation5 + $0x68] sm:$0xff] }
  0x1a   :  { %316 = vmatpush.msra.mxu3 %v4547_v5  ;;  %206 = vmatpush.msra.mxu0 %v178_v12  ;;  %v4580_v17 = vld [vmem:[#allocation5 + $0x70] sm:$0xff]  ;;  %v4586_v19 = vld [vmem:[#allocation5 + $0x60] sm:$0xff] }
  0x1b   :  { %273 = vmatpush.msra.mxu2 %v4555_v8  ;;  %232 = vmatpush.msra.mxu1 %v4562_v10  ;;  %v3934_v24 = vld [vmem:[%s5634_s2] ss:$0 sm:$0xff] }
  0x1c   :  { %317 = vmatpush.msra.mxu3 %v4557_v9  ;;  %274 = vmatmul.f32.vlgmr.msra.gmra.mxu2 %v4466_v14 }
  0x1d   :  { %318 = vmatmul.f32.vlgmr.msra.gmra.mxu3 %v4466_v14  ;;  %3779 = vmatmul.msk.f32.vlgmr.msra.gmra.mxu0 %vm184_vm0, %v176_v13 }
  0x1e   :  { %233 = vmatpush.msra.mxu1 %v4572_v15 }
  0x1f   :  { %234 = vmatmul.f32.vlgmr.msra.gmra.mxu1 %v4466_v14 }
  0x20   :  { %340 = vmatpush.msrb.mxu1 %v4575_v16 }
  0x22   :  { %341 = vmatpush.msrb.mxu1 %v4580_v17 }
  0x24   :  { %342 = vmatpush.msrb.mxu1 %v4583_v18 }
  0x26   :  { %343 = vmatpush.msrb.mxu1 %v4586_v19 }
  0x27   :  { %344 = vmatmul.f32.vlgmr.msrb.gmra.mxu1 %v4466_v14 }
  0x9a   :  { %v208_v25 = vpop.f32.mrf.mxu0 }
  0x9b   :  { %v4597_v26 = vadd.f32 %v3934_v24, %v208_v25  ;;  %v4613_v24 = vld [vmem:[#allocation8 + $0x38] sm:$0xff]  ;;  %v4615_v25 = vld [vmem:[#allocation8 + $0x10] sm:$0xff] }
  0x9c   :  { %v235_v20 = vpop.f32.mrf.mxu1  ;;  %488 = vmatpush.msra.mxu1 %v4613_v24 }
  0x9d   :  { %v238_v30 = vadd.f32 %v235_v20, %v4597_v26 }
  0x9f   :  { %v275_v21 = vpop.f32.mrf.mxu2  ;;  %v3781_v31 = vmul.f32 -1.442695, %v238_v30  ;;  %v4626_v30 = vld [vmem:[#allocation7 + $0x38] sm:$0xff] }
  0xa0   :  { %v319_v22 = vpop.f32.mrf.mxu3  ;;  %279 = vrot.lane.b32.xlu1 %v275_v21, %s4468_s30  ;;  %467 = vmatpush.msrb.mxu0 %v4626_v30 }
  0xa1   :  { %323 = vrot.lane.b32.xlu0 %v319_v22, %s4467_s29 }
  0xa4   :  { %v345_v23 = vpop.f32.mrf.mxu1 }
  0xa5   :  { %349 = vrot.lane.b32.xlu2 %v345_v23, %s4469_s10  ;;  %v4611_v23 = vld [vmem:[#allocation8 + $0x18] sm:$0xff] }
  0xa6   :  { %427 = vmatpush.msrb.mxu3 %v4611_v23 }
  0xa8   :  { %428 = vmatpush.msrb.mxu3 %v4615_v25 }
  0xff   :  { %v350_v12 = vpop.permute.xlu2 %349 }
 0x100   :  { %v352_v13 = vadd.f32 %v350_v12, %v4597_v26  ;;  %v4730_v12 = vld [vmem:[#allocation7 + $0x68] sm:$0xff] }
 0x101   :  { %5706 = vst [vmem:[#allocation26_spill] sm:$0xff] %v4730_v12 }
 0x102   :  { %v3783_v20 = vmul.f32 -1.442695, %v352_v13  ;;  %v4733_v13 = vld [vmem:[#allocation7 + $0x48] sm:$0xff] }
 0x103   :  { %5707 = vst [vmem:[#allocation27_spill] sm:$0xff] %v4733_v13 }
 0x112   :  { %v280_v46 = vpop.permute.xlu1 %279 }
 0x113   :  { %v324_v27 = vpop.permute.xlu0 %323  ;;  %v282_v47 = vadd.f32 %v280_v46, %v4597_v26  ;;  %v4675_v46 = vld [vmem:[#allocation7 + $0x20] sm:$0xff] }
 0x114   :  { %v326_v28 = vadd.f32 %v324_v27, %v4597_v26  ;;  %v4620_v27 = vld [vmem:[#allocation8 + $0x30] sm:$0xff]  ;;  %5699 = vst [vmem:[#allocation19_spill] sm:$0xff] %v4675_v46 }
 0x115   :  { %v3782_v48 = vmul.f32 -1.442695, %v282_v47  ;;  %489 = vmatpush.msra.mxu1 %v4620_v27  ;;  %v4677_v47 = vld [vmem:[#allocation7 + $0x8] sm:$0xff] }
 0x116   :  { %3939 = vtanh.f32 %v326_v28  ;;  %v4622_v28 = vld [vmem:[#allocation8 + $0x8] sm:$0xff]  ;;  %5700 = vst [vmem:[#allocation20_spill] sm:$0xff] %v4677_v47 }
 0x117   :  { %3941 = vpow2.f32 %v3781_v31  ;;  %v4630_v31 = vld [vmem:[#allocation8] sm:$0xff]  ;;  %429 = vmatpush.msrb.mxu3 %v4622_v28 }
 0x119   :  { %430 = vmatpush.msrb.mxu3 %v4630_v31 }
 0x11a   :  { %431 = vmatmul.f32.vlgmr.msrb.gmra.mxu3 %v4466_v14 }
 0x11c   :  { %v3940_v29 = vpop.eup %3939 }
 0x11d   :  { %374 = vrot.lane.b32.xlu0 %v3940_v29, %s4467_s29  ;;  %v3942_v32 = vpop.eup %3941  ;;  %v4624_v29 = vld [vmem:[#allocation8 + $0x28] sm:$0xff] }
 0x11e   :  { %v242_v33 = vadd.f32 1.0, %v3942_v32  ;;  %v4632_v32 = vld [vmem:[#allocation8 + $0x20] sm:$0xff]  ;;  %490 = vmatpush.msra.mxu1 %v4624_v29 }
 0x120   :  { %3943 = vrcp.f32 %v242_v33  ;;  %vm248_vm1 = vweird.f32 %v242_v33  ;;  %v254_v38 = vand.u32 2147483648, %v242_v33  ;;  %v252_v40 = vand.u32 2147483647, %v242_v33  ;;  %491 = vmatpush.msra.mxu1 %v4632_v32 }
 0x121   :  { %3945 = vpow2.f32 %v3782_v48  ;;  %492 = vmatmul.f32.vlgmr.msra.gmra.mxu1 %v4466_v14  ;;  %v4679_v48 = vld [vmem:[#allocation8 + $0x40] sm:$0xff] }
 0x122   :  { %v255_v41 = vor.u32 1.1754944e-38, %v254_v38  ;;  %vm253_vm4 = vcmp.eq.f32.partialorder %v252_v40, 8.507059e+37  ;;  %v4651_v38 = vld [vmem:[#allocation7 + $0x18] sm:$0xff]  ;;  %v4657_v40 = vld [vmem:[#allocation8 + $0x70] sm:$0xff] }
 0x123   :  { %406 = vmatpush.msrb.mxu2 %v4651_v38 }
 0x126   :  { %v3944_v34 = vpop.eup %3943 }
 0x127   :  { %v244_v35 = vmul.f32 %v3944_v34, %v242_v33  ;;  %vm249_vm2 = vweird.f32 %v3944_v34  ;;  %v3946_v49 = vpop.eup %3945  ;;  %v4635_v33 = vld [vmem:[#allocation7 + $0x30] sm:$0xff] }
 0x128   :  { %vm250_vm3 = vmor %vm248_vm1, %vm249_vm2  ;;  %v286_v50 = vadd.f32 1.0, %v3946_v49  ;;  %468 = vmatpush.msrb.mxu0 %v4635_v33  ;;  %v4681_v49 = vld [vmem:[#allocation8 + $0x60] sm:$0xff] }
 0x129   :  { %v245_v36 = vsub.f32 1.0, %v244_v35  ;;  %v4641_v35 = vld [vmem:[#allocation8 + $0x78] sm:$0xff] }
 0x12a   :  { %3947 = vrcp.f32 %v286_v50  ;;  %v298_v56 = vand.u32 2147483648, %v286_v50  ;;  %vm292_vm6 = vweird.f32 %v286_v50  ;;  %v296_v57 = vand.u32 2147483647, %v286_v50  ;;  %592 = vmatpush.msrb.mxu1 %v4641_v35 }
 0x12b   :  { %v246_v37 = vmul.f32 %v3944_v34, %v245_v36 }
 0x12c   :  { %v299_v59 = vor.u32 1.1754944e-38, %v298_v56  ;;  %vm297_vm8 = vcmp.eq.f32.partialorder %v296_v57, 8.507059e+37  ;;  %593 = vmatpush.msrb.mxu1 %v4657_v40 }
 0x12d   :  { %v247_v39 = vadd.f32 %v3944_v34, %v246_v37  ;;  %v177_v37 = vld [vmem:[%s5632_s0 + $0x8] sm:$0xff] }
 0x12e   :  { %3780 = vmatmul.msk.f32.gmra.mxu0 %vm184_vm0, %v177_v37 }
 0x12f   :  { %v251_v42 = vsel %vm250_vm3, %v3944_v34, %v247_v39  ;;  %v4639_v34 = vld [vmem:[#allocation8 + $0x58] sm:$0xff]  ;;  %v4655_v39 = vld [vmem:[#allocation8 + $0x50] sm:$0xff] }
 0x130   :  { %v256_v44 = vsel %vm253_vm4, %v255_v41, %v251_v42  ;;  %v3948_v51 = vpop.eup %3947  ;;  %549 = vmatpush.msra.mxu3 %v4639_v34  ;;  %v4661_v41 = vld [vmem:[#allocation7 + $0x28] sm:$0xff]  ;;  %v4663_v42 = vld [vmem:[#allocation7 + $0x10] sm:$0xff] }
 0x131   :  { %v288_v52 = vmul.f32 %v3948_v51, %v286_v50  ;;  %vm293_vm5 = vweird.f32 %v3948_v51  ;;  %5698 = vst [vmem:[#allocation18_spill] sm:$0xff] %v4661_v41  ;;  %469 = vmatpush.msrb.mxu0 %v4661_v41  ;;  %407 = vmatpush.msrb.mxu2 %v4663_v42 }
 0x132   :  { %vm294_vm7 = vmor %vm292_vm6, %vm293_vm5  ;;  %550 = vmatpush.msra.mxu3 %v4655_v39 }
 0x133   :  { %v289_v53 = vsub.f32 1.0, %v288_v52  ;;  %470 = vmatpush.msrb.mxu0 %v4675_v46  ;;  %408 = vmatpush.msrb.mxu2 %v4677_v47 }
 0x135   :  { %v290_v54 = vmul.f32 %v3948_v51, %v289_v53 }
 0x137   :  { %v291_v55 = vadd.f32 %v3948_v51, %v290_v54 }
 0x139   :  { %v295_v58 = vsel %vm294_vm7, %v3948_v51, %v291_v55  ;;  %v4691_v51 = vld [vmem:[#allocation7] sm:$0xff] }
 0x13a   :  { %v300_v60 = vsel %vm297_vm8, %v299_v59, %v295_v58  ;;  %5701 = vst [vmem:[#allocation21_spill] sm:$0xff] %v4691_v51  ;;  %409 = vmatpush.msrb.mxu2 %v4691_v51 }
 0x13b   :  { %v372_v61 = vmul.f32 0.0, %v300_v60  ;;  %v4720_v60 = vld [vmem:[#allocation7 + $0x78] sm:$0xff] }
 0x13c   :  { %5702 = vst [vmem:[#allocation22_spill] sm:$0xff] %v4720_v60  ;;  %571 = vmatpush.msra.mxu0 %v4720_v60 }
 0x18f   :  { %v375_v43 = vpop.permute.xlu0 %374 }
 0x190   :  { %v377_v45 = vmul.f32 %v375_v43, %v256_v44  ;;  %v4667_v44 = vld [vmem:[#allocation8 + $0x48] sm:$0xff] }
 0x191   :  { %551 = vmatpush.msra.mxu3 %v4667_v44 }
 0x192   :  { %379 = vrot.lane.b32.xlu1 %v377_v45, %s4468_s30  ;;  %v4669_v45 = vld [vmem:[#allocation8 + $0x68] sm:$0xff] }
 0x193   :  { %594 = vmatpush.msrb.mxu1 %v4669_v45  ;;  %552 = vmatpush.msra.mxu3 %v4679_v48 }
 0x194   :  { %553 = vmatmul.f32.vlgmr.msra.gmra.mxu3 %v4466_v14 }
 0x195   :  { %595 = vmatpush.msrb.mxu1 %v4681_v49  ;;  %680 = vmatpush.msrb.mxu3 %v4535_v0 }
 0x196   :  { %596 = vmatmul.f32.vlgmr.msrb.gmra.mxu1 %v4466_v14 }
 0x197   :  { %752 = vmatpush.msra.mxu1 %v4575_v16  ;;  %681 = vmatpush.msrb.mxu3 %v4539_v2 }
 0x199   :  { %753 = vmatpush.msra.mxu1 %v4580_v17  ;;  %682 = vmatpush.msrb.mxu3 %v4545_v4 }
 0x19b   :  { %754 = vmatpush.msra.mxu1 %v4583_v18  ;;  %683 = vmatpush.msrb.mxu3 %v4555_v8 }
 0x19d   :  { %755 = vmatpush.msra.mxu1 %v4586_v19  ;;  %847 = vmatpush.msra.mxu3 %v4611_v23 }
 0x19f   :  { %908 = vmatpush.msrb.mxu1 %v4613_v24  ;;  %848 = vmatpush.msra.mxu3 %v4615_v25 }
 0x1a1   :  { %909 = vmatpush.msrb.mxu1 %v4620_v27  ;;  %849 = vmatpush.msra.mxu3 %v4622_v28 }
 0x1a3   :  { %910 = vmatpush.msrb.mxu1 %v4624_v29  ;;  %850 = vmatpush.msra.mxu3 %v4630_v31 }
 0x1a5   :  { %911 = vmatpush.msrb.mxu1 %v4632_v32 }
 0x1ab   :  { %v4784_v37 = vpop.f32.mrf.mxu0 }
 0x1ac   :  { %5710 = vst [vmem:[#allocation30_spill] sm:$0xff] %v4784_v37 }
 0x204   :  { %v380_v62 = vpop.permute.xlu1 %379 }
 0x205   :  { %v4604_v63 = vadd.f32 %v380_v62, %v372_v61  ;;  %v4723_v61 = vld [vmem:[#allocation7 + $0x58] sm:$0xff]  ;;  %v4725_v62 = vld [vmem:[#allocation7 + $0x70] sm:$0xff] }
 0x206   :  { %5703 = vst [vmem:[#allocation23_spill] sm:$0xff] %v4723_v61  ;;  %528 = vmatpush.msra.mxu2 %v4723_v61  ;;  %572 = vmatpush.msra.mxu0 %v4725_v62 }
 0x207   :  { %3949 = vtanh.f32 %v4604_v63  ;;  %5704 = vst [vmem:[#allocation24_spill] sm:$0xff] %v4725_v62 }
 0x208   :  { %3951 = vpow2.f32 %v3783_v20  ;;  %v4736_v20 = vld [vmem:[#allocation7 + $0x60] sm:$0xff]  ;;  %573 = vmatpush.msra.mxu0 %v4730_v12 }
 0x209   :  { %5708 = vst [vmem:[#allocation28_spill] sm:$0xff] %v4736_v20 }
 0x20a   :  { %574 = vmatpush.msra.mxu0 %v4736_v20 }
 0x20d   :  { %v3950_v11 = vpop.eup %3949 }
 0x20e   :  { %385 = vrot.lane.b32.xlu2 %v3950_v11, %s4467_s29  ;;  %v3952_v21 = vpop.eup %3951  ;;  %v4727_v11 = vld [vmem:[#allocation7 + $0x50] sm:$0xff] }
 0x20f   :  { %v4609_v22 = vadd.f32 1.0, %v3952_v21  ;;  %5705 = vst [vmem:[#allocation25_spill] sm:$0xff] %v4727_v11  ;;  %529 = vmatpush.msra.mxu2 %v4727_v11  ;;  %v4739_v21 = vld [vmem:[#allocation7 + $0x40] sm:$0xff] }
 0x210   :  { %5709 = vst [vmem:[#allocation29_spill] sm:$0xff] %v4739_v21 }
 0x211   :  { %3953 = vrcp.f32 %v4609_v22  ;;  %vm362_vm9 = vweird.f32 %v4609_v22  ;;  %v368_v53 = vand.u32 2147483648, %v4609_v22  ;;  %v366_v54 = vand.u32 2147483647, %v4609_v22  ;;  %530 = vmatpush.msra.mxu2 %v4733_v13 }
 0x213   :  { %v369_v55 = vor.u32 1.1754944e-38, %v368_v53  ;;  %vm367_vm12 = vcmp.eq.f32.partialorder %v366_v54, 8.507059e+37  ;;  %531 = vmatpush.msra.mxu2 %v4739_v21 }
 0x217   :  { %v4644_v36 = vpop.eup %3953 }
 0x218   :  { %v358_v43 = vmul.f32 %v4644_v36, %v4609_v22  ;;  %vm363_vm10 = vweird.f32 %v4644_v36 }
 0x219   :  { %vm364_vm11 = vmor %vm362_vm9, %vm363_vm10 }
 0x21a   :  { %v359_v50 = vsub.f32 1.0, %v358_v43 }
 0x21c   :  { %v360_v52 = vmul.f32 %v4644_v36, %v359_v50  ;;  %v4789_v50 = vld [vmem:[%s5638_s6 + $0x1] ss:$0 sm:$0xff] }
 0x21d   :  { %5711 = vst [vmem:[#allocation31_spill] sm:$0xff] %v4789_v50 }
 0x21e   :  { %v361_v14 = vadd.f32 %v4644_v36, %v360_v52  ;;  %v493_v52 = vpop.f32.mrf.mxu1 }
 0x220   :  { %v365_v56 = vsel %vm364_vm11, %v4644_v36, %v361_v14  ;;  %v432_v36 = vpop.f32.mrf.mxu3 }
 0x221   :  { %v370_v57 = vsel %vm367_vm12, %v369_v55, %v365_v56  ;;  %v4795_v55 = vld [vmem:[%s5638_s6] ss:$0 sm:$0xff] }
 0x222   :  { %5712 = vst [vmem:[#allocation32_spill] sm:$0xff] %v4795_v55 }
 0x228   :  { %v554_v43 = vpop.f32.mrf.mxu3 }
 0x268   :  { %v386_v58 = vpop.permute.xlu2 %385 }
 0x269   :  { %v388_v59 = vmul.f32 %v386_v58, %v370_v57  ;;  %v4800_v57 = vld [vmem:[%s5638_s6 + $0x3] ss:$0 sm:$0xff] }
 0x26a   :  { %5713 = vst [vmem:[#allocation33_spill] sm:$0xff] %v4800_v57 }
 0x26b   :  { %390 = vrot.lane.b32.xlu0 %v388_v59, %s4468_s30 }
 0x2dd   :  { %v391_v22 = vpop.permute.xlu0 %390 }
 0x2de   :  { %3784 = vmatmul.msk.f32.vlgmr.msrb.gmra.mxu2 %vm214_vm13, %v391_v22  ;;  %3786 = vmatmul.msk.f32.vlgmr.msrb.gmra.mxu0 %vm214_vm13, %v391_v22 }
 0x2df   :  { %3793 = vmatmul.msk.f32.vlgmr.msrb.gmra.mxu3 %vm214_vm13, %v391_v22  ;;  %3796 = vmatmul.msk.f32.vlgmr.msra.gmra.mxu1 %vm214_vm13, %v391_v22 }
 0x2e0   :  { %725 = vmatpush.msrb.mxu0 %v4537_v1  ;;  %637 = vmatpush.msrb.mxu2 %v4549_v6 }
 0x2e1   :  { %969 = vmatpush.msrb.mxu3 %v4639_v34  ;;  %1012 = vmatpush.msra.mxu1 %v4641_v35 }
 0x2e2   :  { %726 = vmatpush.msrb.mxu0 %v4543_v3  ;;  %638 = vmatpush.msrb.mxu2 %v4553_v7 }
 0x2e3   :  { %970 = vmatpush.msrb.mxu3 %v4655_v39  ;;  %1013 = vmatpush.msra.mxu1 %v4657_v40 }
 0x2e4   :  { %727 = vmatpush.msrb.mxu0 %v4547_v5  ;;  %639 = vmatpush.msrb.mxu2 %v4562_v10 }
 0x2e5   :  { %971 = vmatpush.msrb.mxu3 %v4667_v44  ;;  %1014 = vmatpush.msra.mxu1 %v4669_v45 }
 0x2e6   :  { %3788 = vmatmul.msk.f32.vlgmr.msra.gmra.mxu2 %vm214_vm13, %v391_v22  ;;  %3789 = vmatmul.msk.f32.vlgmr.msra.gmra.mxu0 %vm214_vm13, %v391_v22 }
 0x2e7   :  { %728 = vmatpush.msrb.mxu0 %v4557_v9  ;;  %640 = vmatpush.msrb.mxu2 %v4572_v15 }
 0x2e8   :  { %972 = vmatpush.msrb.mxu3 %v4679_v48  ;;  %1015 = vmatpush.msra.mxu1 %v4681_v49 }
 0x2e9   :  { %887 = vmatpush.msra.mxu0 %v4626_v30  ;;  %823 = vmatpush.msra.mxu2 %v4651_v38 }
 0x2eb   :  { %888 = vmatpush.msra.mxu0 %v4635_v33  ;;  %824 = vmatpush.msra.mxu2 %v4663_v42 }
 0x2ed   :  { %889 = vmatpush.msra.mxu0 %v4661_v41  ;;  %825 = vmatpush.msra.mxu2 %v4677_v47 }
 0x2ee   :  { %3791 = vmatmul.msk.f32.vlgmr.msrb.gmra.mxu2 %vm214_vm13, %v391_v22  ;;  %3795 = vmatmul.msk.f32.vlgmr.msrb.gmra.mxu0 %vm214_vm13, %v391_v22 }
 0x2ef   :  { %890 = vmatpush.msra.mxu0 %v4675_v46  ;;  %826 = vmatpush.msra.mxu2 %v4691_v51 }
 0x2f1   :  { %991 = vmatpush.msrb.mxu0 %v4720_v60  ;;  %948 = vmatpush.msrb.mxu2 %v4723_v61 }
 0x2f3   :  { %992 = vmatpush.msrb.mxu0 %v4725_v62  ;;  %949 = vmatpush.msrb.mxu2 %v4727_v11 }
 0x2f5   :  { %993 = vmatpush.msrb.mxu0 %v4730_v12  ;;  %950 = vmatpush.msrb.mxu2 %v4733_v13 }
 0x2f7   :  { %994 = vmatpush.msrb.mxu0 %v4736_v20  ;;  %951 = vmatpush.msrb.mxu2 %v4739_v21 }
 0x35b   :  { %v472_v53 = vpop.f32.mrf.mxu0 }
 0x35c   :  { %v475_v14 = vadd.f32 %v4789_v50, %v472_v53 }
 0x35e   :  { %v496_v54 = vadd.f32 %v493_v52, %v475_v14  ;;  %v597_v14 = vpop.f32.mrf.mxu1 }
 0x360   :  { %v3787_v56 = vmul.f32 -1.442695, %v496_v54 }
 0x361   :  { %v411_v58 = vpop.f32.mrf.mxu2 }
 0x362   :  { %3955 = vpow2.f32 %v3787_v56  ;;  %v414_v59 = vadd.f32 %v4795_v55, %v411_v58  ;;  %v685_v22 = vpop.f32.mrf.mxu3 }
 0x363   :  { %v689_v37 = vrot.slane %v685_v22, 6  ;;  %v576_v21 = vpop.f32.mrf.mxu0 }
 0x364   :  { %v435_v53 = vadd.f32 %v432_v36, %v414_v59  ;;  %v579_v52 = vadd.f32 %v4800_v57, %v576_v21  ;;  %v4809_v21 = vld [vmem:[%s5638_s6 + $0x2] ss:$0 sm:$0xff] }
 0x365   :  { %690 = vrot.lane.b32.xlu0 %v689_v37, %s4468_s30  ;;  %5714 = vst [vmem:[#allocation34_spill] sm:$0xff] %v4809_v21 }
 0x366   :  { %v3785_v50 = vmul.f32 -1.442695, %v435_v53  ;;  %v600_v54 = vadd.f32 %v597_v14, %v579_v52 }
 0x368   :  { %v3956_v20 = vpop.eup %3955  ;;  %3957 = vpow2.f32 %v3785_v50  ;;  %v3790_v13 = vmul.f32 -1.442695, %v600_v54 }
 0x369   :  { %v500_v12 = vadd.f32 1.0, %v3956_v20  ;;  %v533_v37 = vpop.f32.mrf.mxu2 }
 0x36a   :  { %3959 = vpow2.f32 %v3790_v13  ;;  %v536_v13 = vadd.f32 %v4809_v21, %v533_v37 }
 0x36b   :  { %3961 = vrcp.f32 %v500_v12  ;;  %v730_v56 = vpop.f32.mrf.mxu0  ;;  %v512_v57 = vand.u32 2147483648, %v500_v12  ;;  %vm506_vm15 = vweird.f32 %v500_v12  ;;  %v510_v61 = vand.u32 2147483647, %v500_v12 }
 0x36c   :  { %v734_v11 = vrot.slane %v730_v56, 6  ;;  %v557_v54 = vadd.f32 %v554_v43, %v536_v13 }
 0x36d   :  { %vm511_vm3 = vcmp.eq.f32.partialorder %v510_v61, 8.507059e+37 }
 0x36e   :  { %v3958_v58 = vpop.eup %3957  ;;  %735 = vrot.lane.b32.xlu1 %v734_v11, %s4467_s29 }
 0x36f   :  { %v439_v22 = vadd.f32 1.0, %v3958_v58 }
 0x370   :  { %v3960_v36 = vpop.eup %3959 }
 0x371   :  { %v3962_v59 = vpop.eup %3961  ;;  %3963 = vrcp.f32 %v439_v22  ;;  %v604_v50 = vadd.f32 1.0, %v3960_v36  ;;  %v451_v60 = vand.u32 2147483648, %v439_v22  ;;  %v449_v51 = vand.u32 2147483647, %v439_v22 }
 0x372   :  { %v502_v53 = vmul.f32 %v3962_v59, %v500_v12  ;;  %vm507_vm14 = vweird.f32 %v3962_v59  ;;  %vm445_vm2 = vweird.f32 %v439_v22 }
 0x373   :  { %3965 = vrcp.f32 %v604_v50  ;;  %vm508_vm0 = vmor %vm506_vm15, %vm507_vm14  ;;  %v452_v43 = vor.u32 1.1754944e-38, %v451_v60  ;;  %vm450_vm5 = vcmp.eq.f32.partialorder %v449_v51, 8.507059e+37  ;;  %vm610_vm7 = vweird.f32 %v604_v50 }
 0x374   :  { %v503_v20 = vsub.f32 1.0, %v502_v53  ;;  %3967 = vtanh.f32 %v557_v54  ;;  %v513_v53 = vor.u32 1.1754944e-38, %v512_v57 }
 0x376   :  { %v504_v52 = vmul.f32 %v3962_v59, %v503_v20 }
 0x377   :  { %v3964_v14 = vpop.eup %3963 }
 0x378   :  { %v441_v11 = vmul.f32 %v3964_v14, %v439_v22  ;;  %v505_v56 = vadd.f32 %v3962_v59, %v504_v52  ;;  %vm446_vm1 = vweird.f32 %v3964_v14 }
 0x379   :  { %v3966_v58 = vpop.eup %3965  ;;  %vm447_vm4 = vmor %vm445_vm2, %vm446_vm1 }
 0x37a   :  { %v442_v55 = vsub.f32 1.0, %v441_v11  ;;  %v606_v62 = vmul.f32 %v3966_v58, %v604_v50  ;;  %v509_v37 = vsel %vm508_vm0, %v3962_v59, %v505_v56  ;;  %v3968_v11 = vpop.eup %3967  ;;  %vm611_vm6 = vweird.f32 %v3966_v58 }
 0x37b   :  { %v514_v13 = vsel %vm511_vm3, %v513_v53, %v509_v37  ;;  %v616_v59 = vand.u32 2147483648, %v604_v50  ;;  %vm612_vm8 = vmor %vm610_vm7, %vm611_vm6 }
 0x37c   :  { %v443_v36 = vmul.f32 %v3964_v14, %v442_v55  ;;  %v607_v20 = vsub.f32 1.0, %v606_v62  ;;  %v620_v47 = vmul.f32 0.0, %v514_v13  ;;  %v614_v62 = vand.u32 2147483647, %v604_v50 }
 0x37d   :  { %v617_v60 = vor.u32 1.1754944e-38, %v616_v59 }
 0x37e   :  { %v444_v21 = vadd.f32 %v3964_v14, %v443_v36  ;;  %v608_v46 = vmul.f32 %v3966_v58, %v607_v20  ;;  %vm615_vm9 = vcmp.eq.f32.partialorder %v614_v62, 8.507059e+37 }
 0x380   :  { %v448_v52 = vsel %vm447_vm4, %v3964_v14, %v444_v21  ;;  %v609_v55 = vadd.f32 %v3966_v58, %v608_v46 }
 0x381   :  { %v453_v12 = vsel %vm450_vm5, %v452_v43, %v448_v52 }
 0x382   :  { %v621_v41 = vmul.f32 %v3968_v11, %v453_v12  ;;  %v613_v61 = vsel %vm612_vm8, %v3966_v58, %v609_v55 }
 0x383   :  { %v618_v51 = vsel %vm615_vm9, %v617_v60, %v613_v61 }
 0x384   :  { %v4812_v54 = vadd.f32 %v621_v41, %v620_v47 }
 0x386   :  { %3969 = vtanh.f32 %v4812_v54 }
 0x38c   :  { %v3970_v57 = vpop.eup %3969 }
 0x38d   :  { %v4815_v22 = vmul.f32 %v3970_v57, %v618_v51 }
 0x38f   :  { %3799 = vmatmul.msk.f32.vlgmr.msra.gmra.mxu3 %vm214_vm13, %v4815_v22  ;;  %3802 = vmatmul.msk.f32.vlgmr.msrb.gmra.mxu1 %vm214_vm13, %v4815_v22 }
 0x390   :  { %1100 = vmatpush.msra.mxu3 %v4535_v0  ;;  %1172 = vmatpush.msrb.mxu1 %v4575_v16 }
 0x392   :  { %1101 = vmatpush.msra.mxu3 %v4539_v2  ;;  %1173 = vmatpush.msrb.mxu1 %v4580_v17  ;;  %v642_v17 = vpop.f32.mrf.mxu2 }
 0x394   :  { %1102 = vmatpush.msra.mxu3 %v4545_v4  ;;  %1174 = vmatpush.msrb.mxu1 %v4583_v18  ;;  %v646_v18 = vrot.slane %v642_v17, 6 }
 0x396   :  { %1103 = vmatpush.msra.mxu3 %v4555_v8  ;;  %1175 = vmatpush.msrb.mxu1 %v4586_v19  ;;  %v757_v8 = vpop.f32.mrf.mxu1  ;;  %v648_v19 = vadd.f32 %v646_v18, %v4597_v26  ;;  %v786_v18 = vrot.slane %v4604_v63, 6 }
 0x397   :  { %3805 = vmatmul.msk.f32.vlgmr.msrb.gmra.mxu3 %vm214_vm13, %v4815_v22  ;;  %3807 = vmatmul.msk.f32.vlgmr.msra.gmra.mxu1 %vm214_vm13, %v4815_v22  ;;  %v761_v16 = vrot.slane %v757_v8, 6 }
 0x398   :  { %1267 = vmatpush.msrb.mxu3 %v4611_v23  ;;  %1328 = vmatpush.msra.mxu1 %v4613_v24  ;;  %v3792_v41 = vmul.f32 -1.442695, %v648_v19 }
 0x39a   :  { %1268 = vmatpush.msrb.mxu3 %v4615_v25  ;;  %1329 = vmatpush.msra.mxu1 %v4620_v27 }
 0x39c   :  { %1269 = vmatpush.msrb.mxu3 %v4622_v28  ;;  %1330 = vmatpush.msra.mxu1 %v4624_v29 }
 0x39e   :  { %1270 = vmatpush.msrb.mxu3 %v4630_v31  ;;  %1331 = vmatpush.msra.mxu1 %v4632_v32 }
 0x3d7   :  { %v691_v11 = vpop.permute.xlu0 %690 }
 0x3d8   :  { %v693_v12 = vadd.f32 %v691_v11, %v4597_v26 }
 0x3da   :  { %v3794_v55 = vmul.f32 -1.442695, %v693_v12 }
 0x3e0   :  { %v736_v0 = vpop.permute.xlu1 %735 }
 0x3e1   :  { %v738_v2 = vadd.f32 %v736_v0, %v4597_v26 }
 0x3e3   :  { %3971 = vtanh.f32 %v738_v2 }
 0x3e4   :  { %3973 = vpow2.f32 %v3792_v41 }
 0x3e9   :  { %v3972_v4 = vpop.eup %3971 }
 0x3ea   :  { %790 = vrot.lane.b32.xlu2 %v3972_v4, %s4467_s29  ;;  %v3974_v46 = vpop.eup %3973 }
 0x3eb   :  { %v652_v47 = vadd.f32 1.0, %v3974_v46 }
 0x3ed   :  { %3975 = vrcp.f32 %v652_v47  ;;  %v664_v36 = vand.u32 2147483648, %v652_v47  ;;  %vm658_vm11 = vweird.f32 %v652_v47  ;;  %v662_v37 = vand.u32 2147483647, %v652_v47 }
 0x3ee   :  { %3977 = vpow2.f32 %v3794_v55 }
 0x3ef   :  { %v665_v20 = vor.u32 1.1754944e-38, %v664_v36  ;;  %vm663_vm14 = vcmp.eq.f32.partialorder %v662_v37, 8.507059e+37 }
 0x3f2   :  { %762 = vrot.lane.b32.xlu2 %v761_v16, %s4469_s10 }
 0x3f3   :  { %v3976_v21 = vpop.eup %3975 }
 0x3f4   :  { %v654_v50 = vmul.f32 %v3976_v21, %v652_v47  ;;  %vm659_vm10 = vweird.f32 %v3976_v21  ;;  %v3978_v59 = vpop.eup %3977 }
 0x3f5   :  { %vm660_vm12 = vmor %vm658_vm11, %vm659_vm10  ;;  %v697_v62 = vadd.f32 1.0, %v3978_v59 }
 0x3f6   :  { %v655_v14 = vsub.f32 1.0, %v654_v50 }
 0x3f7   :  { %3979 = vrcp.f32 %v697_v62  ;;  %v709_v2 = vand.u32 2147483648, %v697_v62  ;;  %vm703_vm0 = vweird.f32 %v697_v62  ;;  %v707_v4 = vand.u32 2147483647, %v697_v62 }
 0x3f8   :  { %v656_v56 = vmul.f32 %v3976_v21, %v655_v14 }
 0x3f9   :  { %v710_v16 = vor.u32 1.1754944e-38, %v709_v2  ;;  %vm708_vm2 = vcmp.eq.f32.partialorder %v707_v4, 8.507059e+37 }
 0x3fa   :  { %v657_v58 = vadd.f32 %v3976_v21, %v656_v56 }
 0x3fc   :  { %v661_v53 = vsel %vm660_vm12, %v3976_v21, %v657_v58 }
 0x3fd   :  { %v666_v13 = vsel %vm663_vm14, %v665_v20, %v661_v53  ;;  %v3980_v61 = vpop.eup %3979 }
 0x3fe   :  { %v699_v60 = vmul.f32 %v3980_v61, %v697_v62  ;;  %vm704_vm15 = vweird.f32 %v3980_v61 }
 0x3ff   :  { %vm705_vm1 = vmor %vm703_vm0, %vm704_vm15 }
 0x400   :  { %v700_v57 = vsub.f32 1.0, %v699_v60 }
 0x402   :  { %v701_v51 = vmul.f32 %v3980_v61, %v700_v57  ;;  %v5728_v57 = vld [vmem:[#allocation32_spill] sm:$0xff] }
 0x404   :  { %v702_v0 = vadd.f32 %v3980_v61, %v701_v51 }
 0x406   :  { %v706_v8 = vsel %vm705_vm1, %v3980_v61, %v702_v0 }
 0x407   :  { %v711_v17 = vsel %vm708_vm2, %v710_v16, %v706_v8  ;;  %v5729_v16 = vld [vmem:[#allocation33_spill] sm:$0xff] }
 0x408   :  { %v788_v19 = vmul.f32 %v786_v18, %v711_v17 }
 0x444   :  { %v791_v43 = vpop.permute.xlu2 %790 }
 0x445   :  { %v793_v52 = vmul.f32 %v791_v43, %v666_v13 }
 0x447   :  { %795 = vrot.lane.b32.xlu1 %v793_v52, %s4468_s30 }
 0x44c   :  { %v763_v21 = vpop.permute.xlu2 %762 }
 0x44d   :  { %v765_v50 = vadd.f32 %v763_v21, %v4597_v26 }
 0x44f   :  { %v3797_v14 = vmul.f32 -1.442695, %v765_v50 }
 0x4b9   :  { %v796_v41 = vpop.permute.xlu1 %795 }
 0x4ba   :  { %v4848_v46 = vadd.f32 %v796_v41, %v788_v19 }
 0x4bc   :  { %3981 = vtanh.f32 %v4848_v46 }
 0x4bd   :  { %3983 = vpow2.f32 %v3797_v14 }
 0x4c2   :  { %v3982_v47 = vpop.eup %3981 }
 0x4c3   :  { %801 = vrot.lane.b32.xlu0 %v3982_v47, %s4467_s29  ;;  %v3984_v56 = vpop.eup %3983 }
 0x4c4   :  { %v769_v58 = vadd.f32 1.0, %v3984_v56 }
 0x4c6   :  { %3985 = vrcp.f32 %v769_v58  ;;  %v781_v43 = vand.u32 2147483648, %v769_v58  ;;  %vm775_vm4 = vweird.f32 %v769_v58  ;;  %v779_v13 = vand.u32 2147483647, %v769_v58 }
 0x4c8   :  { %v782_v11 = vor.u32 1.1754944e-38, %v781_v43  ;;  %vm780_vm6 = vcmp.eq.f32.partialorder %v779_v13, 8.507059e+37  ;;  %v5730_v13 = vld [vmem:[#allocation34_spill] sm:$0xff] }
 0x4cc   :  { %v3986_v36 = vpop.eup %3985 }
 0x4cd   :  { %v771_v37 = vmul.f32 %v3986_v36, %v769_v58  ;;  %vm776_vm3 = vweird.f32 %v3986_v36 }
 0x4ce   :  { %vm777_vm5 = vmor %vm775_vm4, %vm776_vm3 }
 0x4cf   :  { %v772_v63 = vsub.f32 1.0, %v771_v37 }
 0x4d1   :  { %v773_v53 = vmul.f32 %v3986_v36, %v772_v63 }
 0x4d3   :  { %v774_v20 = vadd.f32 %v3986_v36, %v773_v53 }
 0x4d5   :  { %v778_v52 = vsel %vm777_vm5, %v3986_v36, %v774_v20 }
 0x4d6   :  { %v783_v12 = vsel %vm780_vm6, %v782_v11, %v778_v52 }
 0x535   :  { %v802_v55 = vpop.permute.xlu0 %801 }
 0x536   :  { %v804_v59 = vmul.f32 %v802_v55, %v783_v12 }
 0x538   :  { %v806_v62 = vrot.slane %v804_v59, 2 }
 0x53a   :  { %807 = vrot.lane.b32.xlu1 %v806_v62, %s4468_s30 }
 0x5ac   :  { %v808_v61 = vpop.permute.xlu1 %807 }
 0x5ad   :  { %3798 = vmatmul.msk.f32.vlgmr.msra.gmra.mxu2 %vm214_vm13, %v808_v61  ;;  %3801 = vmatmul.msk.f32.vlgmr.msra.gmra.mxu0 %vm214_vm13, %v808_v61 }
 0x5ae   :  { %3811 = vmatmul.msk.f32.vlgmr.msra.gmra.mxu3 %vm214_vm13, %v808_v61  ;;  %3814 = vmatmul.msk.f32.vlgmr.msrb.gmra.mxu1 %vm214_vm13, %v808_v61 }
 0x5af   :  { %1145 = vmatpush.msra.mxu0 %v4537_v1  ;;  %1057 = vmatpush.msra.mxu2 %v4549_v6  ;;  %v5715_v1 = vld [vmem:[#allocation18_spill] sm:$0xff]  ;;  %v5718_v6 = vld [vmem:[#allocation21_spill] sm:$0xff] }
 0x5b0   :  { %1389 = vmatpush.msra.mxu3 %v4639_v34  ;;  %1432 = vmatpush.msrb.mxu1 %v4641_v35  ;;  %v5725_v34 = vld [vmem:[#allocation28_spill] sm:$0xff]  ;;  %v5726_v35 = vld [vmem:[#allocation29_spill] sm:$0xff] }
 0x5b1   :  { %1146 = vmatpush.msra.mxu0 %v4543_v3  ;;  %1058 = vmatpush.msra.mxu2 %v4553_v7  ;;  %v5716_v3 = vld [vmem:[#allocation20_spill] sm:$0xff]  ;;  %v5719_v7 = vld [vmem:[#allocation22_spill] sm:$0xff] }
 0x5b2   :  { %1390 = vmatpush.msra.mxu3 %v4655_v39  ;;  %1433 = vmatpush.msrb.mxu1 %v4657_v40  ;;  %v913_v40 = vpop.f32.mrf.mxu1 }
 0x5b3   :  { %1147 = vmatpush.msra.mxu0 %v4547_v5  ;;  %1059 = vmatpush.msra.mxu2 %v4562_v10  ;;  %v5717_v5 = vld [vmem:[#allocation19_spill] sm:$0xff]  ;;  %v5721_v10 = vld [vmem:[#allocation24_spill] sm:$0xff] }
 0x5b4   :  { %1391 = vmatpush.msra.mxu3 %v4667_v44  ;;  %1434 = vmatpush.msrb.mxu1 %v4669_v45  ;;  %v5727_v44 = vld [vmem:[#allocation31_spill] sm:$0xff] }
 0x5b5   :  { %3804 = vmatmul.msk.f32.vlgmr.msrb.gmra.mxu2 %vm214_vm13, %v808_v61  ;;  %3806 = vmatmul.msk.f32.vlgmr.msrb.gmra.mxu0 %vm214_vm13, %v808_v61 }
 0x5b6   :  { %1148 = vmatpush.msra.mxu0 %v4557_v9  ;;  %1060 = vmatpush.msra.mxu2 %v4572_v15  ;;  %v5720_v9 = vld [vmem:[#allocation23_spill] sm:$0xff]  ;;  %v5722_v15 = vld [vmem:[#allocation25_spill] sm:$0xff] }
 0x5b7   :  { %1392 = vmatpush.msra.mxu3 %v4679_v48  ;;  %1435 = vmatpush.msrb.mxu1 %v4681_v49 }
 0x5b8   :  { %1307 = vmatpush.msrb.mxu0 %v4626_v30  ;;  %1243 = vmatpush.msrb.mxu2 %v4651_v38  ;;  %v5723_v30 = vld [vmem:[#allocation26_spill] sm:$0xff]  ;;  %v852_v38 = vpop.f32.mrf.mxu3 }
 0x5ba   :  { %1308 = vmatpush.msrb.mxu0 %v4635_v33  ;;  %1244 = vmatpush.msrb.mxu2 %v4663_v42  ;;  %v5724_v33 = vld [vmem:[#allocation27_spill] sm:$0xff]  ;;  %v1017_v18 = vpop.f32.mrf.mxu1 }
 0x5bc   :  { %1309 = vmatpush.msrb.mxu0 %v5715_v1  ;;  %1245 = vmatpush.msrb.mxu2 %v5716_v3 }
 0x5bd   :  { %3809 = vmatmul.msk.f32.vlgmr.msra.gmra.mxu2 %vm214_vm13, %v808_v61  ;;  %3813 = vmatmul.msk.f32.vlgmr.msra.gmra.mxu0 %vm214_vm13, %v808_v61 }
 0x5be   :  { %1310 = vmatpush.msrb.mxu0 %v5717_v5  ;;  %1246 = vmatpush.msrb.mxu2 %v5718_v6 }
 0x5c0   :  { %1411 = vmatpush.msra.mxu0 %v5719_v7  ;;  %1368 = vmatpush.msra.mxu2 %v5720_v9  ;;  %v974_v39 = vpop.f32.mrf.mxu3 }
 0x5c2   :  { %1412 = vmatpush.msra.mxu0 %v5721_v10  ;;  %1369 = vmatpush.msra.mxu2 %v5722_v15 }
 0x5c4   :  { %1413 = vmatpush.msra.mxu0 %v5723_v30  ;;  %1370 = vmatpush.msra.mxu2 %v5724_v33 }
 0x5c6   :  { %1414 = vmatpush.msra.mxu0 %v5725_v34  ;;  %1371 = vmatpush.msra.mxu2 %v5726_v35 }
 0x62a   :  { %v892_v42 = vpop.f32.mrf.mxu0 }
 0x62b   :  { %v895_v45 = vadd.f32 %v5727_v44, %v892_v42 }
 0x62d   :  { %v916_v48 = vadd.f32 %v913_v40, %v895_v45 }
 0x62f   :  { %v3803_v49 = vmul.f32 -1.442695, %v916_v48 }
 0x630   :  { %v828_v60 = vpop.f32.mrf.mxu2 }
 0x631   :  { %3987 = vpow2.f32 %v3803_v49  ;;  %v831_v51 = vadd.f32 %v5728_v57, %v828_v60  ;;  %v1105_v0 = vpop.f32.mrf.mxu3 }
 0x632   :  { %v1109_v2 = vrot.slane %v1105_v0, 4  ;;  %v996_v4 = vpop.f32.mrf.mxu0 }
 0x633   :  { %v855_v8 = vadd.f32 %v852_v38, %v831_v51  ;;  %v999_v17 = vadd.f32 %v5729_v16, %v996_v4 }
 0x634   :  { %1110 = vrot.lane.b32.xlu1 %v1109_v2, %s4468_s30 }
 0x635   :  { %v3800_v19 = vmul.f32 -1.442695, %v855_v8  ;;  %v1020_v41 = vadd.f32 %v1017_v18, %v999_v17 }
 0x637   :  { %v3988_v47 = vpop.eup %3987  ;;  %3989 = vpow2.f32 %v3800_v19  ;;  %v3808_v21 = vmul.f32 -1.442695, %v1020_v41 }
 0x638   :  { %v920_v50 = vadd.f32 1.0, %v3988_v47  ;;  %v953_v63 = vpop.f32.mrf.mxu2  ;;  %v4913_v47 = vld [vmem:[#allocation5 + $0x78] sm:$0xff] }
 0x639   :  { %3991 = vpow2.f32 %v3808_v21  ;;  %v956_v52 = vadd.f32 %v5730_v13, %v953_v63  ;;  %v4916_v21 = vld [vmem:[#allocation5 + $0x30] sm:$0xff] }
 0x63a   :  { %3993 = vrcp.f32 %v920_v50  ;;  %v1150_v14 = vpop.f32.mrf.mxu0  ;;  %v932_v3 = vand.u32 2147483648, %v920_v50  ;;  %vm926_vm8 = vweird.f32 %v920_v50  ;;  %v930_v7 = vand.u32 2147483647, %v920_v50 }
 0x63b   :  { %v1154_v56 = vrot.slane %v1150_v14, 4  ;;  %v977_v59 = vadd.f32 %v974_v39, %v956_v52  ;;  %v4922_v14 = vld [vmem:[#allocation5 + $0x28] sm:$0xff] }
 0x63c   :  { %v933_v33 = vor.u32 1.1754944e-38, %v932_v3  ;;  %vm931_vm12 = vcmp.eq.f32.partialorder %v930_v7, 8.507059e+37 }
 0x63d   :  { %v3990_v58 = vpop.eup %3989  ;;  %1155 = vrot.lane.b32.xlu2 %v1154_v56, %s4467_s29  ;;  %v4925_v56 = vld [vmem:[#allocation5 + $0x68] sm:$0xff] }
 0x63e   :  { %v859_v36 = vadd.f32 1.0, %v3990_v58  ;;  %v4928_v58 = vld [vmem:[#allocation5 + $0x20] sm:$0xff] }
 0x63f   :  { %v3992_v37 = vpop.eup %3991 }
 0x640   :  { %v3994_v53 = vpop.eup %3993  ;;  %3995 = vrcp.f32 %v859_v36  ;;  %v1024_v20 = vadd.f32 1.0, %v3992_v37  ;;  %v871_v9 = vand.u32 2147483648, %v859_v36  ;;  %v869_v15 = vand.u32 2147483647, %v859_v36 }
 0x641   :  { %v922_v43 = vmul.f32 %v3994_v53, %v920_v50  ;;  %vm927_vm7 = vweird.f32 %v3994_v53  ;;  %vm865_vm11 = vweird.f32 %v859_v36  ;;  %v4919_v50 = vld [vmem:[#allocation5 + $0x70] sm:$0xff] }
 0x642   :  { %3997 = vrcp.f32 %v1024_v20  ;;  %vm928_vm9 = vmor %vm926_vm8, %vm927_vm7  ;;  %v872_v38 = vor.u32 1.1754944e-38, %v871_v9  ;;  %vm870_vm15 = vcmp.eq.f32.partialorder %v869_v15, 8.507059e+37  ;;  %v1036_v2 = vand.u32 2147483648, %v1024_v20 }
 0x643   :  { %v923_v11 = vsub.f32 1.0, %v922_v43  ;;  %3999 = vtanh.f32 %v977_v59  ;;  %vm1030_vm1 = vweird.f32 %v1024_v20  ;;  %v1034_v4 = vand.u32 2147483647, %v1024_v20 }
 0x644   :  { %v1037_v17 = vor.u32 1.1754944e-38, %v1036_v2 }
 0x645   :  { %v924_v12 = vmul.f32 %v3994_v53, %v923_v11  ;;  %vm1035_vm3 = vcmp.eq.f32.partialorder %v1034_v4, 8.507059e+37 }
 0x646   :  { %v3996_v55 = vpop.eup %3995 }
 0x647   :  { %v861_v62 = vmul.f32 %v3996_v55, %v859_v36  ;;  %v925_v61 = vadd.f32 %v3994_v53, %v924_v12  ;;  %vm866_vm10 = vweird.f32 %v3996_v55  ;;  %v4931_v36 = vld [vmem:[#allocation5 + $0x60] sm:$0xff] }
 0x648   :  { %v3998_v1 = vpop.eup %3997  ;;  %vm867_vm14 = vmor %vm865_vm11, %vm866_vm10 }
 0x649   :  { %v862_v5 = vsub.f32 1.0, %v861_v62  ;;  %v1026_v6 = vmul.f32 %v3998_v1, %v1024_v20  ;;  %v929_v30 = vsel %vm928_vm9, %v3994_v53, %v925_v61  ;;  %v4000_v42 = vpop.eup %3999  ;;  %vm1031_vm0 = vweird.f32 %v3998_v1 }
 0x64a   :  { %v934_v39 = vsel %vm931_vm12, %v933_v33, %v929_v30  ;;  %vm1032_vm2 = vmor %vm1030_vm1, %vm1031_vm0 }
 0x64b   :  { %v863_v10 = vmul.f32 %v3996_v55, %v862_v5  ;;  %v1027_v34 = vsub.f32 1.0, %v1026_v6  ;;  %v1040_v49 = vmul.f32 %v934_v39, %v4812_v54  ;;  %v4910_v54 = vld [vmem:[#allocation5 + $0x38] sm:$0xff] }
 0x64d   :  { %v864_v35 = vadd.f32 %v3996_v55, %v863_v10  ;;  %v1028_v45 = vmul.f32 %v3998_v1, %v1027_v34 }
 0x64f   :  { %v868_v40 = vsel %vm867_vm14, %v3996_v55, %v864_v35  ;;  %v1029_v0 = vadd.f32 %v3998_v1, %v1028_v45 }
 0x650   :  { %v873_v48 = vsel %vm870_vm15, %v872_v38, %v868_v40 }
 0x651   :  { %v1041_v60 = vmul.f32 %v4000_v42, %v873_v48  ;;  %v1033_v8 = vsel %vm1032_vm2, %v3998_v1, %v1029_v0 }
 0x652   :  { %v1038_v19 = vsel %vm1035_vm3, %v1037_v17, %v1033_v8 }
 0x653   :  { %v4901_v51 = vadd.f32 %v1041_v60, %v1040_v49  ;;  %v1206_v49 = vrot.slane %v4848_v46, 6 }
 0x655   :  { %4001 = vtanh.f32 %v4901_v51 }
 0x65b   :  { %v4002_v18 = vpop.eup %4001 }
 0x65c   :  { %v4904_v41 = vmul.f32 %v4002_v18, %v1038_v19 }
 0x65e   :  { %3817 = vmatmul.msk.f32.vlgmr.msrb.gmra.mxu3 %vm214_vm13, %v4904_v41  ;;  %3820 = vmatmul.msk.f32.vlgmr.msra.gmra.mxu1 %vm214_vm13, %v4904_v41 }
 0x65f   :  { %1520 = vmatpush.msrb.mxu3 %v4910_v54  ;;  %1592 = vmatpush.msra.mxu1 %v4913_v47 }
 0x661   :  { %1521 = vmatpush.msrb.mxu3 %v4916_v21  ;;  %1593 = vmatpush.msra.mxu1 %v4919_v50 }
 0x663   :  { %1522 = vmatpush.msrb.mxu3 %v4922_v14  ;;  %1594 = vmatpush.msra.mxu1 %v4925_v56 }
 0x665   :  { %1523 = vmatpush.msrb.mxu3 %v4928_v58  ;;  %1595 = vmatpush.msra.mxu1 %v4931_v36 }
 0x666   :  { %3823 = vmatmul.msk.f32.vlgmr.msra.gmra.mxu3 %vm214_vm13, %v4904_v41  ;;  %3825 = vmatmul.msk.f32.vlgmr.msrb.gmra.mxu1 %vm214_vm13, %v4904_v41 }
 0x667   :  { %1687 = vmatpush.msra.mxu3 %v4611_v23  ;;  %1748 = vmatpush.msrb.mxu1 %v4613_v24  ;;  %v1177_v23 = vpop.f32.mrf.mxu1 }
 0x668   :  { %v1181_v24 = vrot.slane %v1177_v23, 4 }
 0x669   :  { %1688 = vmatpush.msra.mxu3 %v4615_v25  ;;  %1749 = vmatpush.msrb.mxu1 %v4620_v27  ;;  %v1062_v25 = vpop.f32.mrf.mxu2 }
 0x66a   :  { %v1066_v27 = vrot.slane %v1062_v25, 4 }
 0x66b   :  { %1689 = vmatpush.msra.mxu3 %v4622_v28  ;;  %1750 = vmatpush.msrb.mxu1 %v4624_v29 }
 0x66c   :  { %v1068_v28 = vadd.f32 %v1066_v27, %v4597_v26 }
 0x66d   :  { %1690 = vmatpush.msra.mxu3 %v4630_v31  ;;  %1751 = vmatpush.msrb.mxu1 %v4632_v32 }
 0x66e   :  { %v3810_v29 = vmul.f32 -1.442695, %v1068_v28 }
 0x697   :  { %v1156_v37 = vpop.permute.xlu2 %1155 }
 0x698   :  { %v1158_v63 = vadd.f32 %v1156_v37, %v4597_v26 }
 0x69a   :  { %4003 = vtanh.f32 %v1158_v63 }
 0x69b   :  { %4005 = vpow2.f32 %v3810_v29 }
 0x6a0   :  { %v4004_v53 = vpop.eup %4003 }
 0x6a1   :  { %1210 = vrot.lane.b32.xlu0 %v4004_v53, %s4467_s29  ;;  %v4006_v31 = vpop.eup %4005 }
 0x6a2   :  { %v1072_v20 = vadd.f32 1.0, %v4006_v31 }
 0x6a4   :  { %4007 = vrcp.f32 %v1072_v20  ;;  %v1084_v55 = vand.u32 2147483648, %v1072_v20  ;;  %vm1078_vm5 = vweird.f32 %v1072_v20  ;;  %v1082_v59 = vand.u32 2147483647, %v1072_v20 }
 0x6a6   :  { %v1085_v61 = vor.u32 1.1754944e-38, %v1084_v55  ;;  %vm1083_vm7 = vcmp.eq.f32.partialorder %v1082_v59, 8.507059e+37  ;;  %v1111_v6 = vpop.permute.xlu1 %1110  ;;  %v4969_v55 = vld [vmem:[#allocation8 + $0x58] sm:$0xff] }
 0x6a7   :  { %v1113_v7 = vadd.f32 %v1111_v6, %v4597_v26  ;;  %v4972_v59 = vld [vmem:[#allocation8 + $0x78] sm:$0xff]  ;;  %v4990_v6 = vld [vmem:[#allocation5 + $0x8] sm:$0xff] }
 0x6a9   :  { %1182 = vrot.lane.b32.xlu0 %v1181_v24, %s4469_s10  ;;  %v3812_v9 = vmul.f32 -1.442695, %v1113_v7  ;;  %v4993_v7 = vld [vmem:[#allocation8 + $0x48] sm:$0xff] }
 0x6aa   :  { %v4008_v32 = vpop.eup %4007 }
 0x6ab   :  { %v1074_v43 = vmul.f32 %v4008_v32, %v1072_v20  ;;  %vm1079_vm4 = vweird.f32 %v4008_v32  ;;  %4009 = vpow2.f32 %v3812_v9  ;;  %v4996_v9 = vld [vmem:[#allocation8 + $0x68] sm:$0xff] }
 0x6ac   :  { %vm1080_vm6 = vmor %vm1078_vm5, %vm1079_vm4 }
 0x6ad   :  { %v1075_v52 = vsub.f32 1.0, %v1074_v43 }
 0x6af   :  { %v1076_v11 = vmul.f32 %v4008_v32, %v1075_v52 }
 0x6b1   :  { %v1077_v12 = vadd.f32 %v4008_v32, %v1076_v11  ;;  %v4010_v10 = vpop.eup %4009  ;;  %v4963_v11 = vld [vmem:[#allocation5 + $0x58] sm:$0xff] }
 0x6b2   :  { %v1117_v15 = vadd.f32 1.0, %v4010_v10  ;;  %v5001_v10 = vld [vmem:[#allocation5 + $0x40] sm:$0xff] }
 0x6b3   :  { %v1081_v62 = vsel %vm1080_vm6, %v4008_v32, %v1077_v12  ;;  %v4966_v12 = vld [vmem:[#allocation5 + $0x18] sm:$0xff] }
 0x6b4   :  { %v1086_v3 = vsel %vm1083_vm7, %v1085_v61, %v1081_v62  ;;  %4011 = vrcp.f32 %v1117_v15  ;;  %v1129_v39 = vand.u32 2147483648, %v1117_v15  ;;  %vm1123_vm9 = vweird.f32 %v1117_v15  ;;  %v4975_v62 = vld [vmem:[#allocation5 + $0x50] sm:$0xff] }
 0x6b5   :  { %v1127_v40 = vand.u32 2147483647, %v1117_v15  ;;  %v4978_v61 = vld [vmem:[#allocation5 + $0x10] sm:$0xff] }
 0x6b6   :  { %v1130_v45 = vor.u32 1.1754944e-38, %v1129_v39  ;;  %v5022_v39 = vld [vmem:[#allocation7 + $0x10] sm:$0xff] }
 0x6b7   :  { %vm1128_vm11 = vcmp.eq.f32.partialorder %v1127_v40, 8.507059e+37  ;;  %5732 = vst [vmem:[#allocation20_spill] sm:$0xff] %v5022_v39  ;;  %v5025_v40 = vld [vmem:[#allocation7 + $0x28] sm:$0xff] }
 0x6b8   :  { %5733 = vst [vmem:[#allocation19_spill] sm:$0xff] %v5025_v40 }
 0x6ba   :  { %v4012_v30 = vpop.eup %4011 }
 0x6bb   :  { %v1119_v33 = vmul.f32 %v4012_v30, %v1117_v15  ;;  %vm1124_vm8 = vweird.f32 %v4012_v30  ;;  %v5004_v15 = vld [vmem:[#allocation5] sm:$0xff] }
 0x6bc   :  { %vm1125_vm10 = vmor %vm1123_vm9, %vm1124_vm8 }
 0x6bd   :  { %v1120_v34 = vsub.f32 1.0, %v1119_v33  ;;  %v5010_v33 = vld [vmem:[#allocation8 + $0x60] sm:$0xff] }
 0x6bf   :  { %v1121_v35 = vmul.f32 %v4012_v30, %v1120_v34  ;;  %v5013_v34 = vld [vmem:[#allocation7 + $0x38] sm:$0xff] }
 0x6c1   :  { %v1122_v38 = vadd.f32 %v4012_v30, %v1121_v35  ;;  %v5016_v35 = vld [vmem:[#allocation7 + $0x18] sm:$0xff] }
 0x6c3   :  { %v1126_v42 = vsel %vm1125_vm10, %v4012_v30, %v1122_v38  ;;  %v5007_v30 = vld [vmem:[#allocation8 + $0x40] sm:$0xff]  ;;  %v5019_v38 = vld [vmem:[#allocation7 + $0x30] sm:$0xff] }
 0x6c4   :  { %v1131_v48 = vsel %vm1128_vm11, %v1130_v45, %v1126_v42  ;;  %5731 = vst [vmem:[#allocation18_spill] sm:$0xff] %v5019_v38  ;;  %v5028_v42 = vld [vmem:[#allocation7 + $0x8] sm:$0xff]  ;;  %v5033_v45 = vld [vmem:[#allocation7 + $0x20] sm:$0xff] }
 0x6c5   :  { %v1208_v60 = vmul.f32 %v1206_v49, %v1131_v48  ;;  %5734 = vst [vmem:[#allocation21_spill] sm:$0xff] %v5028_v42  ;;  %v5036_v48 = vld [vmem:[#allocation7] sm:$0xff]  ;;  %v5039_v49 = vld [vmem:[#allocation7 + $0x78] sm:$0xff] }
 0x6c6   :  { %5735 = vst [vmem:[#allocation22_spill] sm:$0xff] %v5033_v45 }
 0x6c7   :  { %5736 = vst [vmem:[#allocation23_spill] sm:$0xff] %v5036_v48 }
 0x6c8   :  { %5737 = vst [vmem:[#allocation24_spill] sm:$0xff] %v5039_v49 }
 0x713   :  { %v1211_v1 = vpop.permute.xlu0 %1210 }
 0x714   :  { %v1213_v5 = vmul.f32 %v1211_v1, %v1086_v3  ;;  %v4981_v1 = vld [vmem:[#allocation8 + $0x50] sm:$0xff] }
 0x715   :  { %v4984_v3 = vld [vmem:[#allocation8 + $0x70] sm:$0xff] }
 0x716   :  { %1215 = vrot.lane.b32.xlu2 %v1213_v5, %s4468_s30  ;;  %v4987_v5 = vld [vmem:[#allocation5 + $0x48] sm:$0xff] }
 0x71b   :  { %v1183_v8 = vpop.permute.xlu0 %1182 }
 0x71c   :  { %v1185_v17 = vadd.f32 %v1183_v8, %v4597_v26  ;;  %v5051_v8 = vld [vmem:[#allocation7 + $0x68] sm:$0xff] }
 0x71d   :  { %5741 = vst [vmem:[#allocation28_spill] sm:$0xff] %v5051_v8 }
 0x71e   :  { %v3815_v18 = vmul.f32 -1.442695, %v1185_v17  ;;  %v5054_v17 = vld [vmem:[#allocation7 + $0x48] sm:$0xff] }
 0x71f   :  { %5742 = vst [vmem:[#allocation29_spill] sm:$0xff] %v5054_v17 }
 0x770   :  { %v1216_v0 = vpop.permute.xlu2 %1215 }
 0x771   :  { %v4953_v2 = vadd.f32 %v1216_v0, %v1208_v60  ;;  %v5042_v60 = vld [vmem:[#allocation7 + $0x58] sm:$0xff]  ;;  %v5045_v0 = vld [vmem:[#allocation7 + $0x70] sm:$0xff] }
 0x772   :  { %5738 = vst [vmem:[#allocation25_spill] sm:$0xff] %v5042_v60 }
 0x773   :  { %4013 = vtanh.f32 %v4953_v2  ;;  %5739 = vst [vmem:[#allocation26_spill] sm:$0xff] %v5045_v0 }
 0x774   :  { %4015 = vpow2.f32 %v3815_v18  ;;  %v5057_v18 = vld [vmem:[#allocation7 + $0x60] sm:$0xff] }
 0x775   :  { %5743 = vst [vmem:[#allocation31_spill] sm:$0xff] %v5057_v18 }
 0x779   :  { %v4014_v4 = vpop.eup %4013 }
 0x77a   :  { %1221 = vrot.lane.b32.xlu1 %v4014_v4, %s4467_s29  ;;  %v4016_v19 = vpop.eup %4015  ;;  %v5048_v4 = vld [vmem:[#allocation7 + $0x50] sm:$0xff] }
 0x77b   :  { %v1189_v37 = vadd.f32 1.0, %v4016_v19  ;;  %5740 = vst [vmem:[#allocation27_spill] sm:$0xff] %v5048_v4  ;;  %v5060_v19 = vld [vmem:[#allocation7 + $0x40] sm:$0xff] }
 0x77c   :  { %5744 = vst [vmem:[#allocation32_spill] sm:$0xff] %v5060_v19 }
 0x77d   :  { %4017 = vrcp.f32 %v1189_v37  ;;  %v1201_v25 = vand.u32 2147483648, %v1189_v37  ;;  %vm1195_vm14 = vweird.f32 %v1189_v37  ;;  %v1199_v27 = vand.u32 2147483647, %v1189_v37 }
 0x77f   :  { %v1202_v29 = vor.u32 1.1754944e-38, %v1201_v25  ;;  %vm1200_vm0 = vcmp.eq.f32.partialorder %v1199_v27, 8.507059e+37 }
 0x783   :  { %v4018_v63 = vpop.eup %4017 }
 0x784   :  { %v1191_v53 = vmul.f32 %v4018_v63, %v1189_v37  ;;  %vm1196_vm12 = vweird.f32 %v4018_v63  ;;  %v1272_v37 = vpop.f32.mrf.mxu3 }
 0x785   :  { %vm1197_vm15 = vmor %vm1195_vm14, %vm1196_vm12  ;;  %vm3596_vm14 = vcmask 1040384  }
 0x786   :  { %v1192_v46 = vsub.f32 1.0, %v1191_v53  ;;  %v1333_v53 = vpop.f32.mrf.mxu1 }
 0x788   :  { %v1193_v23 = vmul.f32 %v4018_v63, %v1192_v46 }
 0x78a   :  { %v1194_v24 = vadd.f32 %v4018_v63, %v1193_v23 }
 0x78c   :  { %v1198_v28 = vsel %vm1197_vm15, %v4018_v63, %v1194_v24  ;;  %v1394_v63 = vpop.f32.mrf.mxu3  ;;  %vm3599_vm15 = vcmask 1041408  }
 0x78d   :  { %v1203_v31 = vsel %vm1200_vm0, %v1202_v29, %v1198_v28 }
 0x7ec   :  { %v1222_v20 = vpop.permute.xlu1 %1221 }
 0x7ed   :  { %v1224_v32 = vmul.f32 %v1222_v20, %v1203_v31 }
 0x7ef   :  { %v1226_v43 = vrot.slane %v1224_v32, 4 }
 0x7f1   :  { %1227 = vrot.lane.b32.xlu2 %v1226_v43, %s4468_s30 }
 0x84b   :  { %v1228_v52 = vpop.permute.xlu2 %1227 }
 0x84c   :  { %3816 = vmatmul.msk.f32.vlgmr.msrb.gmra.mxu2 %vm214_vm13, %v1228_v52  ;;  %3819 = vmatmul.msk.f32.vlgmr.msrb.gmra.mxu0 %vm214_vm13, %v1228_v52 }
 0x84d   :  { %3829 = vmatmul.msk.f32.vlgmr.msrb.gmra.mxu3 %vm214_vm13, %v1228_v52  ;;  %3832 = vmatmul.msk.f32.vlgmr.msra.gmra.mxu1 %vm214_vm13, %v1228_v52 }
 0x84e   :  { %1565 = vmatpush.msrb.mxu0 %v4963_v11  ;;  %1477 = vmatpush.msrb.mxu2 %v4966_v12 }
 0x84f   :  { %1809 = vmatpush.msrb.mxu3 %v4969_v55  ;;  %1852 = vmatpush.msra.mxu1 %v4972_v59 }
 0x850   :  { %1566 = vmatpush.msrb.mxu0 %v4975_v62  ;;  %1478 = vmatpush.msrb.mxu2 %v4978_v61 }
 0x851   :  { %1810 = vmatpush.msrb.mxu3 %v4981_v1  ;;  %1853 = vmatpush.msra.mxu1 %v4984_v3 }
 0x852   :  { %1567 = vmatpush.msrb.mxu0 %v4987_v5  ;;  %1479 = vmatpush.msrb.mxu2 %v4990_v6 }
 0x853   :  { %1811 = vmatpush.msrb.mxu3 %v4993_v7  ;;  %1854 = vmatpush.msra.mxu1 %v4996_v9 }
 0x854   :  { %3822 = vmatmul.msk.f32.vlgmr.msra.gmra.mxu2 %vm214_vm13, %v1228_v52  ;;  %3824 = vmatmul.msk.f32.vlgmr.msra.gmra.mxu0 %vm214_vm13, %v1228_v52 }
 0x855   :  { %1568 = vmatpush.msrb.mxu0 %v5001_v10  ;;  %1480 = vmatpush.msrb.mxu2 %v5004_v15 }
 0x856   :  { %1812 = vmatpush.msrb.mxu3 %v5007_v30  ;;  %1855 = vmatpush.msra.mxu1 %v5010_v33 }
 0x857   :  { %1727 = vmatpush.msra.mxu0 %v5013_v34  ;;  %1663 = vmatpush.msra.mxu2 %v5016_v35 }
 0x859   :  { %1728 = vmatpush.msra.mxu0 %v5019_v38  ;;  %1664 = vmatpush.msra.mxu2 %v5022_v39 }
 0x85b   :  { %1729 = vmatpush.msra.mxu0 %v5025_v40  ;;  %1665 = vmatpush.msra.mxu2 %v5028_v42 }
 0x85c   :  { %3827 = vmatmul.msk.f32.vlgmr.msrb.gmra.mxu2 %vm214_vm13, %v1228_v52  ;;  %3831 = vmatmul.msk.f32.vlgmr.msrb.gmra.mxu0 %vm214_vm13, %v1228_v52  ;;  %v1437_v52 = vpop.f32.mrf.mxu1 }
 0x85d   :  { %1730 = vmatpush.msra.mxu0 %v5033_v45  ;;  %1666 = vmatpush.msra.mxu2 %v5036_v48 }
 0x85f   :  { %1831 = vmatpush.msrb.mxu0 %v5039_v49  ;;  %1788 = vmatpush.msrb.mxu2 %v5042_v60 }
 0x861   :  { %1832 = vmatpush.msrb.mxu0 %v5045_v0  ;;  %1789 = vmatpush.msrb.mxu2 %v5048_v4 }
 0x863   :  { %1833 = vmatpush.msrb.mxu0 %v5051_v8  ;;  %1790 = vmatpush.msrb.mxu2 %v5054_v17 }
 0x865   :  { %1834 = vmatpush.msrb.mxu0 %v5057_v18  ;;  %1791 = vmatpush.msrb.mxu2 %v5060_v19 }
 0x8c9   :  { %v1312_v46 = vpop.f32.mrf.mxu0 }
 0x8ca   :  { %v1315_v23 = vadd.f32 %v5727_v44, %v1312_v46 }
 0x8cc   :  { %v1336_v24 = vadd.f32 %v1333_v53, %v1315_v23 }
 0x8ce   :  { %v3821_v25 = vmul.f32 -1.442695, %v1336_v24 }
 0x8cf   :  { %v1248_v27 = vpop.f32.mrf.mxu2 }
 0x8d0   :  { %4019 = vpow2.f32 %v3821_v25  ;;  %v1251_v28 = vadd.f32 %v5728_v57, %v1248_v27  ;;  %v1525_v29 = vpop.f32.mrf.mxu3 }
 0x8d1   :  { %v1529_v31 = vrot.slane %v1525_v29, 2  ;;  %v1416_v20 = vpop.f32.mrf.mxu0 }
 0x8d2   :  { %v1275_v32 = vadd.f32 %v1272_v37, %v1251_v28  ;;  %v1419_v43 = vadd.f32 %v5729_v16, %v1416_v20 }
 0x8d3   :  { %1530 = vrot.lane.b32.xlu2 %v1529_v31, %s4468_s30 }
 0x8d4   :  { %v3818_v19 = vmul.f32 -1.442695, %v1275_v32  ;;  %v1440_v18 = vadd.f32 %v1437_v52, %v1419_v43 }
 0x8d6   :  { %v4020_v17 = vpop.eup %4019  ;;  %4021 = vpow2.f32 %v3818_v19  ;;  %v3826_v44 = vmul.f32 -1.442695, %v1440_v18 }
 0x8d7   :  { %v1340_v53 = vadd.f32 1.0, %v4020_v17  ;;  %v1373_v25 = vpop.f32.mrf.mxu2 }
 0x8d8   :  { %4023 = vpow2.f32 %v3826_v44  ;;  %v1376_v29 = vadd.f32 %v5730_v13, %v1373_v25 }
 0x8d9   :  { %4025 = vrcp.f32 %v1340_v53  ;;  %v1570_v46 = vpop.f32.mrf.mxu0  ;;  %v1352_v52 = vand.u32 2147483648, %v1340_v53  ;;  %vm1346_vm2 = vweird.f32 %v1340_v53 }
 0x8da   :  { %v1574_v23 = vrot.slane %v1570_v46, 2  ;;  %v1397_v31 = vadd.f32 %v1394_v63, %v1376_v29 }
 0x8db   :  { %v1353_v25 = vor.u32 1.1754944e-38, %v1352_v52 }
 0x8dc   :  { %v4022_v57 = vpop.eup %4021  ;;  %1575 = vrot.lane.b32.xlu0 %v1574_v23, %s4467_s29  ;;  %v1350_v23 = vand.u32 2147483647, %v1340_v53 }
 0x8dd   :  { %v1279_v24 = vadd.f32 1.0, %v4022_v57 }
 0x8de   :  { %v4024_v37 = vpop.eup %4023  ;;  %vm1351_vm6 = vcmp.eq.f32.partialorder %v1350_v23, 8.507059e+37 }
 0x8df   :  { %v4026_v16 = vpop.eup %4025  ;;  %4027 = vrcp.f32 %v1279_v24  ;;  %v1444_v27 = vadd.f32 1.0, %v4024_v37  ;;  %v1291_v57 = vand.u32 2147483648, %v1279_v24  ;;  %v1289_v8 = vand.u32 2147483647, %v1279_v24 }
 0x8e0   :  { %v1342_v28 = vmul.f32 %v4026_v16, %v1340_v53  ;;  %vm1347_vm1 = vweird.f32 %v4026_v16  ;;  %vm1285_vm5 = vweird.f32 %v1279_v24 }
 0x8e1   :  { %4029 = vrcp.f32 %v1444_v27  ;;  %vm1348_vm3 = vmor %vm1346_vm2, %vm1347_vm1  ;;  %v1292_v63 = vor.u32 1.1754944e-38, %v1291_v57  ;;  %vm1290_vm8 = vcmp.eq.f32.partialorder %v1289_v8, 8.507059e+37  ;;  %vm1450_vm10 = vweird.f32 %v1444_v27 }
 0x8e2   :  { %v1343_v19 = vsub.f32 1.0, %v1342_v28  ;;  %4031 = vtanh.f32 %v1397_v31  ;;  %v3560_v8 = vrot.slane %v4904_v41, 1 }
 0x8e4   :  { %v1344_v18 = vmul.f32 %v4026_v16, %v1343_v19 }
 0x8e5   :  { %v4028_v17 = vpop.eup %4027 }
 0x8e6   :  { %v1281_v20 = vmul.f32 %v4028_v17, %v1279_v24  ;;  %v1345_v32 = vadd.f32 %v4026_v16, %v1344_v18  ;;  %vm1286_vm4 = vweird.f32 %v4028_v17  ;;  %v1454_v24 = vand.u32 2147483647, %v1444_v27 }
 0x8e7   :  { %v4030_v43 = vpop.eup %4029  ;;  %vm1287_vm7 = vmor %vm1285_vm5, %vm1286_vm4 }
 0x8e8   :  { %v1282_v44 = vsub.f32 1.0, %v1281_v20  ;;  %v1446_v46 = vmul.f32 %v4030_v43, %v1444_v27  ;;  %v1349_v13 = vsel %vm1348_vm3, %v4026_v16, %v1345_v32  ;;  %v4032_v20 = vpop.eup %4031  ;;  %vm1451_vm9 = vweird.f32 %v4030_v43 }
 0x8e9   :  { %v1354_v29 = vsel %vm1351_vm6, %v1353_v25, %v1349_v13  ;;  %v1456_v16 = vand.u32 2147483648, %v1444_v27  ;;  %vm1452_vm11 = vmor %vm1450_vm10, %vm1451_vm9  ;;  %vm1455_vm12 = vcmp.eq.f32.partialorder %v1454_v24, 8.507059e+37  ;;  %v5096_v25 = vld [vmem:[#allocation8 + $0x38] sm:$0xff]  ;;  %v1597_v24 = vpop.f32.mrf.mxu1 }
 0x8ea   :  { %v1283_v37 = vmul.f32 %v4028_v17, %v1282_v44  ;;  %v1447_v28 = vsub.f32 1.0, %v1446_v46  ;;  %v1460_v0 = vmul.f32 %v1354_v29, %v4901_v51  ;;  %v3568_v51 = vperm.slane %v4904_v41, 0  ;;  %v5108_v29 = vld [vmem:[#allocation8 + $0x28] sm:$0xff] }
 0x8eb   :  { %v1457_v52 = vor.u32 1.1754944e-38, %v1456_v16 }
 0x8ec   :  { %v1284_v19 = vadd.f32 %v4028_v17, %v1283_v37  ;;  %v1448_v4 = vmul.f32 %v4030_v43, %v1447_v28  ;;  %v5099_v28 = vld [vmem:[#allocation8 + $0x10] sm:$0xff] }
 0x8ee   :  { %v1288_v18 = vsel %vm1287_vm7, %v4028_v17, %v1284_v19  ;;  %v1449_v60 = vadd.f32 %v4030_v43, %v1448_v4  ;;  %v5102_v19 = vld [vmem:[#allocation8 + $0x30] sm:$0xff] }
 0x8ef   :  { %v1293_v53 = vsel %vm1290_vm8, %v1292_v63, %v1288_v18  ;;  %v5105_v63 = vld [vmem:[#allocation8 + $0x8] sm:$0xff]  ;;  %v5111_v18 = vld [vmem:[#allocation8] sm:$0xff] }
 0x8f0   :  { %v1461_v31 = vmul.f32 %v4032_v20, %v1293_v53  ;;  %v1453_v32 = vsel %vm1452_vm11, %v4030_v43, %v1449_v60  ;;  %v3597_v60 = vsel %vm3596_vm14, %v4815_v22, %v3568_v51  ;;  %v3558_v43 = vrot.slane %v4815_v22, 1  ;;  %v5093_v22 = vld [vmem:[#allocation8 + $0x18] sm:$0xff]  ;;  %v5114_v20 = vld [vmem:[#allocation8 + $0x20] sm:$0xff] }
 0x8f1   :  { %v1458_v46 = vsel %vm1455_vm12, %v1457_v52, %v1453_v32  ;;  %v1601_v32 = vrot.slane %v1597_v24, 2  ;;  %v1482_v52 = vpop.f32.mrf.mxu2 }
 0x8f2   :  { %v5070_v44 = vadd.f32 %v1461_v31, %v1460_v0  ;;  %v3569_v0 = vperm.slane %v3560_v8, 0  ;;  %v1486_v8 = vrot.slane %v1482_v52, 2 }
 0x8f4   :  { %4033 = vtanh.f32 %v5070_v44  ;;  %v3598_v37 = vsel %vm3596_vm14, %v3558_v43, %v3569_v0 }
 0x8fa   :  { %v4034_v17 = vpop.eup %4033 }
 0x8fb   :  { %v1464_v23 = vmul.f32 %v4034_v17, %v1458_v46  ;;  %v1488_v17 = vadd.f32 %v1486_v8, %v4597_v26 }
 0x8fd   :  { %3835 = vmatmul.msk.f32.vlgmr.msra.gmra.mxu3 %vm214_vm13, %v1464_v23  ;;  %3838 = vmatmul.msk.f32.vlgmr.msrb.gmra.mxu1 %vm214_vm13, %v1464_v23  ;;  %v3572_v4 = vperm.slane %v1464_v23, 0  ;;  %v3561_v27 = vrot.slane %v1464_v23, 1  ;;  %v3828_v46 = vmul.f32 -1.442695, %v1488_v17 }
 0x8fe   :  { %1937 = vmatpush.msra.mxu3 %v4910_v54  ;;  %2007 = vmatpush.msrb.mxu1 %v4913_v47 }
 0x8ff   :  { %v5081_v57 = vsel %vm3599_vm15, %v3597_v60, %v3572_v4  ;;  %v3573_v41 = vperm.slane %v3561_v27, 0 }
 0x900   :  { %1938 = vmatpush.msra.mxu3 %v4916_v21  ;;  %2008 = vmatpush.msrb.mxu1 %v4919_v50 }
 0x901   :  { %v5085_v13 = vsel %vm3599_vm15, %v3598_v37, %v3573_v41 }
 0x902   :  { %1939 = vmatpush.msra.mxu3 %v4922_v14  ;;  %2009 = vmatpush.msrb.mxu1 %v4925_v56 }
 0x904   :  { %1940 = vmatpush.msra.mxu3 %v4928_v58  ;;  %2010 = vmatpush.msrb.mxu1 %v4931_v36 }
 0x905   :  { %3841 = vmatmul.msk.f32.vlgmr.msrb.gmra.mxu3 %vm214_vm13, %v1464_v23  ;;  %3843 = vmatmul.msk.f32.vlgmr.msra.gmra.mxu1 %vm214_vm13, %v1464_v23 }
 0x906   :  { %2100 = vmatpush.msrb.mxu3 %v5093_v22  ;;  %2161 = vmatpush.msra.mxu1 %v5096_v25 }
 0x908   :  { %2101 = vmatpush.msrb.mxu3 %v5099_v28  ;;  %2162 = vmatpush.msra.mxu1 %v5102_v19 }
 0x90a   :  { %2102 = vmatpush.msrb.mxu3 %v5105_v63  ;;  %2163 = vmatpush.msra.mxu1 %v5108_v29 }
 0x90c   :  { %2103 = vmatpush.msrb.mxu3 %v5111_v18  ;;  %2164 = vmatpush.msra.mxu1 %v5114_v20 }
 0x92d   :  { %v1531_v52 = vpop.permute.xlu2 %1530 }
 0x92e   :  { %v1533_v8 = vadd.f32 %v1531_v52, %v4597_v26 }
 0x930   :  { %v3830_v17 = vmul.f32 -1.442695, %v1533_v8 }
 0x94e   :  { %v1576_v53 = vpop.permute.xlu0 %1575 }
 0x94f   :  { %v1578_v31 = vadd.f32 %v1576_v53, %v4597_v26 }
 0x951   :  { %4035 = vtanh.f32 %v1578_v31 }
 0x952   :  { %4037 = vpow2.f32 %v3828_v46 }
 0x957   :  { %v4036_v16 = vpop.eup %4035 }
 0x958   :  { %1630 = vrot.lane.b32.xlu1 %v4036_v16, %s4467_s29  ;;  %v4038_v51 = vpop.eup %4037 }
 0x959   :  { %v1492_v23 = vadd.f32 1.0, %v4038_v51 }
 0x95b   :  { %4039 = vrcp.f32 %v1492_v23  ;;  %v1504_v41 = vand.u32 2147483648, %v1492_v23  ;;  %vm1498_vm1 = vweird.f32 %v1492_v23  ;;  %v1502_v37 = vand.u32 2147483647, %v1492_v23 }
 0x95c   :  { %4041 = vpow2.f32 %v3830_v17 }
 0x95d   :  { %v1505_v31 = vor.u32 1.1754944e-38, %v1504_v41  ;;  %vm1503_vm3 = vcmp.eq.f32.partialorder %v1502_v37, 8.507059e+37 }
 0x960   :  { %1602 = vrot.lane.b32.xlu1 %v1601_v32, %s4469_s10 }
 0x961   :  { %v4040_v0 = vpop.eup %4039 }
 0x962   :  { %v1494_v4 = vmul.f32 %v4040_v0, %v1492_v23  ;;  %vm1499_vm0 = vweird.f32 %v4040_v0  ;;  %v4042_v46 = vpop.eup %4041 }
 0x963   :  { %vm1500_vm2 = vmor %vm1498_vm1, %vm1499_vm0  ;;  %v1537_v51 = vadd.f32 1.0, %v4042_v46 }
 0x964   :  { %v1495_v27 = vsub.f32 1.0, %v1494_v4 }
 0x965   :  { %4043 = vrcp.f32 %v1537_v51  ;;  %vm1543_vm5 = vweird.f32 %v1537_v51  ;;  %v1547_v41 = vand.u32 2147483647, %v1537_v51 }
 0x966   :  { %v1496_v60 = vmul.f32 %v4040_v0, %v1495_v27 }
 0x967   :  { %vm1548_vm7 = vcmp.eq.f32.partialorder %v1547_v41, 8.507059e+37 }
 0x968   :  { %v1497_v43 = vadd.f32 %v4040_v0, %v1496_v60 }
 0x96a   :  { %v1501_v53 = vsel %vm1500_vm2, %v4040_v0, %v1497_v43  ;;  %v1549_v43 = vand.u32 2147483648, %v1537_v51 }
 0x96b   :  { %v1506_v24 = vsel %vm1503_vm3, %v1505_v31, %v1501_v53  ;;  %v4044_v4 = vpop.eup %4043 }
 0x96c   :  { %v1539_v27 = vmul.f32 %v4044_v4, %v1537_v51  ;;  %vm1544_vm4 = vweird.f32 %v4044_v4  ;;  %v1550_v53 = vor.u32 1.1754944e-38, %v1549_v43 }
 0x96d   :  { %vm1545_vm6 = vmor %vm1543_vm5, %vm1544_vm4 }
 0x96e   :  { %v1540_v23 = vsub.f32 1.0, %v1539_v27 }
 0x970   :  { %v1541_v60 = vmul.f32 %v4044_v4, %v1540_v23 }
 0x972   :  { %v1542_v0 = vadd.f32 %v4044_v4, %v1541_v60 }
 0x974   :  { %v1546_v37 = vsel %vm1545_vm6, %v4044_v4, %v1542_v0 }
 0x975   :  { %v1551_v31 = vsel %vm1548_vm7, %v1550_v53, %v1546_v37 }
 0x9ca   :  { %v1631_v16 = vpop.permute.xlu1 %1630 }
 0x9cb   :  { %v1633_v32 = vmul.f32 %v1631_v16, %v1506_v24  ;;  %v1626_v16 = vrot.slane %v4953_v2, 6 }
 0x9cd   :  { %1635 = vrot.lane.b32.xlu0 %v1633_v32, %s4468_s30  ;;  %v1628_v24 = vmul.f32 %v1626_v16, %v1551_v31 }
 0x9d2   :  { %v1603_v17 = vpop.permute.xlu1 %1602 }
 0x9d3   :  { %v1605_v46 = vadd.f32 %v1603_v17, %v4597_v26  ;;  %v5745_v17 = vld [vmem:[#allocation25_spill] sm:$0xff] }
 0x9d5   :  { %v3833_v51 = vmul.f32 -1.442695, %v1605_v46  ;;  %v5746_v46 = vld [vmem:[#allocation26_spill] sm:$0xff] }
 0xa3f   :  { %v1636_v32 = vpop.permute.xlu0 %1635 }
 0xa40   :  { %v5124_v52 = vadd.f32 %v1636_v32, %v1628_v24 }
 0xa42   :  { %4045 = vtanh.f32 %v5124_v52 }
 0xa43   :  { %4047 = vpow2.f32 %v3833_v51  ;;  %v5747_v51 = vld [vmem:[#allocation27_spill] sm:$0xff] }
 0xa48   :  { %v4046_v8 = vpop.eup %4045 }
 0xa49   :  { %1641 = vrot.lane.b32.xlu2 %v4046_v8, %s4467_s29  ;;  %v4048_v4 = vpop.eup %4047 }
 0xa4a   :  { %v1609_v27 = vadd.f32 1.0, %v4048_v4  ;;  %v5748_v4 = vld [vmem:[#allocation28_spill] sm:$0xff] }
 0xa4c   :  { %4049 = vrcp.f32 %v1609_v27  ;;  %v1621_v41 = vand.u32 2147483648, %v1609_v27  ;;  %vm1615_vm9 = vweird.f32 %v1609_v27  ;;  %v1619_v37 = vand.u32 2147483647, %v1609_v27 }
 0xa4e   :  { %v1622_v31 = vor.u32 1.1754944e-38, %v1621_v41  ;;  %vm1620_vm11 = vcmp.eq.f32.partialorder %v1619_v37, 8.507059e+37  ;;  %v5173_v37 = vld [vmem:[%s5638_s6 + $0x1] ss:$0 sm:$0xff] }
 0xa4f   :  { %5752 = vst [vmem:[#allocation33_spill] sm:$0xff] %v5173_v37 }
 0xa52   :  { %v4050_v23 = vpop.eup %4049 }
 0xa53   :  { %v1611_v60 = vmul.f32 %v4050_v23, %v1609_v27  ;;  %vm1616_vm8 = vweird.f32 %v4050_v23  ;;  %v5749_v27 = vld [vmem:[#allocation29_spill] sm:$0xff] }
 0xa54   :  { %vm1617_vm10 = vmor %vm1615_vm9, %vm1616_vm8  ;;  %vm3602_vm9 = vcmask 1042432  }
 0xa55   :  { %v1612_v2 = vsub.f32 1.0, %v1611_v60  ;;  %v5751_v60 = vld [vmem:[#allocation32_spill] sm:$0xff] }
 0xa57   :  { %v1613_v0 = vmul.f32 %v4050_v23, %v1612_v2  ;;  %v1692_v2 = vpop.f32.mrf.mxu3 }
 0xa59   :  { %v1614_v43 = vadd.f32 %v4050_v23, %v1613_v0 }
 0xa5b   :  { %v1618_v53 = vsel %vm1617_vm10, %v4050_v23, %v1614_v43  ;;  %v5750_v23 = vld [vmem:[#allocation31_spill] sm:$0xff]  ;;  %v1753_v43 = vpop.f32.mrf.mxu1 }
 0xa5c   :  { %v1623_v16 = vsel %vm1620_vm11, %v1622_v31, %v1618_v53 }
 0xa5f   :  { %v1814_v0 = vpop.f32.mrf.mxu3 }
 0xaa3   :  { %v1642_v26 = vpop.permute.xlu2 %1641 }
 0xaa4   :  { %v1644_v24 = vmul.f32 %v1642_v26, %v1623_v16 }
 0xaa6   :  { %v1646_v32 = vrot.slane %v1644_v24, 6  ;;  %v5179_v24 = vld [vmem:[%s5638_s6] ss:$0 sm:$0xff] }
 0xaa7   :  { %5753 = vst [vmem:[#allocation34_spill] sm:$0xff] %v5179_v24 }
 0xaa8   :  { %1647 = vrot.lane.b32.xlu0 %v1646_v32, %s4468_s30 }
 0xb1a   :  { %v1648_v8 = vpop.permute.xlu0 %1647 }
 0xb1b   :  { %3834 = vmatmul.msk.f32.vlgmr.msra.gmra.mxu2 %vm214_vm13, %v1648_v8  ;;  %3837 = vmatmul.msk.f32.vlgmr.msra.gmra.mxu0 %vm214_vm13, %v1648_v8 }
 0xb1c   :  { %3847 = vmatmul.msk.f32.vlgmr.msra.gmra.mxu3 %vm214_vm13, %v1648_v8  ;;  %3850 = vmatmul.msk.f32.vlgmr.msrb.gmra.mxu1 %vm214_vm13, %v1648_v8 }
 0xb1d   :  { %1981 = vmatpush.msra.mxu0 %v4963_v11  ;;  %1897 = vmatpush.msra.mxu2 %v4966_v12 }
 0xb1e   :  { %2222 = vmatpush.msra.mxu3 %v4969_v55  ;;  %2265 = vmatpush.msrb.mxu1 %v4972_v59 }
 0xb1f   :  { %1982 = vmatpush.msra.mxu0 %v4975_v62  ;;  %1898 = vmatpush.msra.mxu2 %v4978_v61 }
 0xb20   :  { %2223 = vmatpush.msra.mxu3 %v4981_v1  ;;  %2266 = vmatpush.msrb.mxu1 %v4984_v3 }
 0xb21   :  { %1983 = vmatpush.msra.mxu0 %v4987_v5  ;;  %1899 = vmatpush.msra.mxu2 %v4990_v6 }
 0xb22   :  { %2224 = vmatpush.msra.mxu3 %v4993_v7  ;;  %2267 = vmatpush.msrb.mxu1 %v4996_v9 }
 0xb23   :  { %3840 = vmatmul.msk.f32.vlgmr.msrb.gmra.mxu2 %vm214_vm13, %v1648_v8  ;;  %3842 = vmatmul.msk.f32.vlgmr.msrb.gmra.mxu0 %vm214_vm13, %v1648_v8 }
 0xb24   :  { %1984 = vmatpush.msra.mxu0 %v5001_v10  ;;  %1900 = vmatpush.msra.mxu2 %v5004_v15 }
 0xb25   :  { %2225 = vmatpush.msra.mxu3 %v5007_v30  ;;  %2268 = vmatpush.msrb.mxu1 %v5010_v33 }
 0xb26   :  { %2140 = vmatpush.msrb.mxu0 %v5013_v34  ;;  %2076 = vmatpush.msrb.mxu2 %v5016_v35 }
 0xb28   :  { %2141 = vmatpush.msrb.mxu0 %v5019_v38  ;;  %2077 = vmatpush.msrb.mxu2 %v5022_v39 }
 0xb2a   :  { %2142 = vmatpush.msrb.mxu0 %v5025_v40  ;;  %2078 = vmatpush.msrb.mxu2 %v5028_v42 }
 0xb2b   :  { %3845 = vmatmul.msk.f32.vlgmr.msra.gmra.mxu2 %vm214_vm13, %v1648_v8  ;;  %3849 = vmatmul.msk.f32.vlgmr.msra.gmra.mxu0 %vm214_vm13, %v1648_v8 }
 0xb2c   :  { %2143 = vmatpush.msrb.mxu0 %v5033_v45  ;;  %2079 = vmatpush.msrb.mxu2 %v5036_v48 }
 0xb2e   :  { %2244 = vmatpush.msra.mxu0 %v5039_v49  ;;  %2201 = vmatpush.msra.mxu2 %v5745_v17 }
 0xb30   :  { %2245 = vmatpush.msra.mxu0 %v5746_v46  ;;  %2202 = vmatpush.msra.mxu2 %v5747_v51 }
 0xb32   :  { %2246 = vmatpush.msra.mxu0 %v5748_v4  ;;  %2203 = vmatpush.msra.mxu2 %v5749_v27 }
 0xb34   :  { %2247 = vmatpush.msra.mxu0 %v5750_v23  ;;  %2204 = vmatpush.msra.mxu2 %v5751_v60 }
 0xb98   :  { %v1732_v41 = vpop.f32.mrf.mxu0 }
 0xb99   :  { %v1735_v53 = vadd.f32 %v5173_v37, %v1732_v41  ;;  %v5186_v41 = vld [vmem:[%s5638_s6 + $0x3] ss:$0 sm:$0xff] }
 0xb9a   :  { %5754 = vst [vmem:[#allocation35_spill] sm:$0xff] %v5186_v41 }
 0xb9b   :  { %v1756_v31 = vadd.f32 %v1753_v43, %v1735_v53  ;;  %v1857_v53 = vpop.f32.mrf.mxu1 }
 0xb9d   :  { %v3839_v16 = vmul.f32 -1.442695, %v1756_v31 }
 0xb9e   :  { %v1668_v26 = vpop.f32.mrf.mxu2 }
 0xb9f   :  { %4051 = vpow2.f32 %v3839_v16  ;;  %v1671_v32 = vadd.f32 %v5179_v24, %v1668_v26  ;;  %v1942_v8 = vpop.f32.mrf.mxu3 }
 0xba0   :  { %1946 = vrot.lane.b32.xlu0 %v1942_v8, %s4468_s30  ;;  %v1836_v60 = vpop.f32.mrf.mxu0 }
 0xba1   :  { %v1695_v23 = vadd.f32 %v1692_v2, %v1671_v32  ;;  %v1839_v43 = vadd.f32 %v5186_v41, %v1836_v60 }
 0xba3   :  { %v3836_v31 = vmul.f32 -1.442695, %v1695_v23  ;;  %v1860_v16 = vadd.f32 %v1857_v53, %v1839_v43  ;;  %v5193_v23 = vld [vmem:[%s5638_s6 + $0x2] ss:$0 sm:$0xff] }
 0xba4   :  { %5755 = vst [vmem:[#allocation36_spill] sm:$0xff] %v5193_v23 }
 0xba5   :  { %v4052_v37 = vpop.eup %4051  ;;  %4053 = vpow2.f32 %v3836_v31  ;;  %v3844_v27 = vmul.f32 -1.442695, %v1860_v16 }
 0xba6   :  { %v1760_v4 = vadd.f32 1.0, %v4052_v37  ;;  %v1793_v24 = vpop.f32.mrf.mxu2 }
 0xba7   :  { %4055 = vpow2.f32 %v3844_v27  ;;  %v1796_v27 = vadd.f32 %v5193_v23, %v1793_v24 }
 0xba8   :  { %4057 = vrcp.f32 %v1760_v4  ;;  %v1986_v26 = vpop.f32.mrf.mxu0  ;;  %v1772_v41 = vand.u32 2147483648, %v1760_v4  ;;  %vm1766_vm14 = vweird.f32 %v1760_v4  ;;  %v1770_v49 = vand.u32 2147483647, %v1760_v4 }
 0xba9   :  { %1990 = vrot.lane.b32.xlu1 %v1986_v26, %s4467_s29  ;;  %v1817_v31 = vadd.f32 %v1814_v0, %v1796_v27 }
 0xbaa   :  { %vm1771_vm2 = vcmp.eq.f32.partialorder %v1770_v49, 8.507059e+37 }
 0xbab   :  { %v4054_v2 = vpop.eup %4053 }
 0xbac   :  { %v1699_v32 = vadd.f32 1.0, %v4054_v2 }
 0xbad   :  { %v4056_v8 = vpop.eup %4055 }
 0xbae   :  { %v4058_v51 = vpop.eup %4057  ;;  %4059 = vrcp.f32 %v1699_v32  ;;  %v1864_v46 = vadd.f32 1.0, %v4056_v8  ;;  %v1711_v48 = vand.u32 2147483648, %v1699_v32  ;;  %v1709_v42 = vand.u32 2147483647, %v1699_v32 }
 0xbaf   :  { %v1762_v60 = vmul.f32 %v4058_v51, %v1760_v4  ;;  %vm1767_vm12 = vweird.f32 %v4058_v51  ;;  %vm1705_vm1 = vweird.f32 %v1699_v32 }
 0xbb0   :  { %4061 = vrcp.f32 %v1864_v46  ;;  %vm1768_vm15 = vmor %vm1766_vm14, %vm1767_vm12  ;;  %v1712_v0 = vor.u32 1.1754944e-38, %v1711_v48  ;;  %vm1710_vm4 = vcmp.eq.f32.partialorder %v1709_v42, 8.507059e+37  ;;  %vm1870_vm6 = vweird.f32 %v1864_v46 }
 0xbb1   :  { %v1763_v37 = vsub.f32 1.0, %v1762_v60  ;;  %4063 = vtanh.f32 %v1817_v31  ;;  %v1773_v60 = vor.u32 1.1754944e-38, %v1772_v41 }
 0xbb3   :  { %v1764_v43 = vmul.f32 %v4058_v51, %v1763_v37 }
 0xbb4   :  { %v4060_v53 = vpop.eup %4059 }
 0xbb5   :  { %v1701_v16 = vmul.f32 %v4060_v53, %v1699_v32  ;;  %v1765_v26 = vadd.f32 %v4058_v51, %v1764_v43  ;;  %vm1706_vm0 = vweird.f32 %v4060_v53 }
 0xbb6   :  { %v4062_v2 = vpop.eup %4061  ;;  %vm1707_vm3 = vmor %vm1705_vm1, %vm1706_vm0 }
 0xbb7   :  { %v1702_v8 = vsub.f32 1.0, %v1701_v16  ;;  %v1866_v17 = vmul.f32 %v4062_v2, %v1864_v46  ;;  %v1769_v24 = vsel %vm1768_vm15, %v4058_v51, %v1765_v26  ;;  %v4064_v16 = vpop.eup %4063  ;;  %vm1871_vm5 = vweird.f32 %v4062_v2 }
 0xbb8   :  { %v1774_v27 = vsel %vm1771_vm2, %v1773_v60, %v1769_v24  ;;  %v1876_v51 = vand.u32 2147483648, %v1864_v46  ;;  %vm1872_vm7 = vmor %vm1870_vm6, %vm1871_vm5 }
 0xbb9   :  { %v1703_v45 = vmul.f32 %v4060_v53, %v1702_v8  ;;  %v1867_v37 = vsub.f32 1.0, %v1866_v17  ;;  %v1880_v39 = vmul.f32 %v1774_v27, %v5070_v44 }
 0xbba   :  { %v1877_v49 = vor.u32 1.1754944e-38, %v1876_v51 }
 0xbbb   :  { %v1704_v23 = vadd.f32 %v4060_v53, %v1703_v45  ;;  %v1868_v40 = vmul.f32 %v4062_v2, %v1867_v37  ;;  %v1874_v45 = vand.u32 2147483647, %v1864_v46 }
 0xbbd   :  { %v1708_v43 = vsel %vm1707_vm3, %v4060_v53, %v1704_v23  ;;  %v1869_v38 = vadd.f32 %v4062_v2, %v1868_v40  ;;  %vm1875_vm8 = vcmp.eq.f32.partialorder %v1874_v45, 8.507059e+37 }
 0xbbe   :  { %v1713_v4 = vsel %vm1710_vm4, %v1712_v0, %v1708_v43 }
 0xbbf   :  { %v1881_v31 = vmul.f32 %v4064_v16, %v1713_v4  ;;  %v1873_v48 = vsel %vm1872_vm7, %v4062_v2, %v1869_v38 }
 0xbc0   :  { %v1878_v17 = vsel %vm1875_vm8, %v1877_v49, %v1873_v48 }
 0xbc1   :  { %v5197_v8 = vadd.f32 %v1881_v31, %v1880_v39 }
 0xbc3   :  { %4065 = vtanh.f32 %v5197_v8 }
 0xbc9   :  { %v4066_v42 = vpop.eup %4065 }
 0xbca   :  { %v1884_v41 = vmul.f32 %v4066_v42, %v1878_v17 }
 0xbcc   :  { %3853 = vmatmul.msk.f32.vlgmr.msrb.gmra.mxu3 %vm214_vm13, %v1884_v41  ;;  %3856 = vmatmul.msk.f32.vlgmr.msra.gmra.mxu1 %vm214_vm13, %v1884_v41  ;;  %v3576_v39 = vperm.slane %v1884_v41, 0  ;;  %v3562_v40 = vrot.slane %v1884_v41, 1 }
 0xbcd   :  { %2353 = vmatpush.msrb.mxu3 %v4910_v54  ;;  %2425 = vmatpush.msra.mxu1 %v4913_v47  ;;  %v4253_v54 = vld [vmem:[%s5634_s2] ss:$0 sm:$0xff]  ;;  %v5756_v47 = vld [vmem:[#allocation30_spill] sm:$0xff] }
 0xbce   :  { %v5205_v44 = vsel %vm3602_vm9, %v5081_v57, %v3576_v39  ;;  %v3577_v38 = vperm.slane %v3562_v40, 0 }
 0xbcf   :  { %2354 = vmatpush.msrb.mxu3 %v4916_v21  ;;  %2426 = vmatpush.msra.mxu1 %v4919_v50  ;;  %v5230_v21 = vadd.f32 %v4253_v54, %v5756_v47 }
 0xbd0   :  { %v5210_v46 = vsel %vm3602_vm9, %v5085_v13, %v3577_v38 }
 0xbd1   :  { %2355 = vmatpush.msrb.mxu3 %v4922_v14  ;;  %2427 = vmatpush.msra.mxu1 %v4925_v56 }
 0xbd3   :  { %2356 = vmatpush.msrb.mxu3 %v4928_v58  ;;  %2428 = vmatpush.msra.mxu1 %v4931_v36  ;;  %v2012_v58 = vpop.f32.mrf.mxu1  ;;  %v1902_v36 = vpop.f32.mrf.mxu2 }
 0xbd4   :  { %3859 = vmatmul.msk.f32.vlgmr.msra.gmra.mxu3 %vm214_vm13, %v1884_v41  ;;  %3861 = vmatmul.msk.f32.vlgmr.msrb.gmra.mxu1 %vm214_vm13, %v1884_v41  ;;  %v1905_v57 = vadd.f32 %v1902_v36, %v5230_v21 }
 0xbd5   :  { %2520 = vmatpush.msra.mxu3 %v5093_v22  ;;  %2581 = vmatpush.msrb.mxu1 %v5096_v25 }
 0xbd6   :  { %v3846_v13 = vmul.f32 -1.442695, %v1905_v57 }
 0xbd7   :  { %2521 = vmatpush.msra.mxu3 %v5099_v28  ;;  %2582 = vmatpush.msrb.mxu1 %v5102_v19 }
 0xbd9   :  { %2522 = vmatpush.msra.mxu3 %v5105_v63  ;;  %2583 = vmatpush.msrb.mxu1 %v5108_v29 }
 0xbdb   :  { %2523 = vmatpush.msra.mxu3 %v5111_v18  ;;  %2584 = vmatpush.msrb.mxu1 %v5114_v20 }
 0xc12   :  { %v1947_v51 = vpop.permute.xlu0 %1946 }
 0xc13   :  { %v1949_v45 = vadd.f32 %v1947_v51, %v5230_v21 }
 0xc15   :  { %v3848_v48 = vmul.f32 -1.442695, %v1949_v45 }
 0xc1b   :  { %v1991_v50 = vpop.permute.xlu1 %1990 }
 0xc1c   :  { %v1993_v14 = vadd.f32 %v1991_v50, %v5230_v21 }
 0xc1e   :  { %4067 = vtanh.f32 %v1993_v14 }
 0xc1f   :  { %4069 = vpow2.f32 %v3846_v13 }
 0xc24   :  { %v4068_v56 = vpop.eup %4067 }
 0xc25   :  { %2044 = vrot.lane.b32.xlu2 %v4068_v56, %s4467_s29  ;;  %v4070_v32 = vpop.eup %4069 }
 0xc26   :  { %v1909_v23 = vadd.f32 1.0, %v4070_v32 }
 0xc28   :  { %4071 = vrcp.f32 %v1909_v23  ;;  %v1921_v37 = vand.u32 2147483648, %v1909_v23  ;;  %vm1915_vm11 = vweird.f32 %v1909_v23  ;;  %v1919_v0 = vand.u32 2147483647, %v1909_v23 }
 0xc29   :  { %4073 = vpow2.f32 %v3848_v48 }
 0xc2a   :  { %v1922_v43 = vor.u32 1.1754944e-38, %v1921_v37  ;;  %vm1920_vm14 = vcmp.eq.f32.partialorder %v1919_v0, 8.507059e+37 }
 0xc2d   :  { %2016 = vrot.lane.b32.xlu2 %v2012_v58, %s4469_s10  ;;  %v2040_v58 = vrot.slane %v5124_v52, 6 }
 0xc2e   :  { %v4072_v53 = vpop.eup %4071 }
 0xc2f   :  { %v1911_v26 = vmul.f32 %v4072_v53, %v1909_v23  ;;  %vm1916_vm10 = vweird.f32 %v4072_v53  ;;  %v4074_v49 = vpop.eup %4073 }
 0xc30   :  { %vm1917_vm12 = vmor %vm1915_vm11, %vm1916_vm10  ;;  %v1953_v42 = vadd.f32 1.0, %v4074_v49 }
 0xc31   :  { %v1912_v2 = vsub.f32 1.0, %v1911_v26 }
 0xc32   :  { %4075 = vrcp.f32 %v1953_v42  ;;  %v1965_v54 = vand.u32 2147483648, %v1953_v42  ;;  %vm1959_vm0 = vweird.f32 %v1953_v42  ;;  %v1963_v47 = vand.u32 2147483647, %v1953_v42 }
 0xc33   :  { %v1913_v24 = vmul.f32 %v4072_v53, %v1912_v2 }
 0xc34   :  { %v1966_v14 = vor.u32 1.1754944e-38, %v1965_v54  ;;  %vm1964_vm2 = vcmp.eq.f32.partialorder %v1963_v47, 8.507059e+37 }
 0xc35   :  { %v1914_v60 = vadd.f32 %v4072_v53, %v1913_v24 }
 0xc37   :  { %v1918_v27 = vsel %vm1917_vm12, %v4072_v53, %v1914_v60 }
 0xc38   :  { %v1923_v4 = vsel %vm1920_vm14, %v1922_v43, %v1918_v27  ;;  %v4076_v17 = vpop.eup %4075 }
 0xc39   :  { %v1955_v41 = vmul.f32 %v4076_v17, %v1953_v42  ;;  %vm1960_vm15 = vweird.f32 %v4076_v17  ;;  %v5771_v42 = vld [vmem:[#allocation33_spill] sm:$0xff] }
 0xc3a   :  { %vm1961_vm1 = vmor %vm1959_vm0, %vm1960_vm15 }
 0xc3b   :  { %v1956_v39 = vsub.f32 1.0, %v1955_v41 }
 0xc3d   :  { %v1957_v40 = vmul.f32 %v4076_v17, %v1956_v39 }
 0xc3f   :  { %v1958_v38 = vadd.f32 %v4076_v17, %v1957_v40 }
 0xc41   :  { %v1962_v50 = vsel %vm1961_vm1, %v4076_v17, %v1958_v38  ;;  %v5772_v38 = vld [vmem:[#allocation34_spill] sm:$0xff] }
 0xc42   :  { %v1967_v56 = vsel %vm1964_vm2, %v1966_v14, %v1962_v50 }
 0xc43   :  { %v2042_v36 = vmul.f32 %v2040_v58, %v1967_v56  ;;  %v5773_v58 = vld [vmem:[#allocation35_spill] sm:$0xff] }
 0xc7f   :  { %v2045_v16 = vpop.permute.xlu2 %2044 }
 0xc80   :  { %v2047_v31 = vmul.f32 %v2045_v16, %v1923_v4 }
 0xc82   :  { %2049 = vrot.lane.b32.xlu1 %v2047_v31, %s4468_s30 }
 0xc87   :  { %v2017_v23 = vpop.permute.xlu2 %2016 }
 0xc88   :  { %v2019_v53 = vadd.f32 %v2017_v23, %v5230_v21 }
 0xc8a   :  { %v3851_v26 = vmul.f32 -1.442695, %v2019_v53 }
 0xcf4   :  { %v2050_v57 = vpop.permute.xlu1 %2049 }
 0xcf5   :  { %v5239_v13 = vadd.f32 %v2050_v57, %v2042_v36 }
 0xcf7   :  { %4077 = vtanh.f32 %v5239_v13 }
 0xcf8   :  { %4079 = vpow2.f32 %v3851_v26 }
 0xcfd   :  { %v4078_v32 = vpop.eup %4077 }
 0xcfe   :  { %2055 = vrot.lane.b32.xlu0 %v4078_v32, %s4467_s29  ;;  %v4080_v2 = vpop.eup %4079 }
 0xcff   :  { %v2023_v24 = vadd.f32 1.0, %v4080_v2 }
 0xd01   :  { %4081 = vrcp.f32 %v2023_v24  ;;  %v2035_v43 = vand.u32 2147483648, %v2023_v24  ;;  %vm2029_vm4 = vweird.f32 %v2023_v24  ;;  %v2033_v16 = vand.u32 2147483647, %v2023_v24 }
 0xd03   :  { %v2036_v31 = vor.u32 1.1754944e-38, %v2035_v43  ;;  %vm2034_vm6 = vcmp.eq.f32.partialorder %v2033_v16, 8.507059e+37 }
 0xd07   :  { %v4082_v60 = vpop.eup %4081 }
 0xd08   :  { %v2025_v37 = vmul.f32 %v4082_v60, %v2023_v24  ;;  %vm2030_vm3 = vweird.f32 %v4082_v60 }
 0xd09   :  { %vm2031_vm5 = vmor %vm2029_vm4, %vm2030_vm3  ;;  %vm3605_vm4 = vcmask 1043456  }
 0xd0a   :  { %v2026_v52 = vsub.f32 1.0, %v2025_v37 }
 0xd0c   :  { %v2027_v0 = vmul.f32 %v4082_v60, %v2026_v52 }
 0xd0e   :  { %v2028_v27 = vadd.f32 %v4082_v60, %v2027_v0 }
 0xd10   :  { %v2032_v4 = vsel %vm2031_vm5, %v4082_v60, %v2028_v27 }
 0xd11   :  { %v2037_v51 = vsel %vm2034_vm6, %v2036_v31, %v2032_v4  ;;  %v5774_v31 = vld [vmem:[#allocation36_spill] sm:$0xff] }
 0xd70   :  { %v2056_v45 = vpop.permute.xlu0 %2055 }
 0xd71   :  { %v2058_v48 = vmul.f32 %v2056_v45, %v2037_v51 }
 0xd73   :  { %2060 = vrot.lane.b32.xlu1 %v2058_v48, %s4468_s30 }
 0xde5   :  { %v2061_v49 = vpop.permute.xlu1 %2060 }
 0xde6   :  { %3852 = vmatmul.msk.f32.vlgmr.msrb.gmra.mxu2 %vm214_vm13, %v2061_v49  ;;  %3855 = vmatmul.msk.f32.vlgmr.msrb.gmra.mxu0 %vm214_vm13, %v2061_v49 }
 0xde7   :  { %3865 = vmatmul.msk.f32.vlgmr.msrb.gmra.mxu3 %vm214_vm13, %v2061_v49  ;;  %3868 = vmatmul.msk.f32.vlgmr.msra.gmra.mxu1 %vm214_vm13, %v2061_v49 }
 0xde8   :  { %2398 = vmatpush.msrb.mxu0 %v4963_v11  ;;  %2310 = vmatpush.msrb.mxu2 %v4966_v12  ;;  %v5757_v11 = vld [vmem:[#allocation18_spill] sm:$0xff]  ;;  %v5758_v12 = vld [vmem:[#allocation20_spill] sm:$0xff] }
 0xde9   :  { %2642 = vmatpush.msrb.mxu3 %v4969_v55  ;;  %2685 = vmatpush.msra.mxu1 %v4972_v59  ;;  %v5759_v55 = vld [vmem:[#allocation19_spill] sm:$0xff]  ;;  %v5760_v59 = vld [vmem:[#allocation21_spill] sm:$0xff] }
 0xdea   :  { %2399 = vmatpush.msrb.mxu0 %v4975_v62  ;;  %2311 = vmatpush.msrb.mxu2 %v4978_v61  ;;  %v5761_v62 = vld [vmem:[#allocation22_spill] sm:$0xff]  ;;  %v5762_v61 = vld [vmem:[#allocation23_spill] sm:$0xff] }
 0xdeb   :  { %2643 = vmatpush.msrb.mxu3 %v4981_v1  ;;  %2686 = vmatpush.msra.mxu1 %v4984_v3  ;;  %v5763_v1 = vld [vmem:[#allocation24_spill] sm:$0xff]  ;;  %v5764_v3 = vld [vmem:[#allocation25_spill] sm:$0xff] }
 0xdec   :  { %2400 = vmatpush.msrb.mxu0 %v4987_v5  ;;  %2312 = vmatpush.msrb.mxu2 %v4990_v6  ;;  %v5765_v5 = vld [vmem:[#allocation26_spill] sm:$0xff]  ;;  %v5766_v6 = vld [vmem:[#allocation27_spill] sm:$0xff] }
 0xded   :  { %2644 = vmatpush.msrb.mxu3 %v4993_v7  ;;  %2687 = vmatpush.msra.mxu1 %v4996_v9  ;;  %v5767_v7 = vld [vmem:[#allocation28_spill] sm:$0xff]  ;;  %v5768_v9 = vld [vmem:[#allocation29_spill] sm:$0xff] }
 0xdee   :  { %3858 = vmatmul.msk.f32.vlgmr.msra.gmra.mxu2 %vm214_vm13, %v2061_v49  ;;  %3860 = vmatmul.msk.f32.vlgmr.msra.gmra.mxu0 %vm214_vm13, %v2061_v49 }
 0xdef   :  { %2401 = vmatpush.msrb.mxu0 %v5001_v10  ;;  %2313 = vmatpush.msrb.mxu2 %v5004_v15  ;;  %v5769_v10 = vld [vmem:[#allocation31_spill] sm:$0xff]  ;;  %v5770_v15 = vld [vmem:[#allocation32_spill] sm:$0xff] }
 0xdf0   :  { %2645 = vmatpush.msrb.mxu3 %v5007_v30  ;;  %2688 = vmatpush.msra.mxu1 %v5010_v33  ;;  %v2105_v30 = vpop.f32.mrf.mxu3 }
 0xdf1   :  { %2560 = vmatpush.msra.mxu0 %v5013_v34  ;;  %2496 = vmatpush.msra.mxu2 %v5016_v35  ;;  %v2166_v34 = vpop.f32.mrf.mxu1 }
 0xdf3   :  { %2561 = vmatpush.msra.mxu0 %v5757_v11  ;;  %2497 = vmatpush.msra.mxu2 %v5758_v12 }
 0xdf5   :  { %2562 = vmatpush.msra.mxu0 %v5759_v55  ;;  %2498 = vmatpush.msra.mxu2 %v5760_v59 }
 0xdf6   :  { %3863 = vmatmul.msk.f32.vlgmr.msrb.gmra.mxu2 %vm214_vm13, %v2061_v49  ;;  %3867 = vmatmul.msk.f32.vlgmr.msrb.gmra.mxu0 %vm214_vm13, %v2061_v49 }
 0xdf7   :  { %2563 = vmatpush.msra.mxu0 %v5761_v62  ;;  %2499 = vmatpush.msra.mxu2 %v5762_v61 }
 0xdf8   :  { %v2227_v33 = vpop.f32.mrf.mxu3 }
 0xdf9   :  { %2664 = vmatpush.msrb.mxu0 %v5763_v1  ;;  %2621 = vmatpush.msrb.mxu2 %v5764_v3  ;;  %v2270_v57 = vpop.f32.mrf.mxu1 }
 0xdfb   :  { %2665 = vmatpush.msrb.mxu0 %v5765_v5  ;;  %2622 = vmatpush.msrb.mxu2 %v5766_v6 }
 0xdfd   :  { %2666 = vmatpush.msrb.mxu0 %v5767_v7  ;;  %2623 = vmatpush.msrb.mxu2 %v5768_v9 }
 0xdff   :  { %2667 = vmatpush.msrb.mxu0 %v5769_v10  ;;  %2624 = vmatpush.msrb.mxu2 %v5770_v15 }
 0xe63   :  { %v2145_v35 = vpop.f32.mrf.mxu0 }
 0xe64   :  { %v2148_v17 = vadd.f32 %v5771_v42, %v2145_v35 }
 0xe66   :  { %v2169_v41 = vadd.f32 %v2166_v34, %v2148_v17 }
 0xe68   :  { %v3857_v39 = vmul.f32 -1.442695, %v2169_v41 }
 0xe69   :  { %v2081_v40 = vpop.f32.mrf.mxu2 }
 0xe6a   :  { %4083 = vpow2.f32 %v3857_v39  ;;  %v2084_v54 = vadd.f32 %v5772_v38, %v2081_v40  ;;  %v2358_v47 = vpop.f32.mrf.mxu3 }
 0xe6b   :  { %v2362_v50 = vrot.slane %v2358_v47, 6  ;;  %v2249_v14 = vpop.f32.mrf.mxu0 }
 0xe6c   :  { %v2108_v56 = vadd.f32 %v2105_v30, %v2084_v54  ;;  %v2252_v36 = vadd.f32 %v5773_v58, %v2249_v14 }
 0xe6d   :  { %2363 = vrot.lane.b32.xlu1 %v2362_v50, %s4468_s30 }
 0xe6e   :  { %v3854_v32 = vmul.f32 -1.442695, %v2108_v56  ;;  %v2273_v23 = vadd.f32 %v2270_v57, %v2252_v36 }
 0xe70   :  { %v4084_v53 = vpop.eup %4083  ;;  %4085 = vpow2.f32 %v3854_v32  ;;  %v3862_v26 = vmul.f32 -1.442695, %v2273_v23 }
 0xe71   :  { %v2173_v2 = vadd.f32 1.0, %v4084_v53  ;;  %v2206_v27 = vpop.f32.mrf.mxu2 }
 0xe72   :  { %4087 = vpow2.f32 %v3862_v26  ;;  %v2209_v51 = vadd.f32 %v5774_v31, %v2206_v27 }
 0xe73   :  { %4089 = vrcp.f32 %v2173_v2  ;;  %v2403_v24 = vpop.f32.mrf.mxu0  ;;  %v2185_v62 = vand.u32 2147483648, %v2173_v2  ;;  %vm2179_vm8 = vweird.f32 %v2173_v2  ;;  %v2183_v3 = vand.u32 2147483647, %v2173_v2 }
 0xe74   :  { %v2407_v60 = vrot.slane %v2403_v24, 6  ;;  %v2230_v11 = vadd.f32 %v2227_v33, %v2209_v51  ;;  %v5300_v24 = vld [vmem:[#allocation5 + $0x78] sm:$0xff] }
 0xe75   :  { %v2186_v10 = vor.u32 1.1754944e-38, %v2185_v62  ;;  %vm2184_vm12 = vcmp.eq.f32.partialorder %v2183_v3, 8.507059e+37 }
 0xe76   :  { %v4086_v37 = vpop.eup %4085  ;;  %2408 = vrot.lane.b32.xlu2 %v2407_v60, %s4467_s29 }
 0xe77   :  { %v2112_v52 = vadd.f32 1.0, %v4086_v37 }
 0xe78   :  { %v4088_v0 = vpop.eup %4087 }
 0xe79   :  { %v4090_v43 = vpop.eup %4089  ;;  %4091 = vrcp.f32 %v2112_v52  ;;  %v2277_v16 = vadd.f32 1.0, %v4088_v0  ;;  %v2124_v5 = vand.u32 2147483648, %v2112_v52  ;;  %v2122_v7 = vand.u32 2147483647, %v2112_v52  ;;  %v5309_v0 = vld [vmem:[#allocation5 + $0x70] sm:$0xff] }
 0xe7a   :  { %v2175_v4 = vmul.f32 %v4090_v43, %v2173_v2  ;;  %vm2180_vm7 = vweird.f32 %v4090_v43  ;;  %vm2118_vm11 = vweird.f32 %v2112_v52  ;;  %v5297_v2 = vld [vmem:[#allocation5 + $0x38] sm:$0xff] }
 0xe7b   :  { %4093 = vrcp.f32 %v2277_v16  ;;  %vm2181_vm9 = vmor %vm2179_vm8, %vm2180_vm7  ;;  %v2125_v33 = vor.u32 1.1754944e-38, %v2124_v5  ;;  %vm2123_vm15 = vcmp.eq.f32.partialorder %v2122_v7, 8.507059e+37  ;;  %v2289_v14 = vand.u32 2147483648, %v2277_v16 }
 0xe7c   :  { %v2176_v45 = vsub.f32 1.0, %v2175_v4  ;;  %4095 = vtanh.f32 %v2230_v11  ;;  %vm2283_vm1 = vweird.f32 %v2277_v16  ;;  %v2287_v56 = vand.u32 2147483647, %v2277_v16  ;;  %v5324_v4 = vld [vmem:[#allocation5 + $0x60] sm:$0xff] }
 0xe7d   :  { %v2290_v57 = vor.u32 1.1754944e-38, %v2289_v14 }
 0xe7e   :  { %v2177_v48 = vmul.f32 %v4090_v43, %v2176_v45  ;;  %vm2288_vm3 = vcmp.eq.f32.partialorder %v2287_v56, 8.507059e+37  ;;  %v2459_v56 = vrot.slane %v5239_v13, 6 }
 0xe7f   :  { %v4092_v49 = vpop.eup %4091 }
 0xe80   :  { %v2114_v12 = vmul.f32 %v4092_v49, %v2112_v52  ;;  %v2178_v55 = vadd.f32 %v4090_v43, %v2177_v48  ;;  %vm2119_vm10 = vweird.f32 %v4092_v49  ;;  %v5306_v52 = vld [vmem:[#allocation5 + $0x30] sm:$0xff] }
 0xe81   :  { %v4094_v59 = vpop.eup %4093  ;;  %vm2120_vm14 = vmor %vm2118_vm11, %vm2119_vm10 }
 0xe82   :  { %v2115_v61 = vsub.f32 1.0, %v2114_v12  ;;  %v2279_v1 = vmul.f32 %v4094_v59, %v2277_v16  ;;  %v2182_v9 = vsel %vm2181_vm9, %v4090_v43, %v2178_v55  ;;  %v4096_v17 = vpop.eup %4095  ;;  %vm2284_vm0 = vweird.f32 %v4094_v59  ;;  %v5315_v43 = vld [vmem:[#allocation5 + $0x28] sm:$0xff] }
 0xe83   :  { %v2187_v34 = vsel %vm2184_vm12, %v2186_v10, %v2182_v9  ;;  %vm2285_vm2 = vmor %vm2283_vm1, %vm2284_vm0  ;;  %v5318_v16 = vld [vmem:[#allocation5 + $0x68] sm:$0xff] }
 0xe84   :  { %v2116_v6 = vmul.f32 %v4092_v49, %v2115_v61  ;;  %v2280_v15 = vsub.f32 1.0, %v2279_v1  ;;  %v2293_v40 = vmul.f32 %v2187_v34, %v5197_v8 }
 0xe86   :  { %v2117_v30 = vadd.f32 %v4092_v49, %v2116_v6  ;;  %v2281_v41 = vmul.f32 %v4094_v59, %v2280_v15 }
 0xe88   :  { %v2121_v35 = vsel %vm2120_vm14, %v4092_v49, %v2117_v30  ;;  %v2282_v50 = vadd.f32 %v4094_v59, %v2281_v41 }
 0xe89   :  { %v2126_v39 = vsel %vm2123_vm15, %v2125_v33, %v2121_v35 }
 0xe8a   :  { %v2294_v54 = vmul.f32 %v4096_v17, %v2126_v39  ;;  %v2286_v36 = vsel %vm2285_vm2, %v4094_v59, %v2282_v50 }
 0xe8b   :  { %v2291_v23 = vsel %vm2288_vm3, %v2290_v57, %v2286_v36 }
 0xe8c   :  { %v5292_v47 = vadd.f32 %v2294_v54, %v2293_v40 }
 0xe8e   :  { %4097 = vtanh.f32 %v5292_v47 }
 0xe94   :  { %v4098_v32 = vpop.eup %4097 }
 0xe95   :  { %v2297_v53 = vmul.f32 %v4098_v32, %v2291_v23 }
 0xe97   :  { %3871 = vmatmul.msk.f32.vlgmr.msra.gmra.mxu3 %vm214_vm13, %v2297_v53  ;;  %3874 = vmatmul.msk.f32.vlgmr.msrb.gmra.mxu1 %vm214_vm13, %v2297_v53  ;;  %v3580_v8 = vperm.slane %v2297_v53, 0  ;;  %v3563_v26 = vrot.slane %v2297_v53, 1 }
 0xe98   :  { %2773 = vmatpush.msra.mxu3 %v5297_v2  ;;  %2845 = vmatpush.msrb.mxu1 %v5300_v24 }
 0xe99   :  { %v5304_v60 = vsel %vm3605_vm4, %v5205_v44, %v3580_v8  ;;  %v3581_v37 = vperm.slane %v3563_v26, 0  ;;  %v5321_v44 = vld [vmem:[#allocation5 + $0x20] sm:$0xff] }
 0xe9a   :  { %2774 = vmatpush.msra.mxu3 %v5306_v52  ;;  %2846 = vmatpush.msrb.mxu1 %v5309_v0 }
 0xe9b   :  { %v5313_v27 = vsel %vm3605_vm4, %v5210_v46, %v3581_v37 }
 0xe9c   :  { %2775 = vmatpush.msra.mxu3 %v5315_v43  ;;  %2847 = vmatpush.msrb.mxu1 %v5318_v16 }
 0xe9e   :  { %2776 = vmatpush.msra.mxu3 %v5321_v44  ;;  %2848 = vmatpush.msrb.mxu1 %v5324_v4 }
 0xe9f   :  { %3877 = vmatmul.msk.f32.vlgmr.msrb.gmra.mxu3 %vm214_vm13, %v2297_v53  ;;  %3879 = vmatmul.msk.f32.vlgmr.msra.gmra.mxu1 %vm214_vm13, %v2297_v53 }
 0xea0   :  { %2940 = vmatpush.msrb.mxu3 %v5093_v22  ;;  %3001 = vmatpush.msra.mxu1 %v5096_v25  ;;  %v2430_v22 = vpop.f32.mrf.mxu1 }
 0xea1   :  { %v2434_v25 = vrot.slane %v2430_v22, 6 }
 0xea2   :  { %2941 = vmatpush.msrb.mxu3 %v5099_v28  ;;  %3002 = vmatpush.msra.mxu1 %v5102_v19  ;;  %v2315_v28 = vpop.f32.mrf.mxu2 }
 0xea3   :  { %v2319_v19 = vrot.slane %v2315_v28, 6 }
 0xea4   :  { %2942 = vmatpush.msrb.mxu3 %v5105_v63  ;;  %3003 = vmatpush.msra.mxu1 %v5108_v29 }
 0xea5   :  { %v2321_v63 = vadd.f32 %v2319_v19, %v5230_v21 }
 0xea6   :  { %2943 = vmatpush.msrb.mxu3 %v5111_v18  ;;  %3004 = vmatpush.msra.mxu1 %v5114_v20 }
 0xea7   :  { %v3864_v29 = vmul.f32 -1.442695, %v2321_v63 }
 0xed0   :  { %v2409_v46 = vpop.permute.xlu2 %2408 }
 0xed1   :  { %v2411_v51 = vadd.f32 %v2409_v46, %v5230_v21 }
 0xed3   :  { %4099 = vtanh.f32 %v2411_v51 }
 0xed4   :  { %4101 = vpow2.f32 %v3864_v29 }
 0xed9   :  { %v4100_v45 = vpop.eup %4099 }
 0xeda   :  { %2463 = vrot.lane.b32.xlu0 %v4100_v45, %s4467_s29  ;;  %v4102_v18 = vpop.eup %4101 }
 0xedb   :  { %v2325_v48 = vadd.f32 1.0, %v4102_v18 }
 0xedd   :  { %4103 = vrcp.f32 %v2325_v48  ;;  %v2337_v59 = vand.u32 2147483648, %v2325_v48  ;;  %vm2331_vm6 = vweird.f32 %v2325_v48  ;;  %v2335_v62 = vand.u32 2147483647, %v2325_v48 }
 0xedf   :  { %v2338_v1 = vor.u32 1.1754944e-38, %v2337_v59  ;;  %vm2336_vm8 = vcmp.eq.f32.partialorder %v2335_v62, 8.507059e+37  ;;  %v2364_v7 = vpop.permute.xlu1 %2363  ;;  %v5360_v59 = vld [vmem:[#allocation8 + $0x58] sm:$0xff] }
 0xee0   :  { %v2366_v9 = vadd.f32 %v2364_v7, %v5230_v21  ;;  %v5363_v62 = vld [vmem:[#allocation8 + $0x78] sm:$0xff]  ;;  %v5381_v7 = vld [vmem:[#allocation5 + $0x8] sm:$0xff] }
 0xee2   :  { %2435 = vrot.lane.b32.xlu0 %v2434_v25, %s4469_s10  ;;  %v3866_v10 = vmul.f32 -1.442695, %v2366_v9  ;;  %v5384_v9 = vld [vmem:[#allocation8 + $0x48] sm:$0xff] }
 0xee3   :  { %v4104_v20 = vpop.eup %4103 }
 0xee4   :  { %v2327_v49 = vmul.f32 %v4104_v20, %v2325_v48  ;;  %vm2332_vm5 = vweird.f32 %v4104_v20  ;;  %4105 = vpow2.f32 %v3866_v10  ;;  %v5387_v10 = vld [vmem:[#allocation8 + $0x68] sm:$0xff] }
 0xee5   :  { %vm2333_vm7 = vmor %vm2331_vm6, %vm2332_vm5 }
 0xee6   :  { %v2328_v11 = vsub.f32 1.0, %v2327_v49 }
 0xee8   :  { %v2329_v12 = vmul.f32 %v4104_v20, %v2328_v11 }
 0xeea   :  { %v2330_v55 = vadd.f32 %v4104_v20, %v2329_v12  ;;  %v4106_v15 = vpop.eup %4105  ;;  %v5354_v12 = vld [vmem:[#allocation5 + $0x58] sm:$0xff] }
 0xeeb   :  { %v2370_v30 = vadd.f32 1.0, %v4106_v15  ;;  %v5392_v15 = vld [vmem:[#allocation5 + $0x40] sm:$0xff] }
 0xeec   :  { %v2334_v61 = vsel %vm2333_vm7, %v4104_v20, %v2330_v55  ;;  %v5357_v55 = vld [vmem:[#allocation5 + $0x18] sm:$0xff] }
 0xeed   :  { %v2339_v5 = vsel %vm2336_vm8, %v2338_v1, %v2334_v61  ;;  %4107 = vrcp.f32 %v2370_v30  ;;  %v2382_v39 = vand.u32 2147483648, %v2370_v30  ;;  %vm2376_vm10 = vweird.f32 %v2370_v30  ;;  %v5366_v61 = vld [vmem:[#allocation5 + $0x50] sm:$0xff] }
 0xeee   :  { %v2380_v40 = vand.u32 2147483647, %v2370_v30  ;;  %v5369_v1 = vld [vmem:[#allocation5 + $0x10] sm:$0xff] }
 0xeef   :  { %v2383_v50 = vor.u32 1.1754944e-38, %v2382_v39  ;;  %v5413_v39 = vld [vmem:[#allocation7 + $0x10] sm:$0xff] }
 0xef0   :  { %vm2381_vm12 = vcmp.eq.f32.partialorder %v2380_v40, 8.507059e+37  ;;  %v5416_v40 = vld [vmem:[#allocation7 + $0x28] sm:$0xff] }
 0xef3   :  { %v4108_v33 = vpop.eup %4107 }
 0xef4   :  { %v2372_v34 = vmul.f32 %v4108_v33, %v2370_v30  ;;  %vm2377_vm9 = vweird.f32 %v4108_v33  ;;  %v5395_v30 = vld [vmem:[#allocation5] sm:$0xff] }
 0xef5   :  { %vm2378_vm11 = vmor %vm2376_vm10, %vm2377_vm9 }
 0xef6   :  { %v2373_v35 = vsub.f32 1.0, %v2372_v34  ;;  %v5401_v34 = vld [vmem:[#allocation8 + $0x60] sm:$0xff] }
 0xef8   :  { %v2374_v17 = vmul.f32 %v4108_v33, %v2373_v35  ;;  %v5404_v35 = vld [vmem:[#allocation7 + $0x38] sm:$0xff] }
 0xefa   :  { %v2375_v41 = vadd.f32 %v4108_v33, %v2374_v17  ;;  %v5407_v17 = vld [vmem:[#allocation7 + $0x18] sm:$0xff] }
 0xefc   :  { %v2379_v54 = vsel %vm2378_vm11, %v4108_v33, %v2375_v41  ;;  %v5398_v33 = vld [vmem:[#allocation8 + $0x40] sm:$0xff]  ;;  %v5410_v41 = vld [vmem:[#allocation7 + $0x30] sm:$0xff] }
 0xefd   :  { %v2384_v14 = vsel %vm2381_vm12, %v2383_v50, %v2379_v54  ;;  %v5419_v54 = vld [vmem:[#allocation7 + $0x8] sm:$0xff]  ;;  %v5424_v50 = vld [vmem:[#allocation7 + $0x20] sm:$0xff] }
 0xefe   :  { %v2461_v36 = vmul.f32 %v2459_v56, %v2384_v14  ;;  %v5427_v14 = vld [vmem:[#allocation7] sm:$0xff]  ;;  %v5430_v56 = vld [vmem:[#allocation7 + $0x78] sm:$0xff] }
 0xeff   :  { %5775 = vst [vmem:[#allocation30_spill] sm:$0xff] %v5430_v56 }
 0xf4c   :  { %v2464_v3 = vpop.permute.xlu0 %2463 }
 0xf4d   :  { %v2466_v6 = vmul.f32 %v2464_v3, %v2339_v5  ;;  %v5372_v3 = vld [vmem:[#allocation8 + $0x50] sm:$0xff] }
 0xf4e   :  { %v5375_v5 = vld [vmem:[#allocation8 + $0x70] sm:$0xff] }
 0xf4f   :  { %2468 = vrot.lane.b32.xlu2 %v2466_v6, %s4468_s30  ;;  %v5378_v6 = vld [vmem:[#allocation5 + $0x48] sm:$0xff] }
 0xf54   :  { %v2436_v53 = vpop.permute.xlu0 %2435 }
 0xf55   :  { %v2438_v8 = vadd.f32 %v2436_v53, %v5230_v21  ;;  %v5442_v53 = vld [vmem:[#allocation7 + $0x68] sm:$0xff] }
 0xf56   :  { %5778 = vst [vmem:[#allocation19_spill] sm:$0xff] %v5442_v53 }
 0xf57   :  { %v3869_v26 = vmul.f32 -1.442695, %v2438_v8  ;;  %v5445_v8 = vld [vmem:[#allocation7 + $0x48] sm:$0xff] }
 0xf58   :  { %5779 = vst [vmem:[#allocation21_spill] sm:$0xff] %v5445_v8 }
 0xfa9   :  { %v2469_v57 = vpop.permute.xlu2 %2468 }
 0xfaa   :  { %v5344_v32 = vadd.f32 %v2469_v57, %v2461_v36  ;;  %v5433_v36 = vld [vmem:[#allocation7 + $0x58] sm:$0xff]  ;;  %v5436_v57 = vld [vmem:[#allocation7 + $0x70] sm:$0xff] }
 0xfab   :  { %5776 = vst [vmem:[#allocation18_spill] sm:$0xff] %v5436_v57 }
 0xfac   :  { %4109 = vtanh.f32 %v5344_v32 }
 0xfad   :  { %4111 = vpow2.f32 %v3869_v26  ;;  %v5448_v26 = vld [vmem:[#allocation7 + $0x60] sm:$0xff] }
 0xfae   :  { %5780 = vst [vmem:[#allocation22_spill] sm:$0xff] %v5448_v26 }
 0xfb2   :  { %v4110_v23 = vpop.eup %4109 }
 0xfb3   :  { %2474 = vrot.lane.b32.xlu1 %v4110_v23, %s4467_s29  ;;  %v4112_v37 = vpop.eup %4111  ;;  %v5439_v23 = vld [vmem:[#allocation7 + $0x50] sm:$0xff] }
 0xfb4   :  { %v2442_v46 = vadd.f32 1.0, %v4112_v37  ;;  %5777 = vst [vmem:[#allocation20_spill] sm:$0xff] %v5439_v23  ;;  %v5451_v37 = vld [vmem:[#allocation7 + $0x40] sm:$0xff] }
 0xfb5   :  { %5781 = vst [vmem:[#allocation23_spill] sm:$0xff] %v5451_v37 }
 0xfb6   :  { %4113 = vrcp.f32 %v2442_v46  ;;  %v2454_v28 = vand.u32 2147483648, %v2442_v46  ;;  %vm2448_vm15 = vweird.f32 %v2442_v46  ;;  %v2452_v19 = vand.u32 2147483647, %v2442_v46 }
 0xfb8   :  { %v2455_v29 = vor.u32 1.1754944e-38, %v2454_v28  ;;  %vm2453_vm1 = vcmp.eq.f32.partialorder %v2452_v19, 8.507059e+37 }
 0xfbc   :  { %v4114_v51 = vpop.eup %4113 }
 0xfbd   :  { %v2444_v45 = vmul.f32 %v4114_v51, %v2442_v46  ;;  %vm2449_vm14 = vweird.f32 %v4114_v51  ;;  %v2525_v46 = vpop.f32.mrf.mxu3 }
 0xfbe   :  { %vm2450_vm0 = vmor %vm2448_vm15, %vm2449_vm14  ;;  %vm3608_vm15 = vcmask 1044480  }
 0xfbf   :  { %v2445_v13 = vsub.f32 1.0, %v2444_v45  ;;  %v2586_v45 = vpop.f32.mrf.mxu1 }
 0xfc1   :  { %v2446_v22 = vmul.f32 %v4114_v51, %v2445_v13 }
 0xfc3   :  { %v2447_v25 = vadd.f32 %v4114_v51, %v2446_v22 }
 0xfc5   :  { %v2451_v63 = vsel %vm2450_vm0, %v4114_v51, %v2447_v25  ;;  %v2647_v51 = vpop.f32.mrf.mxu3 }
 0xfc6   :  { %v2456_v18 = vsel %vm2453_vm1, %v2455_v29, %v2451_v63 }
0x1025   :  { %v2475_v48 = vpop.permute.xlu1 %2474 }
0x1026   :  { %v2477_v20 = vmul.f32 %v2475_v48, %v2456_v18 }
0x1028   :  { %v2479_v49 = vrot.slane %v2477_v20, 2 }
0x102a   :  { %2480 = vrot.lane.b32.xlu2 %v2479_v49, %s4468_s30 }
0x1084   :  { %v2481_v11 = vpop.permute.xlu2 %2480 }
0x1085   :  { %3870 = vmatmul.msk.f32.vlgmr.msra.gmra.mxu2 %vm214_vm13, %v2481_v11  ;;  %3873 = vmatmul.msk.f32.vlgmr.msra.gmra.mxu0 %vm214_vm13, %v2481_v11 }
0x1086   :  { %3883 = vmatmul.msk.f32.vlgmr.msra.gmra.mxu3 %vm214_vm13, %v2481_v11  ;;  %3886 = vmatmul.msk.f32.vlgmr.msrb.gmra.mxu1 %vm214_vm13, %v2481_v11 }
0x1087   :  { %2818 = vmatpush.msra.mxu0 %v5354_v12  ;;  %2730 = vmatpush.msra.mxu2 %v5357_v55 }
0x1088   :  { %3062 = vmatpush.msra.mxu3 %v5360_v59  ;;  %3105 = vmatpush.msrb.mxu1 %v5363_v62 }
0x1089   :  { %2819 = vmatpush.msra.mxu0 %v5366_v61  ;;  %2731 = vmatpush.msra.mxu2 %v5369_v1 }
0x108a   :  { %3063 = vmatpush.msra.mxu3 %v5372_v3  ;;  %3106 = vmatpush.msrb.mxu1 %v5375_v5 }
0x108b   :  { %2820 = vmatpush.msra.mxu0 %v5378_v6  ;;  %2732 = vmatpush.msra.mxu2 %v5381_v7 }
0x108c   :  { %3064 = vmatpush.msra.mxu3 %v5384_v9  ;;  %3107 = vmatpush.msrb.mxu1 %v5387_v10 }
0x108d   :  { %3876 = vmatmul.msk.f32.vlgmr.msrb.gmra.mxu2 %vm214_vm13, %v2481_v11  ;;  %3878 = vmatmul.msk.f32.vlgmr.msrb.gmra.mxu0 %vm214_vm13, %v2481_v11 }
0x108e   :  { %2821 = vmatpush.msra.mxu0 %v5392_v15  ;;  %2733 = vmatpush.msra.mxu2 %v5395_v30 }
0x108f   :  { %3065 = vmatpush.msra.mxu3 %v5398_v33  ;;  %3108 = vmatpush.msrb.mxu1 %v5401_v34 }
0x1090   :  { %2980 = vmatpush.msrb.mxu0 %v5404_v35  ;;  %2916 = vmatpush.msrb.mxu2 %v5407_v17 }
0x1092   :  { %2981 = vmatpush.msrb.mxu0 %v5410_v41  ;;  %2917 = vmatpush.msrb.mxu2 %v5413_v39 }
0x1094   :  { %2982 = vmatpush.msrb.mxu0 %v5416_v40  ;;  %2918 = vmatpush.msrb.mxu2 %v5419_v54 }
0x1095   :  { %3881 = vmatmul.msk.f32.vlgmr.msra.gmra.mxu2 %vm214_vm13, %v2481_v11  ;;  %3885 = vmatmul.msk.f32.vlgmr.msra.gmra.mxu0 %vm214_vm13, %v2481_v11  ;;  %v2690_v11 = vpop.f32.mrf.mxu1 }
0x1096   :  { %2983 = vmatpush.msrb.mxu0 %v5424_v50  ;;  %2919 = vmatpush.msrb.mxu2 %v5427_v14 }
0x1098   :  { %3084 = vmatpush.msra.mxu0 %v5430_v56  ;;  %3041 = vmatpush.msra.mxu2 %v5433_v36 }
0x109a   :  { %3085 = vmatpush.msra.mxu0 %v5436_v57  ;;  %3042 = vmatpush.msra.mxu2 %v5439_v23 }
0x109c   :  { %3086 = vmatpush.msra.mxu0 %v5442_v53  ;;  %3043 = vmatpush.msra.mxu2 %v5445_v8 }
0x109e   :  { %3087 = vmatpush.msra.mxu0 %v5448_v26  ;;  %3044 = vmatpush.msra.mxu2 %v5451_v37 }
0x1102   :  { %v2565_v13 = vpop.f32.mrf.mxu0 }
0x1103   :  { %v2568_v22 = vadd.f32 %v5771_v42, %v2565_v13 }
0x1105   :  { %v2589_v25 = vadd.f32 %v2586_v45, %v2568_v22 }
0x1107   :  { %v3875_v28 = vmul.f32 -1.442695, %v2589_v25 }
0x1108   :  { %v2501_v19 = vpop.f32.mrf.mxu2 }
0x1109   :  { %4115 = vpow2.f32 %v3875_v28  ;;  %v2504_v63 = vadd.f32 %v5772_v38, %v2501_v19  ;;  %v2778_v29 = vpop.f32.mrf.mxu3 }
0x110a   :  { %v2782_v18 = vrot.slane %v2778_v29, 4  ;;  %v2669_v48 = vpop.f32.mrf.mxu0 }
0x110b   :  { %v2528_v20 = vadd.f32 %v2525_v46, %v2504_v63  ;;  %v2672_v49 = vadd.f32 %v5773_v58, %v2669_v48 }
0x110c   :  { %2783 = vrot.lane.b32.xlu2 %v2782_v18, %s4468_s30 }
0x110d   :  { %v3872_v26 = vmul.f32 -1.442695, %v2528_v20  ;;  %v2693_v37 = vadd.f32 %v2690_v11, %v2672_v49 }
0x110f   :  { %v4116_v53 = vpop.eup %4115  ;;  %4117 = vpow2.f32 %v3872_v26  ;;  %v3880_v42 = vmul.f32 -1.442695, %v2693_v37 }
0x1110   :  { %v2593_v45 = vadd.f32 1.0, %v4116_v53  ;;  %v2626_v28 = vpop.f32.mrf.mxu2 }
0x1111   :  { %4119 = vpow2.f32 %v3880_v42  ;;  %v2629_v29 = vadd.f32 %v5774_v31, %v2626_v28 }
0x1112   :  { %4121 = vrcp.f32 %v2593_v45  ;;  %v2823_v13 = vpop.f32.mrf.mxu0  ;;  %v2605_v11 = vand.u32 2147483648, %v2593_v45  ;;  %vm2599_vm3 = vweird.f32 %v2593_v45 }
0x1113   :  { %v2827_v22 = vrot.slane %v2823_v13, 4  ;;  %v2650_v18 = vadd.f32 %v2647_v51, %v2629_v29 }
0x1114   :  { %v2606_v28 = vor.u32 1.1754944e-38, %v2605_v11 }
0x1115   :  { %v4118_v38 = vpop.eup %4117  ;;  %2828 = vrot.lane.b32.xlu0 %v2827_v22, %s4467_s29  ;;  %v2603_v22 = vand.u32 2147483647, %v2593_v45 }
0x1116   :  { %v2532_v25 = vadd.f32 1.0, %v4118_v38 }
0x1117   :  { %v4120_v46 = vpop.eup %4119  ;;  %vm2604_vm7 = vcmp.eq.f32.partialorder %v2603_v22, 8.507059e+37  ;;  %v2850_v22 = vpop.f32.mrf.mxu1 }
0x1118   :  { %v4122_v58 = vpop.eup %4121  ;;  %4123 = vrcp.f32 %v2532_v25  ;;  %v2697_v19 = vadd.f32 1.0, %v4120_v46  ;;  %v2544_v38 = vand.u32 2147483648, %v2532_v25  ;;  %v2542_v8 = vand.u32 2147483647, %v2532_v25 }
0x1119   :  { %v2595_v63 = vmul.f32 %v4122_v58, %v2593_v45  ;;  %vm2600_vm2 = vweird.f32 %v4122_v58  ;;  %vm2538_vm6 = vweird.f32 %v2532_v25 }
0x111a   :  { %4125 = vrcp.f32 %v2697_v19  ;;  %vm2601_vm4 = vmor %vm2599_vm3, %vm2600_vm2  ;;  %v2545_v51 = vor.u32 1.1754944e-38, %v2544_v38  ;;  %vm2543_vm9 = vcmp.eq.f32.partialorder %v2542_v8, 8.507059e+37  ;;  %vm2703_vm11 = vweird.f32 %v2697_v19 }
0x111b   :  { %v2596_v26 = vsub.f32 1.0, %v2595_v63  ;;  %4127 = vtanh.f32 %v2650_v18  ;;  %v2854_v38 = vrot.slane %v2850_v22, 4 }
0x111d   :  { %v2597_v37 = vmul.f32 %v4122_v58, %v2596_v26 }
0x111e   :  { %v4124_v53 = vpop.eup %4123 }
0x111f   :  { %v2534_v48 = vmul.f32 %v4124_v53, %v2532_v25  ;;  %v2598_v20 = vadd.f32 %v4122_v58, %v2597_v37  ;;  %vm2539_vm5 = vweird.f32 %v4124_v53  ;;  %v2707_v25 = vand.u32 2147483647, %v2697_v19 }
0x1120   :  { %v4126_v49 = vpop.eup %4125  ;;  %vm2540_vm8 = vmor %vm2538_vm6, %vm2539_vm5 }
0x1121   :  { %v2535_v42 = vsub.f32 1.0, %v2534_v48  ;;  %v2699_v13 = vmul.f32 %v4126_v49, %v2697_v19  ;;  %v2602_v31 = vsel %vm2601_vm4, %v4122_v58, %v2598_v20  ;;  %v4128_v48 = vpop.eup %4127  ;;  %vm2704_vm10 = vweird.f32 %v4126_v49 }
0x1122   :  { %v2607_v29 = vsel %vm2604_vm7, %v2606_v28, %v2602_v31  ;;  %v2709_v58 = vand.u32 2147483648, %v2697_v19  ;;  %vm2705_vm12 = vmor %vm2703_vm11, %vm2704_vm10  ;;  %vm2708_vm14 = vcmp.eq.f32.partialorder %v2707_v25, 8.507059e+37 }
0x1123   :  { %v2536_v46 = vmul.f32 %v4124_v53, %v2535_v42  ;;  %v2700_v63 = vsub.f32 1.0, %v2699_v13  ;;  %v2713_v23 = vmul.f32 %v2607_v29, %v5292_v47 }
0x1124   :  { %v2710_v11 = vor.u32 1.1754944e-38, %v2709_v58 }
0x1125   :  { %v2537_v26 = vadd.f32 %v4124_v53, %v2536_v46  ;;  %v2701_v57 = vmul.f32 %v4126_v49, %v2700_v63  ;;  %v2735_v46 = vpop.f32.mrf.mxu2 }
0x1126   :  { %v2739_v31 = vrot.slane %v2735_v46, 4 }
0x1127   :  { %v2541_v37 = vsel %vm2540_vm8, %v4124_v53, %v2537_v26  ;;  %v2702_v56 = vadd.f32 %v4126_v49, %v2701_v57 }
0x1128   :  { %v2546_v45 = vsel %vm2543_vm9, %v2545_v51, %v2541_v37  ;;  %v2741_v28 = vadd.f32 %v2739_v31, %v5230_v21 }
0x1129   :  { %v2714_v18 = vmul.f32 %v4128_v48, %v2546_v45  ;;  %v2706_v20 = vsel %vm2705_vm12, %v4126_v49, %v2702_v56 }
0x112a   :  { %v2711_v53 = vsel %vm2708_vm14, %v2710_v11, %v2706_v20  ;;  %v3882_v63 = vmul.f32 -1.442695, %v2741_v28 }
0x112b   :  { %v5461_v42 = vadd.f32 %v2714_v18, %v2713_v23 }
0x112d   :  { %4129 = vtanh.f32 %v5461_v42 }
0x1133   :  { %v4130_v8 = vpop.eup %4129 }
0x1134   :  { %v2717_v13 = vmul.f32 %v4130_v8, %v2711_v53 }
0x1136   :  { %3889 = vmatmul.msk.f32.vlgmr.msrb.gmra.mxu3 %vm214_vm13, %v2717_v13  ;;  %3892 = vmatmul.msk.f32.vlgmr.msra.gmra.mxu1 %vm214_vm13, %v2717_v13  ;;  %v3584_v47 = vperm.slane %v2717_v13, 0  ;;  %v3564_v57 = vrot.slane %v2717_v13, 1 }
0x1137   :  { %3193 = vmatpush.msrb.mxu3 %v5297_v2  ;;  %3265 = vmatpush.msra.mxu1 %v5300_v24  ;;  %v4294_v2 = vld [vmem:[#allocation8 + $0x18] sm:$0xff] }
0x1138   :  { %v5469_v23 = vsel %vm3608_vm15, %v5304_v60, %v3584_v47  ;;  %v3585_v56 = vperm.slane %v3564_v57, 0  ;;  %v4295_v24 = vld [vmem:[#allocation8 + $0x38] sm:$0xff]  ;;  %v4296_v60 = vld [vmem:[#allocation8 + $0x10] sm:$0xff] }
0x1139   :  { %3194 = vmatpush.msrb.mxu3 %v5306_v52  ;;  %3266 = vmatpush.msra.mxu1 %v5309_v0  ;;  %v4297_v52 = vld [vmem:[#allocation8 + $0x30] sm:$0xff]  ;;  %v4298_v0 = vld [vmem:[#allocation8 + $0x8] sm:$0xff] }
0x113a   :  { %v5474_v19 = vsel %vm3608_vm15, %v5313_v27, %v3585_v56  ;;  %v4299_v27 = vld [vmem:[#allocation8 + $0x28] sm:$0xff] }
0x113b   :  { %3195 = vmatpush.msrb.mxu3 %v5315_v43  ;;  %3267 = vmatpush.msra.mxu1 %v5318_v16  ;;  %v4300_v43 = vld [vmem:[#allocation8] sm:$0xff] }
0x113c   :  { %v4301_v16 = vld [vmem:[#allocation8 + $0x20] sm:$0xff] }
0x113d   :  { %3196 = vmatpush.msrb.mxu3 %v5321_v44  ;;  %3268 = vmatpush.msra.mxu1 %v5324_v4 }
0x113e   :  { %3895 = vmatmul.msk.f32.vlgmr.msra.gmra.mxu3 %vm214_vm13, %v2717_v13  ;;  %3897 = vmatmul.msk.f32.vlgmr.msrb.gmra.mxu1 %vm214_vm13, %v2717_v13 }
0x113f   :  { %3360 = vmatpush.msra.mxu3 %v4294_v2  ;;  %3421 = vmatpush.msrb.mxu1 %v4295_v24 }
0x1141   :  { %3361 = vmatpush.msra.mxu3 %v4296_v60  ;;  %3422 = vmatpush.msrb.mxu1 %v4297_v52 }
0x1143   :  { %3362 = vmatpush.msra.mxu3 %v4298_v0  ;;  %3423 = vmatpush.msrb.mxu1 %v4299_v27 }
0x1145   :  { %3363 = vmatpush.msra.mxu3 %v4300_v43  ;;  %3424 = vmatpush.msrb.mxu1 %v4301_v16 }
0x1166   :  { %v2784_v47 = vpop.permute.xlu2 %2783 }
0x1167   :  { %v2786_v57 = vadd.f32 %v2784_v47, %v5230_v21 }
0x1169   :  { %v3884_v56 = vmul.f32 -1.442695, %v2786_v57 }
0x1187   :  { %v2829_v44 = vpop.permute.xlu0 %2828 }
0x1188   :  { %v2831_v4 = vadd.f32 %v2829_v44, %v5230_v21 }
0x118a   :  { %4131 = vtanh.f32 %v2831_v4 }
0x118b   :  { %4133 = vpow2.f32 %v3882_v63 }
0x1190   :  { %v4132_v49 = vpop.eup %4131 }
0x1191   :  { %2883 = vrot.lane.b32.xlu1 %v4132_v49, %s4467_s29  ;;  %v4134_v26 = vpop.eup %4133 }
0x1192   :  { %v2745_v51 = vadd.f32 1.0, %v4134_v26 }
0x1194   :  { %4135 = vrcp.f32 %v2745_v51  ;;  %v2757_v58 = vand.u32 2147483648, %v2745_v51  ;;  %vm2751_vm1 = vweird.f32 %v2745_v51  ;;  %v2755_v25 = vand.u32 2147483647, %v2745_v51 }
0x1195   :  { %4137 = vpow2.f32 %v3884_v56 }
0x1196   :  { %v2758_v11 = vor.u32 1.1754944e-38, %v2757_v58  ;;  %vm2756_vm3 = vcmp.eq.f32.partialorder %v2755_v25, 8.507059e+37 }
0x1199   :  { %2855 = vrot.lane.b32.xlu1 %v2854_v38, %s4469_s10  ;;  %v2879_v38 = vrot.slane %v5344_v32, 6 }
0x119a   :  { %v4136_v29 = vpop.eup %4135 }
0x119b   :  { %v2747_v37 = vmul.f32 %v4136_v29, %v2745_v51  ;;  %vm2752_vm0 = vweird.f32 %v4136_v29  ;;  %v4138_v2 = vpop.eup %4137 }
0x119c   :  { %vm2753_vm2 = vmor %vm2751_vm1, %vm2752_vm0  ;;  %v2790_v24 = vadd.f32 1.0, %v4138_v2 }
0x119d   :  { %v2748_v48 = vsub.f32 1.0, %v2747_v37 }
0x119e   :  { %4139 = vrcp.f32 %v2790_v24  ;;  %v2802_v16 = vand.u32 2147483648, %v2790_v24  ;;  %vm2796_vm5 = vweird.f32 %v2790_v24  ;;  %v2800_v44 = vand.u32 2147483647, %v2790_v24 }
0x119f   :  { %v2749_v45 = vmul.f32 %v4136_v29, %v2748_v48 }
0x11a0   :  { %v2803_v49 = vor.u32 1.1754944e-38, %v2802_v16  ;;  %vm2801_vm7 = vcmp.eq.f32.partialorder %v2800_v44, 8.507059e+37 }
0x11a1   :  { %v2750_v18 = vadd.f32 %v4136_v29, %v2749_v45 }
0x11a3   :  { %v2754_v20 = vsel %vm2753_vm2, %v4136_v29, %v2750_v18 }
0x11a4   :  { %v2759_v53 = vsel %vm2756_vm3, %v2758_v11, %v2754_v20  ;;  %v4140_v60 = vpop.eup %4139 }
0x11a5   :  { %v2792_v52 = vmul.f32 %v4140_v60, %v2790_v24  ;;  %vm2797_vm4 = vweird.f32 %v4140_v60 }
0x11a6   :  { %vm2798_vm6 = vmor %vm2796_vm5, %vm2797_vm4 }
0x11a7   :  { %v2793_v0 = vsub.f32 1.0, %v2792_v52 }
0x11a9   :  { %v2794_v27 = vmul.f32 %v4140_v60, %v2793_v0 }
0x11ab   :  { %v2795_v43 = vadd.f32 %v4140_v60, %v2794_v27 }
0x11ad   :  { %v2799_v4 = vsel %vm2798_vm6, %v4140_v60, %v2795_v43 }
0x11ae   :  { %v2804_v22 = vsel %vm2801_vm7, %v2803_v49, %v2799_v4 }
0x11af   :  { %v2881_v46 = vmul.f32 %v2879_v38, %v2804_v22 }
0x1203   :  { %v2884_v8 = vpop.permute.xlu1 %2883 }
0x1204   :  { %v2886_v13 = vmul.f32 %v2884_v8, %v2759_v53 }
0x1206   :  { %2888 = vrot.lane.b32.xlu0 %v2886_v13, %s4468_s30 }
0x120b   :  { %v2856_v26 = vpop.permute.xlu1 %2855 }
0x120c   :  { %v2858_v51 = vadd.f32 %v2856_v26, %v5230_v21 }
0x120e   :  { %v3887_v29 = vmul.f32 -1.442695, %v2858_v51 }
0x1278   :  { %v2889_v31 = vpop.permute.xlu0 %2888 }
0x1279   :  { %v5489_v28 = vadd.f32 %v2889_v31, %v2881_v46 }
0x127b   :  { %4141 = vtanh.f32 %v5489_v28 }
0x127c   :  { %4143 = vpow2.f32 %v3887_v29 }
0x1281   :  { %v4142_v63 = vpop.eup %4141 }
0x1282   :  { %2894 = vrot.lane.b32.xlu2 %v4142_v63, %s4467_s29  ;;  %v4144_v37 = vpop.eup %4143  ;;  %v5558_v63 = vld [vmem:[%s5638_s6 + $0x2] ss:$0 sm:$0xff] }
0x1283   :  { %v2862_v48 = vadd.f32 1.0, %v4144_v37 }
0x1285   :  { %4145 = vrcp.f32 %v2862_v48  ;;  %v2874_v20 = vand.u32 2147483648, %v2862_v48  ;;  %vm2868_vm9 = vweird.f32 %v2862_v48  ;;  %v2872_v11 = vand.u32 2147483647, %v2862_v48 }
0x1287   :  { %v2875_v53 = vor.u32 1.1754944e-38, %v2874_v20  ;;  %vm2873_vm11 = vcmp.eq.f32.partialorder %v2872_v11, 8.507059e+37 }
0x128b   :  { %v4146_v45 = vpop.eup %4145 }
0x128c   :  { %v2864_v18 = vmul.f32 %v4146_v45, %v2862_v48  ;;  %vm2869_vm8 = vweird.f32 %v4146_v45 }
0x128d   :  { %vm2870_vm10 = vmor %vm2868_vm9, %vm2869_vm8  ;;  %vm3611_vm9 = vcmask 1045504  }
0x128e   :  { %v2865_v32 = vsub.f32 1.0, %v2864_v18 }
0x1290   :  { %v2866_v58 = vmul.f32 %v4146_v45, %v2865_v32 }
0x1292   :  { %v2867_v25 = vadd.f32 %v4146_v45, %v2866_v58 }
0x1294   :  { %v2871_v8 = vsel %vm2870_vm10, %v4146_v45, %v2867_v25 }
0x1295   :  { %v2876_v13 = vsel %vm2873_vm11, %v2875_v53, %v2871_v8 }
0x12dc   :  { %v2895_v47 = vpop.permute.xlu2 %2894 }
0x12dd   :  { %v2897_v57 = vmul.f32 %v2895_v47, %v2876_v13 }
0x12df   :  { %v2899_v56 = vrot.slane %v2897_v57, 4 }
0x12e1   :  { %2900 = vrot.lane.b32.xlu0 %v2899_v56, %s4468_s30 }
0x1353   :  { %v2901_v2 = vpop.permute.xlu0 %2900 }
0x1354   :  { %3888 = vmatmul.msk.f32.vlgmr.msrb.gmra.mxu2 %vm214_vm13, %v2901_v2  ;;  %3891 = vmatmul.msk.f32.vlgmr.msrb.gmra.mxu0 %vm214_vm13, %v2901_v2 }
0x1355   :  { %3901 = vmatmul.msk.f32.vlgmr.msrb.gmra.mxu3 %vm214_vm13, %v2901_v2  ;;  %3904 = vmatmul.msk.f32.vlgmr.msra.gmra.mxu1 %vm214_vm13, %v2901_v2 }
0x1356   :  { %3238 = vmatpush.msrb.mxu0 %v5354_v12  ;;  %3150 = vmatpush.msrb.mxu2 %v5357_v55  ;;  %v5782_v12 = vld [vmem:[#allocation30_spill] sm:$0xff]  ;;  %v5783_v55 = vld [vmem:[#allocation20_spill] sm:$0xff] }
0x1357   :  { %3482 = vmatpush.msrb.mxu3 %v5360_v59  ;;  %3525 = vmatpush.msra.mxu1 %v5363_v62  ;;  %v5784_v59 = vld [vmem:[#allocation18_spill] sm:$0xff]  ;;  %v5785_v62 = vld [vmem:[#allocation21_spill] sm:$0xff] }
0x1358   :  { %3239 = vmatpush.msrb.mxu0 %v5366_v61  ;;  %3151 = vmatpush.msrb.mxu2 %v5369_v1  ;;  %v5786_v61 = vld [vmem:[#allocation19_spill] sm:$0xff] }
0x1359   :  { %3483 = vmatpush.msrb.mxu3 %v5372_v3  ;;  %3526 = vmatpush.msra.mxu1 %v5375_v5  ;;  %v5787_v1 = vld [vmem:[#allocation23_spill] sm:$0xff]  ;;  %v5788_v3 = vld [vmem:[#allocation22_spill] sm:$0xff]  ;;  %v2945_v5 = vpop.f32.mrf.mxu3 }
0x135a   :  { %3240 = vmatpush.msrb.mxu0 %v5378_v6  ;;  %3152 = vmatpush.msrb.mxu2 %v5381_v7  ;;  %v3006_v7 = vpop.f32.mrf.mxu1 }
0x135b   :  { %3484 = vmatpush.msrb.mxu3 %v5384_v9  ;;  %3527 = vmatpush.msra.mxu1 %v5387_v10  ;;  %v5538_v10 = vld [vmem:[%s5638_s6 + $0x1] ss:$0 sm:$0xff] }
0x135c   :  { %3894 = vmatmul.msk.f32.vlgmr.msra.gmra.mxu2 %vm214_vm13, %v2901_v2  ;;  %3896 = vmatmul.msk.f32.vlgmr.msra.gmra.mxu0 %vm214_vm13, %v2901_v2 }
0x135d   :  { %3241 = vmatpush.msrb.mxu0 %v5392_v15  ;;  %3153 = vmatpush.msrb.mxu2 %v5395_v30 }
0x135e   :  { %3485 = vmatpush.msrb.mxu3 %v5398_v33  ;;  %3528 = vmatpush.msra.mxu1 %v5401_v34 }
0x135f   :  { %3336 = vmatpush.msra.mxu2 %v5407_v17  ;;  %3400 = vmatpush.msra.mxu0 %v5404_v35  ;;  %v5544_v35 = vld [vmem:[%s5638_s6] ss:$0 sm:$0xff] }
0x1361   :  { %3337 = vmatpush.msra.mxu2 %v5413_v39  ;;  %3401 = vmatpush.msra.mxu0 %v5410_v41  ;;  %v3067_v6 = vpop.f32.mrf.mxu3 }
0x1363   :  { %3338 = vmatpush.msra.mxu2 %v5419_v54  ;;  %3402 = vmatpush.msra.mxu0 %v5416_v40 }
0x1364   :  { %3899 = vmatmul.msk.f32.vlgmr.msrb.gmra.mxu2 %vm214_vm13, %v2901_v2  ;;  %3903 = vmatmul.msk.f32.vlgmr.msrb.gmra.mxu0 %vm214_vm13, %v2901_v2 }
0x1365   :  { %3339 = vmatpush.msra.mxu2 %v5427_v14  ;;  %3403 = vmatpush.msra.mxu0 %v5424_v50  ;;  %v5550_v50 = vld [vmem:[%s5638_s6 + $0x3] ss:$0 sm:$0xff] }
0x1367   :  { %3461 = vmatpush.msrb.mxu2 %v5433_v36  ;;  %3504 = vmatpush.msrb.mxu0 %v5782_v12  ;;  %v3110_v36 = vpop.f32.mrf.mxu1 }
0x1369   :  { %3462 = vmatpush.msrb.mxu2 %v5783_v55  ;;  %3505 = vmatpush.msrb.mxu0 %v5784_v59 }
0x136b   :  { %3463 = vmatpush.msrb.mxu2 %v5785_v62  ;;  %3506 = vmatpush.msrb.mxu0 %v5786_v61 }
0x136d   :  { %3464 = vmatpush.msrb.mxu2 %v5787_v1  ;;  %3507 = vmatpush.msrb.mxu0 %v5788_v3 }
0x13d1   :  { %v2985_v9 = vpop.f32.mrf.mxu0 }
0x13d2   :  { %v2988_v15 = vadd.f32 %v5538_v10, %v2985_v9 }
0x13d4   :  { %v3009_v30 = vadd.f32 %v3006_v7, %v2988_v15 }
0x13d6   :  { %v3893_v33 = vmul.f32 -1.442695, %v3009_v30 }
0x13d7   :  { %v2921_v34 = vpop.f32.mrf.mxu2 }
0x13d8   :  { %4147 = vpow2.f32 %v3893_v33  ;;  %v2924_v17 = vadd.f32 %v5544_v35, %v2921_v34  ;;  %v3198_v41 = vpop.f32.mrf.mxu3 }
0x13d9   :  { %v3202_v39 = vrot.slane %v3198_v41, 2  ;;  %v3089_v40 = vpop.f32.mrf.mxu0 }
0x13da   :  { %v2948_v54 = vadd.f32 %v2945_v5, %v2924_v17  ;;  %v3092_v14 = vadd.f32 %v5550_v50, %v3089_v40 }
0x13db   :  { %3203 = vrot.lane.b32.xlu0 %v3202_v39, %s4468_s30 }
0x13dc   :  { %v3890_v24 = vmul.f32 -1.442695, %v2948_v54  ;;  %v3113_v60 = vadd.f32 %v3110_v36, %v3092_v14 }
0x13de   :  { %v4148_v52 = vpop.eup %4147  ;;  %4149 = vpow2.f32 %v3890_v24  ;;  %v3898_v0 = vmul.f32 -1.442695, %v3113_v60 }
0x13df   :  { %v3013_v27 = vadd.f32 1.0, %v4148_v52  ;;  %v3046_v22 = vpop.f32.mrf.mxu2  ;;  %v3270_v52 = vpop.f32.mrf.mxu1 }
0x13e0   :  { %4151 = vpow2.f32 %v3898_v0  ;;  %v3049_v26 = vadd.f32 %v5558_v63, %v3046_v22  ;;  %v3274_v0 = vrot.slane %v3270_v52, 2 }
0x13e1   :  { %4153 = vrcp.f32 %v3013_v27  ;;  %v3243_v43 = vpop.f32.mrf.mxu0  ;;  %v3025_v58 = vand.u32 2147483648, %v3013_v27  ;;  %vm3019_vm14 = vweird.f32 %v3013_v27  ;;  %v3023_v11 = vand.u32 2147483647, %v3013_v27 }
0x13e2   :  { %v3247_v16 = vrot.slane %v3243_v43, 2  ;;  %v3070_v48 = vadd.f32 %v3067_v6, %v3049_v26 }
0x13e3   :  { %v3026_v57 = vor.u32 1.1754944e-38, %v3025_v58  ;;  %vm3024_vm2 = vcmp.eq.f32.partialorder %v3023_v11, 8.507059e+37 }
0x13e4   :  { %v4150_v44 = vpop.eup %4149  ;;  %3248 = vrot.lane.b32.xlu1 %v3247_v16, %s4467_s29 }
0x13e5   :  { %v2952_v4 = vadd.f32 1.0, %v4150_v44 }
0x13e6   :  { %v4152_v49 = vpop.eup %4151 }
0x13e7   :  { %v4154_v38 = vpop.eup %4153  ;;  %4155 = vrcp.f32 %v2952_v4  ;;  %v3117_v46 = vadd.f32 1.0, %v4152_v49  ;;  %v2964_v8 = vand.u32 2147483648, %v2952_v4  ;;  %v2962_v13 = vand.u32 2147483647, %v2952_v4 }
0x13e8   :  { %v3015_v31 = vmul.f32 %v4154_v38, %v3013_v27  ;;  %vm3020_vm12 = vweird.f32 %v4154_v38  ;;  %vm2958_vm1 = vweird.f32 %v2952_v4 }
0x13e9   :  { %4157 = vrcp.f32 %v3117_v46  ;;  %vm3021_vm15 = vmor %vm3019_vm14, %vm3020_vm12  ;;  %v2965_v12 = vor.u32 1.1754944e-38, %v2964_v8  ;;  %vm2963_vm4 = vcmp.eq.f32.partialorder %v2962_v13, 8.507059e+37  ;;  %v3129_v9 = vand.u32 2147483648, %v3117_v46 }
0x13ea   :  { %v3016_v51 = vsub.f32 1.0, %v3015_v31  ;;  %4159 = vtanh.f32 %v3070_v48  ;;  %vm3123_vm6 = vweird.f32 %v3117_v46  ;;  %v3127_v15 = vand.u32 2147483647, %v3117_v46 }
0x13eb   :  { %v3130_v33 = vor.u32 1.1754944e-38, %v3129_v9 }
0x13ec   :  { %v3017_v29 = vmul.f32 %v4154_v38, %v3016_v51  ;;  %vm3128_vm8 = vcmp.eq.f32.partialorder %v3127_v15, 8.507059e+37 }
0x13ed   :  { %v4156_v37 = vpop.eup %4155 }
0x13ee   :  { %v2954_v45 = vmul.f32 %v4156_v37, %v2952_v4  ;;  %v3018_v18 = vadd.f32 %v4154_v38, %v3017_v29  ;;  %vm2959_vm0 = vweird.f32 %v4156_v37 }
0x13ef   :  { %v4158_v32 = vpop.eup %4157  ;;  %vm2960_vm3 = vmor %vm2958_vm1, %vm2959_vm0 }
0x13f0   :  { %v2955_v25 = vsub.f32 1.0, %v2954_v45  ;;  %v3119_v20 = vmul.f32 %v4158_v32, %v3117_v46  ;;  %v3022_v47 = vsel %vm3021_vm15, %v4154_v38, %v3018_v18  ;;  %v4160_v62 = vpop.eup %4159  ;;  %vm3124_vm5 = vweird.f32 %v4158_v32 }
0x13f1   :  { %v3027_v55 = vsel %vm3024_vm2, %v3026_v57, %v3022_v47  ;;  %vm3125_vm7 = vmor %vm3123_vm6, %vm3124_vm5 }
0x13f2   :  { %v2956_v53 = vmul.f32 %v4156_v37, %v2955_v25  ;;  %v3120_v56 = vsub.f32 1.0, %v3119_v20  ;;  %v3133_v3 = vmul.f32 %v3027_v55, %v5461_v42 }
0x13f4   :  { %v2957_v2 = vadd.f32 %v4156_v37, %v2956_v53  ;;  %v3121_v61 = vmul.f32 %v4158_v32, %v3120_v56 }
0x13f6   :  { %v2961_v59 = vsel %vm2960_vm3, %v4156_v37, %v2957_v2  ;;  %v3122_v7 = vadd.f32 %v4158_v32, %v3121_v61 }
0x13f7   :  { %v2966_v1 = vsel %vm2963_vm4, %v2965_v12, %v2961_v59  ;;  %v3299_v59 = vrot.slane %v5489_v28, 6 }
0x13f8   :  { %v3134_v5 = vmul.f32 %v4160_v62, %v2966_v1  ;;  %v3126_v30 = vsel %vm3125_vm7, %v4158_v32, %v3122_v7 }
0x13f9   :  { %v3131_v17 = vsel %vm3128_vm8, %v3130_v33, %v3126_v30 }
0x13fa   :  { %v5562_v6 = vadd.f32 %v3134_v5, %v3133_v3 }
0x13fc   :  { %4161 = vtanh.f32 %v5562_v6 }
0x1402   :  { %v4162_v34 = vpop.eup %4161 }
0x1403   :  { %v3137_v41 = vmul.f32 %v4162_v34, %v3131_v17 }
0x1405   :  { %3907 = vmatmul.msk.f32.vlgmr.msra.gmra.mxu3 %vm214_vm13, %v3137_v41  ;;  %3910 = vmatmul.msk.f32.vlgmr.msrb.gmra.mxu1 %vm214_vm13, %v3137_v41  ;;  %v3588_v42 = vperm.slane %v3137_v41, 0  ;;  %v3565_v39 = vrot.slane %v3137_v41, 1 }
0x1407   :  { %v5568_v40 = vsel %vm3611_vm9, %v5469_v23, %v3588_v42  ;;  %v3589_v54 = vperm.slane %v3565_v39, 0  ;;  %v3155_v23 = vpop.f32.mrf.mxu2 }
0x1408   :  { %v3159_v27 = vrot.slane %v3155_v23, 2 }
0x1409   :  { %v5571_v14 = vsel %vm3611_vm9, %v5474_v19, %v3589_v54 }
0x140a   :  { %v3161_v19 = vadd.f32 %v3159_v27, %v5230_v21 }
0x140c   :  { %v3900_v43 = vmul.f32 -1.442695, %v3161_v19 }
0x140d   :  { %3913 = vmatmul.msk.f32.vlgmr.msrb.gmra.mxu3 %vm214_vm13, %v3137_v41  ;;  %3915 = vmatmul.msk.f32.vlgmr.msra.gmra.mxu1 %vm214_vm13, %v3137_v41 }
0x144d   :  { %v3204_v18 = vpop.permute.xlu0 %3203 }
0x144e   :  { %v3206_v32 = vadd.f32 %v3204_v18, %v5230_v21 }
0x1450   :  { %v3902_v58 = vmul.f32 -1.442695, %v3206_v32 }
0x1456   :  { %v3249_v36 = vpop.permute.xlu1 %3248 }
0x1457   :  { %v3251_v24 = vadd.f32 %v3249_v36, %v5230_v21 }
0x1459   :  { %4163 = vtanh.f32 %v3251_v24 }
0x145a   :  { %4165 = vpow2.f32 %v3900_v43 }
0x145f   :  { %v4164_v60 = vpop.eup %4163 }
0x1460   :  { %3303 = vrot.lane.b32.xlu2 %v4164_v60, %s4467_s29  ;;  %v4166_v16 = vpop.eup %4165 }
0x1461   :  { %v3165_v44 = vadd.f32 1.0, %v4166_v16 }
0x1463   :  { %4167 = vrcp.f32 %v3165_v44  ;;  %v3177_v31 = vand.u32 2147483648, %v3165_v44  ;;  %vm3171_vm11 = vweird.f32 %v3165_v44  ;;  %v3175_v26 = vand.u32 2147483647, %v3165_v44 }
0x1464   :  { %4169 = vpow2.f32 %v3902_v58 }
0x1465   :  { %v3178_v29 = vor.u32 1.1754944e-38, %v3177_v31  ;;  %vm3176_vm14 = vcmp.eq.f32.partialorder %v3175_v26, 8.507059e+37 }
0x1468   :  { %3275 = vrot.lane.b32.xlu2 %v3274_v0, %s4469_s10 }
0x1469   :  { %v4168_v4 = vpop.eup %4167 }
0x146a   :  { %v3167_v49 = vmul.f32 %v4168_v4, %v3165_v44  ;;  %vm3172_vm10 = vweird.f32 %v4168_v4  ;;  %v4170_v25 = vpop.eup %4169 }
0x146b   :  { %vm3173_vm12 = vmor %vm3171_vm11, %vm3172_vm10  ;;  %v3210_v20 = vadd.f32 1.0, %v4170_v25 }
0x146c   :  { %v3168_v22 = vsub.f32 1.0, %v3167_v49 }
0x146d   :  { %4171 = vrcp.f32 %v3210_v20  ;;  %v3222_v57 = vand.u32 2147483648, %v3210_v20  ;;  %vm3216_vm0 = vweird.f32 %v3210_v20  ;;  %v3220_v56 = vand.u32 2147483647, %v3210_v20 }
0x146e   :  { %v3169_v38 = vmul.f32 %v4168_v4, %v3168_v22 }
0x146f   :  { %v3223_v12 = vor.u32 1.1754944e-38, %v3222_v57  ;;  %vm3221_vm2 = vcmp.eq.f32.partialorder %v3220_v56, 8.507059e+37 }
0x1470   :  { %v3170_v46 = vadd.f32 %v4168_v4, %v3169_v38 }
0x1472   :  { %v3174_v51 = vsel %vm3173_vm12, %v4168_v4, %v3170_v46 }
0x1473   :  { %v3179_v48 = vsel %vm3176_vm14, %v3178_v29, %v3174_v51  ;;  %v4172_v11 = vpop.eup %4171  ;;  %v175_v29 = vld [vmem:[%s5639_s7 + $0x18] sm:$0xff] }
0x1474   :  { %v3212_v8 = vmul.f32 %v4172_v11, %v3210_v20  ;;  %vm3217_vm15 = vweird.f32 %v4172_v11 }
0x1475   :  { %vm3218_vm1 = vmor %vm3216_vm0, %vm3217_vm15 }
0x1476   :  { %v3213_v53 = vsub.f32 1.0, %v3212_v8 }
0x1478   :  { %v3214_v13 = vmul.f32 %v4172_v11, %v3213_v53 }
0x147a   :  { %v3215_v47 = vadd.f32 %v4172_v11, %v3214_v13 }
0x147c   :  { %v3219_v2 = vsel %vm3218_vm1, %v4172_v11, %v3215_v47 }
0x147d   :  { %v3224_v55 = vsel %vm3221_vm2, %v3223_v12, %v3219_v2 }
0x147e   :  { %v3301_v62 = vmul.f32 %v3299_v59, %v3224_v55 }
0x1482   :  { %v3426_v23 = vpop.f32.mrf.mxu1 }
0x1488   :  { %v3365_v49 = vpop.f32.mrf.mxu3 }
0x148a   :  { %v3530_v31 = vpop.f32.mrf.mxu1 }
0x1490   :  { %v3487_v47 = vpop.f32.mrf.mxu3 }
0x14ba   :  { %v3304_v37 = vpop.permute.xlu2 %3303 }
0x14bb   :  { %v3306_v45 = vmul.f32 %v3304_v37, %v3179_v48  ;;  %v173_v48 = vld [vmem:[%s5639_s7 + $0x8] sm:$0xff] }
0x14bd   :  { %3308 = vrot.lane.b32.xlu1 %v3306_v45, %s4468_s30  ;;  %v172_v45 = vld [vmem:[%s5639_s7] sm:$0xff] }
0x14c2   :  { %v3276_v5 = vpop.permute.xlu2 %3275 }
0x14c3   :  { %v3278_v7 = vadd.f32 %v3276_v5, %v5230_v21 }
0x14c5   :  { %v3905_v9 = vmul.f32 -1.442695, %v3278_v7 }
0x152f   :  { %v3309_v61 = vpop.permute.xlu1 %3308 }
0x1530   :  { %v3311_v1 = vadd.f32 %v3309_v61, %v3301_v62 }
0x1532   :  { %4173 = vtanh.f32 %v3311_v1 }
0x1533   :  { %4175 = vpow2.f32 %v3905_v9 }
0x1538   :  { %v4174_v3 = vpop.eup %4173 }
0x1539   :  { %3314 = vrot.lane.b32.xlu0 %v4174_v3, %s4467_s29  ;;  %v4176_v15 = vpop.eup %4175 }
0x153a   :  { %v3282_v30 = vadd.f32 1.0, %v4176_v15 }
0x153c   :  { %4177 = vrcp.f32 %v3282_v30  ;;  %v3294_v42 = vand.u32 2147483648, %v3282_v30  ;;  %vm3288_vm4 = vweird.f32 %v3282_v30  ;;  %v3292_v39 = vand.u32 2147483647, %v3282_v30 }
0x153e   :  { %v3295_v36 = vor.u32 1.1754944e-38, %v3294_v42  ;;  %vm3293_vm6 = vcmp.eq.f32.partialorder %v3292_v39, 8.507059e+37 }
0x1542   :  { %v4178_v33 = vpop.eup %4177 }
0x1543   :  { %v3284_v34 = vmul.f32 %v4178_v33, %v3282_v30  ;;  %vm3289_vm3 = vweird.f32 %v4178_v33 }
0x1544   :  { %vm3290_vm5 = vmor %vm3288_vm4, %vm3289_vm3  ;;  %vm3614_vm4 = vcmask 1046528  }
0x1545   :  { %v3285_v17 = vsub.f32 1.0, %v3284_v34 }
0x1547   :  { %v3286_v41 = vmul.f32 %v4178_v33, %v3285_v17 }
0x1549   :  { %v3287_v28 = vadd.f32 %v4178_v33, %v3286_v41 }
0x154b   :  { %v3291_v54 = vsel %vm3290_vm5, %v4178_v33, %v3287_v28  ;;  %vm3659_vm5 = vcmask 1041409  }
0x154c   :  { %v3296_v24 = vsel %vm3293_vm6, %v3295_v36, %v3291_v54  ;;  %vm3662_vm6 = vcmask 58368  }
0x15ab   :  { %v3315_v21 = vpop.permute.xlu0 %3314 }
0x15ac   :  { %v3317_v60 = vmul.f32 %v3315_v21, %v3296_v24 }
0x15ae   :  { %v3319_v52 = vrot.slane %v3317_v60, 6 }
0x15b0   :  { %3320 = vrot.lane.b32.xlu1 %v3319_v52, %s4468_s30 }
0x1622   :  { %v3321_v0 = vpop.permute.xlu1 %3320 }
0x1623   :  { %3906 = vmatmul.msk.f32.vlgmr.msra.gmra.mxu2 %vm214_vm13, %v3321_v0  ;;  %3909 = vmatmul.msk.f32.vlgmr.msra.gmra.mxu0 %vm214_vm13, %v3321_v0 }
0x1624   :  { %3631 = vmatpush.msra.mxu2 %v175_v29 }
0x162b   :  { %3912 = vmatmul.msk.f32.vlgmr.msrb.gmra.mxu2 %vm214_vm13, %v3321_v0  ;;  %3914 = vmatmul.msk.f32.vlgmr.msrb.gmra.mxu0 %vm214_vm13, %v3321_v0 }
0x16a0   :  { %v3405_v27 = vpop.f32.mrf.mxu0 }
0x16a1   :  { %v3408_v19 = vadd.f32 %v5538_v10, %v3405_v27  ;;  %v174_v10 = vld [vmem:[%s5639_s7 + $0x10] sm:$0xff]  ;;  %s4471_s7 = smov [#allocation11]  }
0x16a2   :  { %3632 = vmatpush.msra.mxu2 %v174_v10  ;;  %s3757_s21 = sshll.u32 %s4471_s7, 4  ;;  %s3758_s21 = int_to_ptr.vmem [resolvable:$true] %s3757_s21 }
0x16a3   :  { %v3429_v43 = vadd.f32 %v3426_v23, %v3408_v19 }
0x16a4   :  { %3633 = vmatpush.msra.mxu2 %v173_v48 }
0x16a5   :  { %v3911_v16 = vmul.f32 -1.442695, %v3429_v43 }
0x16a6   :  { %v3341_v44 = vpop.f32.mrf.mxu2  ;;  %3634 = vmatpush.msra.mxu2 %v172_v45 }
0x16a7   :  { %4179 = vpow2.f32 %v3911_v16  ;;  %v3344_v4 = vadd.f32 %v5544_v35, %v3341_v44 }
0x16a8   :  { %v3509_v22 = vpop.f32.mrf.mxu0 }
0x16a9   :  { %v3368_v38 = vadd.f32 %v3365_v49, %v3344_v4  ;;  %v3512_v46 = vadd.f32 %v5550_v50, %v3509_v22 }
0x16ab   :  { %v3908_v26 = vmul.f32 -1.442695, %v3368_v38  ;;  %v3533_v51 = vadd.f32 %v3530_v31, %v3512_v46 }
0x16ad   :  { %v4180_v37 = vpop.eup %4179  ;;  %4181 = vpow2.f32 %v3908_v26  ;;  %v3916_v35 = vmul.f32 -1.442695, %v3533_v51 }
0x16ae   :  { %v3433_v50 = vadd.f32 1.0, %v4180_v37  ;;  %v3466_v25 = vpop.f32.mrf.mxu2  ;;  %v3655_v37 = vlaneseq }
0x16af   :  { %4183 = vpow2.f32 %v3916_v35  ;;  %v3469_v53 = vadd.f32 %v5558_v63, %v3466_v25 }
0x16b0   :  { %4185 = vrcp.f32 %v3433_v50  ;;  %v3445_v62 = vand.u32 2147483648, %v3433_v50  ;;  %vm3439_vm8 = vweird.f32 %v3433_v50  ;;  %v3443_v3 = vand.u32 2147483647, %v3433_v50 }
0x16b1   :  { %v3490_v2 = vadd.f32 %v3487_v47, %v3469_v53  ;;  %v3656_v35 = vand.u32 127, %v3655_v37 }
0x16b2   :  { %v3446_v15 = vor.u32 1.1754944e-38, %v3445_v62  ;;  %vm3444_vm12 = vcmp.eq.f32.partialorder %v3443_v3, 8.507059e+37 }
0x16b3   :  { %v4182_v18 = vpop.eup %4181 }
0x16b4   :  { %v3372_v32 = vadd.f32 1.0, %v4182_v18 }
0x16b5   :  { %v4184_v58 = vpop.eup %4183 }
0x16b6   :  { %v4186_v20 = vpop.eup %4185  ;;  %4187 = vrcp.f32 %v3372_v32  ;;  %v3537_v11 = vadd.f32 1.0, %v4184_v58  ;;  %v3384_v5 = vand.u32 2147483648, %v3372_v32  ;;  %v3382_v63 = vand.u32 2147483647, %v3372_v32 }
0x16b7   :  { %v3435_v8 = vmul.f32 %v4186_v20, %v3433_v50  ;;  %vm3440_vm7 = vweird.f32 %v4186_v20  ;;  %vm3378_vm11 = vweird.f32 %v3372_v32 }
0x16b8   :  { %4189 = vrcp.f32 %v3537_v11  ;;  %vm3441_vm9 = vmor %vm3439_vm8, %vm3440_vm7  ;;  %v3385_v34 = vor.u32 1.1754944e-38, %v3384_v5  ;;  %vm3383_vm15 = vcmp.eq.f32.partialorder %v3382_v63, 8.507059e+37  ;;  %v3549_v60 = vand.u32 2147483648, %v3537_v11 }
0x16b9   :  { %v3436_v13 = vsub.f32 1.0, %v3435_v8  ;;  %4191 = vtanh.f32 %v3490_v2  ;;  %vm3543_vm1 = vweird.f32 %v3537_v11  ;;  %v3547_v52 = vand.u32 2147483647, %v3537_v11 }
0x16ba   :  { %v3550_v23 = vor.u32 1.1754944e-38, %v3549_v60  ;;  %vm3734_vm7 = vcmask 517120  }
0x16bb   :  { %v3437_v57 = vmul.f32 %v4186_v20, %v3436_v13  ;;  %vm3548_vm3 = vcmp.eq.f32.partialorder %v3547_v52, 8.507059e+37 }
0x16bc   :  { %v4188_v56 = vpop.eup %4187 }
0x16bd   :  { %v3374_v12 = vmul.f32 %v4188_v56, %v3372_v32  ;;  %v3438_v55 = vadd.f32 %v4186_v20, %v3437_v57  ;;  %vm3379_vm10 = vweird.f32 %v4188_v56 }
0x16be   :  { %v4190_v59 = vpop.eup %4189  ;;  %vm3380_vm14 = vmor %vm3378_vm11, %vm3379_vm10 }
0x16bf   :  { %v3375_v61 = vsub.f32 1.0, %v3374_v12  ;;  %v3539_v1 = vmul.f32 %v4190_v59, %v3537_v11  ;;  %v3442_v9 = vsel %vm3441_vm9, %v4186_v20, %v3438_v55  ;;  %v4192_v28 = vpop.eup %4191  ;;  %vm3544_vm0 = vweird.f32 %v4190_v59 }
0x16c0   :  { %v3447_v17 = vsel %vm3444_vm12, %v3446_v15, %v3442_v9  ;;  %vm3545_vm2 = vmor %vm3543_vm1, %vm3544_vm0 }
0x16c1   :  { %v3376_v7 = vmul.f32 %v4188_v56, %v3375_v61  ;;  %v3540_v30 = vsub.f32 1.0, %v3539_v1  ;;  %v3553_v54 = vmul.f32 %v3447_v17, %v5562_v6 }
0x16c3   :  { %v3377_v33 = vadd.f32 %v4188_v56, %v3376_v7  ;;  %v3541_v42 = vmul.f32 %v4190_v59, %v3540_v30 }
0x16c5   :  { %v3381_v41 = vsel %vm3380_vm14, %v4188_v56, %v3377_v33  ;;  %v3542_v21 = vadd.f32 %v4190_v59, %v3541_v42 }
0x16c6   :  { %v3386_v39 = vsel %vm3383_vm15, %v3385_v34, %v3381_v41 }
0x16c7   :  { %v3554_v36 = vmul.f32 %v4192_v28, %v3386_v39  ;;  %v3546_v0 = vsel %vm3545_vm2, %v4190_v59, %v3542_v21 }
0x16c8   :  { %v3551_v19 = vsel %vm3548_vm3, %v3550_v23, %v3546_v0 }
0x16c9   :  { %v3555_v24 = vadd.f32 %v3554_v36, %v3553_v54 }
0x16cb   :  { %4193 = vtanh.f32 %v3555_v24 }
0x16d1   :  { %v4194_v27 = vpop.eup %4193 }
0x16d2   :  { %v3557_v43 = vmul.f32 %v4194_v27, %v3551_v19 }
0x16d4   :  { %3917 = vmatmul.msk.f32.vlgmr.msra.gmra.mxu2 %vm214_vm13, %v3557_v43  ;;  %v3567_v16 = vrot.slane %v3557_v43, 1  ;;  %v3592_v44 = vperm.slane %v3557_v43, 0 }
0x16d6   :  { %v3593_v4 = vperm.slane %v3567_v16, 0  ;;  %v5608_v38 = vsel %vm3614_vm4, %v5568_v40, %v3592_v44 }
0x16d8   :  { %v3616_v26 = vsel %vm3614_vm4, %v5571_v14, %v3593_v4  ;;  %v4470_v14 = vmov 0  }
0x16d9   :  { %3932 = vset.pattern.permute.xlu0 %v4470_v14  ;;  %3931 = vset.pattern.permute.xlu2 %v4470_v14 }
0x16da   :  { %3933 = vset.pattern.permute.xlu1 %v4470_v14 }
0x1757   :  { %v3636_v6 = vpop.f32.mrf.mxu2 }
0x1758   :  { %v3640_v49 = vrot.slane %v3636_v6, 1  ;;  %v3641_v22 = vperm.slane %v3636_v6, 0 }
0x175a   :  { %v3642_v46 = vperm.slane %v3640_v49, 0  ;;  %v3645_v31 = vmul.f32 %v3641_v22, %v5608_v38 }
0x175c   :  { %v3647_v51 = vsel %vm214_vm13, %v3645_v31, 0.0  ;;  %v3646_v29 = vmul.f32 %v3642_v46, %v3616_v26 }
0x175d   :  { %3648 = vadd.xlane.f32.xlu2 %v3647_v51 }
0x175e   :  { %v3650_v10 = vsel %vm214_vm13, %v3646_v29, 0.0 }
0x175f   :  { %3651 = vadd.xlane.f32.xlu0 %v3650_v10 }
0x17d0   :  { %v3649_v48 = vpop.xlane.xlu2 %3648 }
0x17d1   :  { %v3657_v45 = vperm.slane %v3649_v48, %v3656_v35 }
0x17d2   :  { %v3652_v50 = vpop.xlane.xlu0 %3651 }
0x17d3   :  { %v3658_v40 = vperm.slane %v3652_v50, %v3656_v35 }
0x17d5   :  { %v3660_v18 = vsel %vm3659_vm5, %v3658_v40, %v3657_v45 }
0x17d6   :  { %v3663_v32 = vsel %vm3662_vm6, %v3660_v18, -inf }
0x17d7   :  { %3664 = vmax.xlane.f32.xlu1 %v3663_v32 }
0x184a   :  { %v3665_v58 = vpop.xlane.xlu1 %3664 }
0x184b   :  { %v3667_v25 = vperm.slane %v3665_v58, 0  ;;  %v3668_v20 = vperm.slane %v3665_v58, 1 }
0x184d   :  { %v3671_v11 = vsub.f32 %v3649_v48, %v3667_v25  ;;  %v3672_v8 = vsub.f32 %v3652_v50, %v3668_v20 }
0x184f   :  { %v3673_v53 = vmul.f32 1.442695, %v3671_v11  ;;  %v3675_v13 = vmul.f32 1.442695, %v3672_v8 }
0x1851   :  { %4195 = vpow2.f32 %v3673_v53 }
0x1852   :  { %4197 = vpow2.f32 %v3675_v13 }
0x1857   :  { %v4196_v47 = vpop.eup %4195 }
0x1858   :  { %v4198_v57 = vpop.eup %4197  ;;  %3680 = vperm.xlu2 %3931, %v4196_v47  }
0x1859   :  { %3683 = vperm.xlu0 %3932, %v4198_v57  }
0x18b2   :  { %v3681_v56 = vpop.permute.xlu2 %3680 }
0x18b3   :  { %v3685_v12 = vperm.slane %v3681_v56, %v3656_v35 }
0x18cb   :  { %v3684_v2 = vpop.permute.xlu0 %3683 }
0x18cc   :  { %v3686_v55 = vperm.slane %v3684_v2, %v3656_v35 }
0x18ce   :  { %v3687_v59 = vsel %vm3659_vm5, %v3686_v55, %v3685_v12 }
0x18cf   :  { %v3689_v62 = vsel %vm3662_vm6, %v3687_v59, 0.0 }
0x18d0   :  { %3690 = vadd.xlane.f32.xlu1 %v3689_v62 }
0x1943   :  { %v3691_v61 = vpop.xlane.xlu1 %3690 }
0x1944   :  { %4199 = vrcp.f32 %v3691_v61 }
0x194a   :  { %v4200_v1 = vpop.eup %4199 }
0x194b   :  { %v3695_v3 = vperm.slane %v4200_v1, 1  ;;  %v3694_v5 = vperm.slane %v4200_v1, 0 }
0x194d   :  { %v3699_v7 = vmul.f32 %v4198_v57, %v3695_v3  ;;  %v3698_v63 = vmul.f32 %v4196_v47, %v3694_v5 }
0x194f   :  { %3707 = vperm.xlu2 %3931, %v3699_v7   ;;  %3702 = vperm.xlu1 %3933, %v3698_v63  }
0x1957   :  { %3730 = vrot.lane.b32.xlu2 %v3557_v43, %s4468_s30  ;;  %s3746_s30 = sshll.u32 %s4472_s9, 4  ;;  %s3747_s30 = int_to_ptr.vmem [resolvable:$true] %s3746_s30 }
0x19a9   :  { %v3708_v9 = vpop.permute.xlu2 %3707 }
0x19aa   :  { %v3711_v15 = vmul.f32 %v3708_v9, %v3616_v26  ;;  %v3737_v41 = vperm.slane %v3708_v9, %v3656_v35 }
0x19ac   :  { %v3719_v30 = vsel %vm214_vm13, %v3711_v15, 0.0 }
0x19ad   :  { %v3720_v33 = vrot.slane %v3719_v30, 4 }
0x19af   :  { %v3721_v34 = vadd.f32 %v3720_v33, %v3719_v30 }
0x19b1   :  { %v3722_v39 = vrot.slane %v3721_v34, 2  ;;  %v3731_v16 = vpop.permute.xlu2 %3730 }
0x19b3   :  { %v3723_v21 = vadd.f32 %v3722_v39, %v3721_v34 }
0x19b5   :  { %v3724_v0 = vrot.slane %v3723_v21, 1 }
0x19b7   :  { %v3725_v19 = vadd.f32 %v3724_v0, %v3723_v21 }
0x19c1   :  { %v3703_v17 = vpop.permute.xlu1 %3702 }
0x19c2   :  { %v3710_v28 = vmul.f32 %v3703_v17, %v5608_v38  ;;  %v3736_v42 = vperm.slane %v3703_v17, %v3656_v35 }
0x19c4   :  { %v3712_v54 = vsel %vm214_vm13, %v3710_v28, 0.0  ;;  %v3738_v36 = vsel %vm3659_vm5, %v3737_v41, %v3736_v42 }
0x19c5   :  { %v3713_v24 = vrot.slane %v3712_v54, 4  ;;  %3740 = vst.msk [vmem:[#allocation11] sm:$0x3] %vm3662_vm6, %v3738_v36 }
0x19c6   :  { %3762 = dma.vmem_to_hbm [thread:$0]  %s3758_s21, 32, %s3760_s3, [#allocation12]  }
0x19c7   :  { %v3714_v60 = vadd.f32 %v3713_v24, %v3712_v54 }
0x19c9   :  { %v3715_v52 = vrot.slane %v3714_v60, 2 }
0x19cb   :  { %v3716_v23 = vadd.f32 %v3715_v52, %v3714_v60 }
0x19cd   :  { %v3717_v27 = vrot.slane %v3716_v23, 1 }
0x19cf   :  { %v3718_v43 = vadd.f32 %v3717_v27, %v3716_v23 }
0x19d1   :  { %v3728_v44 = vsel %vm3659_vm5, %v3725_v19, %v3718_v43 }
0x19d2   :  { %v3733_v6 = vsel %vm214_vm13, %v3728_v44, %v3731_v16 }
0x19d3   :  { %3735 = vst.msk [vmem:[#allocation10] sm:$0x3] %vm3734_vm7, %v3733_v6 }
0x19d4   :  { %3751 = dma.vmem_to_hbm [thread:$0]  %s3747_s30, 32, %s3749_s26, [#allocation4]  }
0x19d5   :  { %4456 = dma.done.wait [#allocation4], 32  }
0x19d6   :  { %4457 = vsyncadd [#allocation4], 4294967264 }
0x19d7   :  { %4458 = dma.done.wait [#allocation12], 32  }
0x19d8   :  { %4459 = vsyncadd [#allocation12], 4294967264 }
0x19d9   :  { %3771 = vsyncpa [#allocation3], 1 }
0x19da   :  { %3772 = vsyncpa [#allocation6], 1 }
0x19db   :  { %3773 = vsyncpa [#allocation9], 1 }
0x19dc   :  { %3774 = vsyncpa [#allocation4], 1 }
0x19dd   :  { %3775 = vsyncpa [#allocation12], 1 }

</bundles_post_ra>
